<compile_context>
chip_gen: v6e
topology: v6e:2x2x1
jax: 0.10.0
libtpu: 0.0.40
codegen_flags: <defaults>
</compile_context>

<pallas_src>
import numpy as np
import jax
import jax.numpy as jnp
from jax.experimental import pallas as pl
from jax.experimental.pallas import tpu as pltpu


KSIZE, STRIDE, PAD = 3, 2, 1
C_PAD = 128          # lane-dense channel width (all channel dims padded to 128)
ROW_PAD = 16         # sublane-dense row padding (full (16,128) bf16 tiles)
N_TAPS = KSIZE * KSIZE


def _out_hw(h):
    return (h + 2 * PAD - KSIZE) // STRIDE + 1


def _round_up(x, m):
    return ((x + m - 1) // m) * m


# ----------------------------------------------------------------------------
# Host-side packing (done once at init, hoisted out of the forward pass)
# ----------------------------------------------------------------------------
def _pack_weights(w_hwio, b):
    """(3,3,Cin,Cout) HWIO -> K-concatenated im2col weight slab (9*128, 128)
    bf16 (channels zero-padded to 128 lanes per tap) + bias (1,128) f32."""
    cin, cout = int(w_hwio.shape[2]), int(w_hwio.shape[3])
    w_np = np.asarray(w_hwio, np.float32)
    wp = np.zeros((N_TAPS * C_PAD, C_PAD), np.float32)
    for kh in range(KSIZE):
        for kw in range(KSIZE):
            t = kh * KSIZE + kw
            wp[t * C_PAD:t * C_PAD + cin, :cout] = w_np[kh, kw]
    bp = np.zeros((1, C_PAD), np.float32)
    bp[0, :cout] = np.asarray(b, np.float32)
    return jnp.asarray(wp, jnp.bfloat16), jnp.asarray(bp, jnp.float32), cout


def _gather_tap_mats(h_in, w_in, rows_in_pad, rows_out_pad):
    """Per-tap 0/1 selection matrices (9, rows_out_pad, rows_in_pad), PER BATCH
    ITEM (batch is handled by the grid, not block-diagonally).  Stride/padding
    are folded in; columns for the previous block's row-padding stay zero so
    padded rows are ignored.  0/1 values are exact in bf16."""
    ho, wo = _out_hw(h_in), _out_hw(w_in)
    g = np.zeros((N_TAPS, rows_out_pad, rows_in_pad), np.float32)
    for kh in range(KSIZE):
        for kw in range(KSIZE):
            t = kh * KSIZE + kw
            for i in range(ho):
                hi = STRIDE * i + kh - PAD
                if not (0 <= hi < h_in):
                    continue
                for j in range(wo):
                    wi = STRIDE * j + kw - PAD
                    if 0 <= wi < w_in:
                        g[t, i * wo + j, hi * w_in + wi] = 1.0
    return jnp.asarray(g, jnp.bfloat16)


def init_encoder_params(in_channels, channels, key):
    """blocks[i] stored so that blocks[-1] is the FIRST-applied block, matching
    the PyTorch ModuleList convention used by Encoder.forward."""
    chain = [in_channels] + list(channels)
    params_applied = []
    for i in range(len(channels)):
        key, kw, kb = jax.random.split(key, 3)
        cin, cout = chain[i], chain[i + 1]
        w = jax.random.normal(kw, (3, 3, cin, cout), jnp.float32) * 0.1
        b = jax.random.normal(kb, (cout,), jnp.float32) * 0.01
        params_applied.append((w, b))
    return list(reversed(params_applied))


def pack_encoder(blocks, height, width):
    """Pre-pack weights/biases (and tiny per-batch tap-selection matrices for
    blocks 1..4) for the fused kernel.  Shapes are static per (height, width)."""
    applied = list(reversed(blocks))   # application order: blocks[-1] first
    packed = []
    h, w = height, width
    prev_rows_pad = None
    for idx, (wt, bt) in enumerate(applied):
        ho, wo = _out_hw(h), _out_hw(w)
        rows = ho * wo
        rows_pad = _round_up(max(rows, ROW_PAD), ROW_PAD)
        wp, bp, cout = _pack_weights(wt, bt)
        entry = dict(w=wp, b=bp, cout=cout, ho=ho, wo=wo,
                     rows=rows, rows_pad=rows_pad)
        if idx > 0:   # block 0's im2col comes pre-built from the wrapper
            entry["g"] = _gather_tap_mats(h, w, prev_rows_pad, rows_pad)
        packed.append(entry)
        h, w, prev_rows_pad = ho, wo, rows_pad
    return packed


def _im2col_input(x_nchw):
    """Boundary layout plumbing (XLA, outside the kernel): NCHW input ->
    lane-dense im2col slab (N, Ho*Wo, 9*128) bf16 for block 0."""
    n, c, h, w = x_nchw.shape
    ho, wo = _out_hw(h), _out_hw(w)
    xq = jnp.transpose(x_nchw, (0, 2, 3, 1))                        # NHWC
    xp = jnp.pad(xq, ((0, 0), (PAD, PAD), (PAD, PAD), (0, C_PAD - c)))
    taps = []
    for kh in range(KSIZE):
        for kw in range(KSIZE):
            taps.append(xp[:, kh:kh + STRIDE * ho:STRIDE,
                           kw:kw + STRIDE * wo:STRIDE, :])          # (N,Ho,Wo,128)
    cols = jnp.concatenate(taps, axis=-1)                           # (N,Ho,Wo,1152)
    return cols.reshape(n, ho * wo, N_TAPS * C_PAD).astype(jnp.bfloat16)


# ----------------------------------------------------------------------------
# Fused Pallas kernel: whole 5-block encoder for ONE batch item per grid step.
# refs = [cols0, w0, b0, (g, w, b) x 4, out x 5]; intermediates stay in VMEM.
# ----------------------------------------------------------------------------
def _encoder_kernel(*refs):
    n_blocks = len(refs) // 4          # 1 + 2 + 3*(n-1) + n == 4n
    x_ref, w0_ref, b0_ref = refs[0], refs[1], refs[2]
    tail = refs[3:3 + 3 * (n_blocks - 1)]
    out_refs = refs[3 + 3 * (n_blocks - 1):]

    def conv_block(cols_bf16, w_ref, b_ref, out_ref):
        # ONE K=9*128 MXU matmul per block, f32 accumulate, fused bias+ReLU.
        y = jnp.dot(cols_bf16, w_ref[...], preferred_element_type=jnp.float32)
        y = jnp.maximum(y + b_ref[...], 0.0).astype(jnp.bfloat16)
        out_ref[0] = y                 # full-tile lane/sublane-dense bf16 store
        return y                       # exactly what the next block consumes

    # Block 0: im2col slab was built in the wrapper -> single matmul.
    x = conv_block(x_ref[0], w0_ref, b0_ref, out_refs[0])

    # Blocks 1..4: tiny per-batch 0/1 tap selection (exact), lane-concatenated
    # into one K=1152 channel matmul per block.
    for i in range(n_blocks - 1):
        g_ref, w_ref, b_ref = tail[3 * i], tail[3 * i + 1], tail[3 * i + 2]
        taps = [
            jnp.dot(g_ref[t], x,
                    preferred_element_type=jnp.float32).astype(jnp.bfloat16)
            for t in range(N_TAPS)
        ]
        cols = jnp.concatenate(taps, axis=-1)          # (rows_pad, 9*128) bf16
        x = conv_block(cols, w_ref, b_ref, out_refs[i + 1])


def encoder_forward(packed, x_nchw):
    """Matches Encoder.forward: returns [x4, x3, x2, x1, x0] in NCHW (bf16)."""
    n = x_nchw.shape[0]
    cols0 = _im2col_input(x_nchw)

    args = [cols0, packed[0]["w"], packed[0]["b"]]
    in_specs = [
        pl.BlockSpec((1,) + cols0.shape[1:], lambda b: (b, 0, 0)),
        pl.BlockSpec(packed[0]["w"].shape, lambda b: (0, 0)),
        pl.BlockSpec(packed[0]["b"].shape, lambda b: (0, 0)),
    ]
    for blk in packed[1:]:
        args += [blk["g"], blk["w"], blk["b"]]
        in_specs += [
            pl.BlockSpec(blk["g"].shape, lambda b: (0, 0, 0)),
            pl.BlockSpec(blk["w"].shape, lambda b: (0, 0)),
            pl.BlockSpec(blk["b"].shape, lambda b: (0, 0)),
        ]

    out_shape = tuple(
        jax.ShapeDtypeStruct((n, blk["rows_pad"], C_PAD), jnp.bfloat16)
        for blk in packed)
    out_specs = tuple(
        pl.BlockSpec((1, blk["rows_pad"], C_PAD), lambda b: (b, 0, 0))
        for blk in packed)

    outs = pl.pallas_call(
        _encoder_kernel,
        out_shape=out_shape,
        grid_spec=pltpu.PrefetchScalarGridSpec(
            num_scalar_prefetch=0,
            grid=(n,),                                   # batch-parallel grid
            in_specs=in_specs,
            out_specs=out_specs),
        compiler_params=pltpu.CompilerParams(
            dimension_semantics=("parallel",),           # 2 TCs on v7x
            vmem_limit_bytes=32 * 1024 * 1024),
    )(*args)

    feats = []
    for blk, o in zip(packed, outs):
        f = o[:, :blk["rows"], :blk["cout"]]             # drop row/lane padding
        f = f.reshape(n, blk["ho"], blk["wo"], blk["cout"])
        feats.append(jnp.transpose(f, (0, 3, 1, 2)))     # back to NCHW
    return feats[::-1]                                   # [x4, x3, x2, x1, x0]


# ----------------------------------------------------------------------------
# Plain-JAX f32 reference (numerical sanity check against the bf16 kernel)
# ----------------------------------------------------------------------------
def _reference_forward(blocks, x_nchw):
    x = jnp.transpose(x_nchw, (0, 2, 3, 1))
    feats = []
    for (wt, bt) in reversed(blocks):                    # application order
        x = jax.lax.conv_general_dilated(
            x, wt, window_strides=(STRIDE, STRIDE),
            padding=((PAD, PAD), (PAD, PAD)),
            dimension_numbers=("NHWC", "HWIO", "NHWC"))
        x = jnp.maximum(x + bt, 0.0)
        feats.append(x)
    return [jnp.transpose(f, (0, 3, 1, 2)) for f in feats][::-1]


if __name__ == "__main__":
    key = jax.random.PRNGKey(0)
    key, kx = jax.random.split(key)

    # Small shapes: N=2, Cin=4, H=W=16; channel pyramid 8,16,32,32,32
    x = jax.random.normal(kx, (2, 4, 16, 16), jnp.float32)
    channels = [8, 16, 32, 32, 32]
    blocks = init_encoder_params(4, channels, key)
    packed = pack_encoder(blocks, height=16, width=16)

    fwd = jax.jit(lambda inp: encoder_forward(packed, inp))
    outs = fwd(x)
    outs = [jax.block_until_ready(o) for o in outs]

    # Expected spatial pyramid (stride-2 per block): 16->8->4->2->1->1
    expected = [
        (2, 32, 1, 1),   # x4
        (2, 32, 1, 1),   # x3
        (2, 32, 2, 2),   # x2
        (2, 16, 4, 4),   # x1
        (2, 8, 8, 8),    # x0
    ]
    assert [tuple(o.shape) for o in outs] == expected, \
        [tuple(o.shape) for o in outs]

    got_np = [np.asarray(o).astype(np.float32) for o in outs]
    assert all(np.all(np.isfinite(g)) for g in got_np)

    # Numerical check vs f32 reference conv (tolerances cover bf16 rounding)
    ref_outs = _reference_forward(blocks, x)
    for got, want in zip(got_np, ref_outs):
        np.testing.assert_allclose(got, np.asarray(want),
                                   rtol=5e-2, atol=5e-2)

    print("KERNEL_OK")
</pallas_src>

<mosaic_0001>
module attributes {stable_mosaic.version = 11 : i64} {
  func.func @_encoder_kernel(%arg0: i32, %arg1: memref<1x64x1152xbf16, #tpu.memory_space<vmem>>, %arg2: memref<1152x128xbf16, #tpu.memory_space<vmem>>, %arg3: memref<1x128xf32, #tpu.memory_space<vmem>>, %arg4: memref<9x16x64xbf16, #tpu.memory_space<vmem>>, %arg5: memref<1152x128xbf16, #tpu.memory_space<vmem>>, %arg6: memref<1x128xf32, #tpu.memory_space<vmem>>, %arg7: memref<9x16x16xbf16, #tpu.memory_space<vmem>>, %arg8: memref<1152x128xbf16, #tpu.memory_space<vmem>>, %arg9: memref<1x128xf32, #tpu.memory_space<vmem>>, %arg10: memref<9x16x16xbf16, #tpu.memory_space<vmem>>, %arg11: memref<1152x128xbf16, #tpu.memory_space<vmem>>, %arg12: memref<1x128xf32, #tpu.memory_space<vmem>>, %arg13: memref<9x16x16xbf16, #tpu.memory_space<vmem>>, %arg14: memref<1152x128xbf16, #tpu.memory_space<vmem>>, %arg15: memref<1x128xf32, #tpu.memory_space<vmem>>, %arg16: memref<1x64x128xbf16, #tpu.memory_space<vmem>>, %arg17: memref<1x16x128xbf16, #tpu.memory_space<vmem>>, %arg18: memref<1x16x128xbf16, #tpu.memory_space<vmem>>, %arg19: memref<1x16x128xbf16, #tpu.memory_space<vmem>>, %arg20: memref<1x16x128xbf16, #tpu.memory_space<vmem>>) attributes {dimension_semantics = [#tpu.dimension_semantics<parallel>], iteration_bounds = array<i64: 2>, scalar_prefetch = 0 : i64, scratch_operands = 0 : i64, tpu.core_type = #tpu.core_type<tc>, window_params = [{transform_indices = @transform_0, window_bounds = array<i64: 1, 64, 1152>}, {pipeline_mode = #tpu.pipeline_mode<synchronous>, transform_indices = @transform_1, window_bounds = array<i64: 1152, 128>}, {pipeline_mode = #tpu.pipeline_mode<synchronous>, transform_indices = @transform_2, window_bounds = array<i64: 1, 128>}, {pipeline_mode = #tpu.pipeline_mode<synchronous>, transform_indices = @transform_3, window_bounds = array<i64: 9, 16, 64>}, {pipeline_mode = #tpu.pipeline_mode<synchronous>, transform_indices = @transform_4, window_bounds = array<i64: 1152, 128>}, {pipeline_mode = #tpu.pipeline_mode<synchronous>, transform_indices = @transform_5, window_bounds = array<i64: 1, 128>}, {pipeline_mode = #tpu.pipeline_mode<synchronous>, transform_indices = @transform_6, window_bounds = array<i64: 9, 16, 16>}, {pipeline_mode = #tpu.pipeline_mode<synchronous>, transform_indices = @transform_7, window_bounds = array<i64: 1152, 128>}, {pipeline_mode = #tpu.pipeline_mode<synchronous>, transform_indices = @transform_8, window_bounds = array<i64: 1, 128>}, {pipeline_mode = #tpu.pipeline_mode<synchronous>, transform_indices = @transform_9, window_bounds = array<i64: 9, 16, 16>}, {pipeline_mode = #tpu.pipeline_mode<synchronous>, transform_indices = @transform_10, window_bounds = array<i64: 1152, 128>}, {pipeline_mode = #tpu.pipeline_mode<synchronous>, transform_indices = @transform_11, window_bounds = array<i64: 1, 128>}, {pipeline_mode = #tpu.pipeline_mode<synchronous>, transform_indices = @transform_12, window_bounds = array<i64: 9, 16, 16>}, {pipeline_mode = #tpu.pipeline_mode<synchronous>, transform_indices = @transform_13, window_bounds = array<i64: 1152, 128>}, {pipeline_mode = #tpu.pipeline_mode<synchronous>, transform_indices = @transform_14, window_bounds = array<i64: 1, 128>}, {transform_indices = @transform_15, window_bounds = array<i64: 1, 64, 128>}, {transform_indices = @transform_16, window_bounds = array<i64: 1, 16, 128>}, {transform_indices = @transform_17, window_bounds = array<i64: 1, 16, 128>}, {transform_indices = @transform_18, window_bounds = array<i64: 1, 16, 128>}, {transform_indices = @transform_19, window_bounds = array<i64: 1, 16, 128>}]} {
    %c0 = arith.constant 0 : index
    %c0_0 = arith.constant 0 : index
    %c0_1 = arith.constant 0 : index
    %0 = vector.load %arg1[%c0, %c0_0, %c0_1] : memref<1x64x1152xbf16, #tpu.memory_space<vmem>>, vector<1x64x1152xbf16>
    %1 = vector.shape_cast %0 : vector<1x64x1152xbf16> to vector<64x1152xbf16>
    %c0_2 = arith.constant 0 : index
    %c0_3 = arith.constant 0 : index
    %2 = vector.load %arg2[%c0_2, %c0_3] : memref<1152x128xbf16, #tpu.memory_space<vmem>>, vector<1152x128xbf16>
    %cst = arith.constant dense<0.000000e+00> : vector<64x128xf32>
    %3 = tpu.matmul %1, %2, %cst {dimension_numbers = #tpu.dot_dimension_numbers<[1], [0], [0], [1], [0, 0, 1, 1], [], []>} : vector<64x1152xbf16>, vector<1152x128xbf16>, vector<64x128xf32> -> vector<64x128xf32>
    %c0_4 = arith.constant 0 : index
    %c0_5 = arith.constant 0 : index
    %4 = vector.load %arg3[%c0_4, %c0_5] : memref<1x128xf32, #tpu.memory_space<vmem>>, vector<1x128xf32>
    %5 = vector.broadcast %4 : vector<1x128xf32> to vector<64x128xf32>
    %6 = arith.addf %3, %5 : vector<64x128xf32>
    %cst_6 = arith.constant 0.000000e+00 : f32
    %7 = vector.broadcast %cst_6 : f32 to vector<64x128xf32>
    %8 = arith.maximumf %6, %7 : vector<64x128xf32>
    %9 = arith.truncf %8 : vector<64x128xf32> to vector<64x128xbf16>
    %c0_7 = arith.constant 0 : index
    %c0_8 = arith.constant 0 : index
    %c0_9 = arith.constant 0 : index
    %10 = vector.load %arg16[%c0_7, %c0_8, %c0_9] : memref<1x64x128xbf16, #tpu.memory_space<vmem>>, vector<1x64x128xbf16>
    %11 = vector.shape_cast %10 : vector<1x64x128xbf16> to vector<64x128xbf16>
    %12 = vector.shape_cast %9 : vector<64x128xbf16> to vector<1x64x128xbf16>
    tpu.vector_store %arg16[%c0_7, %c0_8, %c0_9], %12 {strides = array<i32>} : memref<1x64x128xbf16, #tpu.memory_space<vmem>>, vector<1x64x128xbf16>,
    %c0_10 = arith.constant 0 : index
    %c0_11 = arith.constant 0 : index
    %c0_12 = arith.constant 0 : index
    %13 = vector.load %arg4[%c0_10, %c0_11, %c0_12] : memref<9x16x64xbf16, #tpu.memory_space<vmem>>, vector<1x16x64xbf16>
    %14 = vector.shape_cast %13 : vector<1x16x64xbf16> to vector<16x64xbf16>
    %cst_13 = arith.constant dense<0.000000e+00> : vector<16x128xf32>
    %15 = tpu.matmul %14, %9, %cst_13 {dimension_numbers = #tpu.dot_dimension_numbers<[1], [0], [0], [1], [0, 0, 1, 1], [], []>} : vector<16x64xbf16>, vector<64x128xbf16>, vector<16x128xf32> -> vector<16x128xf32>
    %16 = arith.truncf %15 : vector<16x128xf32> to vector<16x128xbf16>
    %c1 = arith.constant 1 : index
    %c0_14 = arith.constant 0 : index
    %c0_15 = arith.constant 0 : index
    %17 = vector.load %arg4[%c1, %c0_14, %c0_15] : memref<9x16x64xbf16, #tpu.memory_space<vmem>>, vector<1x16x64xbf16>
    %18 = vector.shape_cast %17 : vector<1x16x64xbf16> to vector<16x64xbf16>
    %cst_16 = arith.constant dense<0.000000e+00> : vector<16x128xf32>
    %19 = tpu.matmul %18, %9, %cst_16 {dimension_numbers = #tpu.dot_dimension_numbers<[1], [0], [0], [1], [0, 0, 1, 1], [], []>} : vector<16x64xbf16>, vector<64x128xbf16>, vector<16x128xf32> -> vector<16x128xf32>
    %20 = arith.truncf %19 : vector<16x128xf32> to vector<16x128xbf16>
    %c2 = arith.constant 2 : index
    %c0_17 = arith.constant 0 : index
    %c0_18 = arith.constant 0 : index
    %21 = vector.load %arg4[%c2, %c0_17, %c0_18] : memref<9x16x64xbf16, #tpu.memory_space<vmem>>, vector<1x16x64xbf16>
    %22 = vector.shape_cast %21 : vector<1x16x64xbf16> to vector<16x64xbf16>
    %cst_19 = arith.constant dense<0.000000e+00> : vector<16x128xf32>
    %23 = tpu.matmul %22, %9, %cst_19 {dimension_numbers = #tpu.dot_dimension_numbers<[1], [0], [0], [1], [0, 0, 1, 1], [], []>} : vector<16x64xbf16>, vector<64x128xbf16>, vector<16x128xf32> -> vector<16x128xf32>
    %24 = arith.truncf %23 : vector<16x128xf32> to vector<16x128xbf16>
    %c3 = arith.constant 3 : index
    %c0_20 = arith.constant 0 : index
    %c0_21 = arith.constant 0 : index
    %25 = vector.load %arg4[%c3, %c0_20, %c0_21] : memref<9x16x64xbf16, #tpu.memory_space<vmem>>, vector<1x16x64xbf16>
    %26 = vector.shape_cast %25 : vector<1x16x64xbf16> to vector<16x64xbf16>
    %cst_22 = arith.constant dense<0.000000e+00> : vector<16x128xf32>
    %27 = tpu.matmul %26, %9, %cst_22 {dimension_numbers = #tpu.dot_dimension_numbers<[1], [0], [0], [1], [0, 0, 1, 1], [], []>} : vector<16x64xbf16>, vector<64x128xbf16>, vector<16x128xf32> -> vector<16x128xf32>
    %28 = arith.truncf %27 : vector<16x128xf32> to vector<16x128xbf16>
    %c4 = arith.constant 4 : index
    %c0_23 = arith.constant 0 : index
    %c0_24 = arith.constant 0 : index
    %29 = vector.load %arg4[%c4, %c0_23, %c0_24] : memref<9x16x64xbf16, #tpu.memory_space<vmem>>, vector<1x16x64xbf16>
    %30 = vector.shape_cast %29 : vector<1x16x64xbf16> to vector<16x64xbf16>
    %cst_25 = arith.constant dense<0.000000e+00> : vector<16x128xf32>
    %31 = tpu.matmul %30, %9, %cst_25 {dimension_numbers = #tpu.dot_dimension_numbers<[1], [0], [0], [1], [0, 0, 1, 1], [], []>} : vector<16x64xbf16>, vector<64x128xbf16>, vector<16x128xf32> -> vector<16x128xf32>
    %32 = arith.truncf %31 : vector<16x128xf32> to vector<16x128xbf16>
    %c5 = arith.constant 5 : index
    %c0_26 = arith.constant 0 : index
    %c0_27 = arith.constant 0 : index
    %33 = vector.load %arg4[%c5, %c0_26, %c0_27] : memref<9x16x64xbf16, #tpu.memory_space<vmem>>, vector<1x16x64xbf16>
    %34 = vector.shape_cast %33 : vector<1x16x64xbf16> to vector<16x64xbf16>
    %cst_28 = arith.constant dense<0.000000e+00> : vector<16x128xf32>
    %35 = tpu.matmul %34, %9, %cst_28 {dimension_numbers = #tpu.dot_dimension_numbers<[1], [0], [0], [1], [0, 0, 1, 1], [], []>} : vector<16x64xbf16>, vector<64x128xbf16>, vector<16x128xf32> -> vector<16x128xf32>
    %36 = arith.truncf %35 : vector<16x128xf32> to vector<16x128xbf16>
    %c6 = arith.constant 6 : index
    %c0_29 = arith.constant 0 : index
    %c0_30 = arith.constant 0 : index
    %37 = vector.load %arg4[%c6, %c0_29, %c0_30] : memref<9x16x64xbf16, #tpu.memory_space<vmem>>, vector<1x16x64xbf16>
    %38 = vector.shape_cast %37 : vector<1x16x64xbf16> to vector<16x64xbf16>
    %cst_31 = arith.constant dense<0.000000e+00> : vector<16x128xf32>
    %39 = tpu.matmul %38, %9, %cst_31 {dimension_numbers = #tpu.dot_dimension_numbers<[1], [0], [0], [1], [0, 0, 1, 1], [], []>} : vector<16x64xbf16>, vector<64x128xbf16>, vector<16x128xf32> -> vector<16x128xf32>
    %40 = arith.truncf %39 : vector<16x128xf32> to vector<16x128xbf16>
    %c7 = arith.constant 7 : index
    %c0_32 = arith.constant 0 : index
    %c0_33 = arith.constant 0 : index
    %41 = vector.load %arg4[%c7, %c0_32, %c0_33] : memref<9x16x64xbf16, #tpu.memory_space<vmem>>, vector<1x16x64xbf16>
    %42 = vector.shape_cast %41 : vector<1x16x64xbf16> to vector<16x64xbf16>
    %cst_34 = arith.constant dense<0.000000e+00> : vector<16x128xf32>
    %43 = tpu.matmul %42, %9, %cst_34 {dimension_numbers = #tpu.dot_dimension_numbers<[1], [0], [0], [1], [0, 0, 1, 1], [], []>} : vector<16x64xbf16>, vector<64x128xbf16>, vector<16x128xf32> -> vector<16x128xf32>
    %44 = arith.truncf %43 : vector<16x128xf32> to vector<16x128xbf16>
    %c8 = arith.constant 8 : index
    %c0_35 = arith.constant 0 : index
    %c0_36 = arith.constant 0 : index
    %45 = vector.load %arg4[%c8, %c0_35, %c0_36] : memref<9x16x64xbf16, #tpu.memory_space<vmem>>, vector<1x16x64xbf16>
    %46 = vector.shape_cast %45 : vector<1x16x64xbf16> to vector<16x64xbf16>
    %cst_37 = arith.constant dense<0.000000e+00> : vector<16x128xf32>
    %47 = tpu.matmul %46, %9, %cst_37 {dimension_numbers = #tpu.dot_dimension_numbers<[1], [0], [0], [1], [0, 0, 1, 1], [], []>} : vector<16x64xbf16>, vector<64x128xbf16>, vector<16x128xf32> -> vector<16x128xf32>
    %48 = arith.truncf %47 : vector<16x128xf32> to vector<16x128xbf16>
    %49 = tpu.concatenate %16, %20, %24, %28, %32, %36, %40, %44, %48 in 1 : vector<16x128xbf16>, vector<16x128xbf16>, vector<16x128xbf16>, vector<16x128xbf16>, vector<16x128xbf16>, vector<16x128xbf16>, vector<16x128xbf16>, vector<16x128xbf16>, vector<16x128xbf16> -> vector<16x1152xbf16>
    %c0_38 = arith.constant 0 : index
    %c0_39 = arith.constant 0 : index
    %50 = vector.load %arg5[%c0_38, %c0_39] : memref<1152x128xbf16, #tpu.memory_space<vmem>>, vector<1152x128xbf16>
    %cst_40 = arith.constant dense<0.000000e+00> : vector<16x128xf32>
    %51 = tpu.matmul %49, %50, %cst_40 {dimension_numbers = #tpu.dot_dimension_numbers<[1], [0], [0], [1], [0, 0, 1, 1], [], []>} : vector<16x1152xbf16>, vector<1152x128xbf16>, vector<16x128xf32> -> vector<16x128xf32>
    %c0_41 = arith.constant 0 : index
    %c0_42 = arith.constant 0 : index
    %52 = vector.load %arg6[%c0_41, %c0_42] : memref<1x128xf32, #tpu.memory_space<vmem>>, vector<1x128xf32>
    %53 = vector.broadcast %52 : vector<1x128xf32> to vector<16x128xf32>
    %54 = arith.addf %51, %53 : vector<16x128xf32>
    %cst_43 = arith.constant 0.000000e+00 : f32
    %55 = vector.broadcast %cst_43 : f32 to vector<16x128xf32>
    %56 = arith.maximumf %54, %55 : vector<16x128xf32>
    %57 = arith.truncf %56 : vector<16x128xf32> to vector<16x128xbf16>
    %c0_44 = arith.constant 0 : index
    %c0_45 = arith.constant 0 : index
    %c0_46 = arith.constant 0 : index
    %58 = vector.load %arg17[%c0_44, %c0_45, %c0_46] : memref<1x16x128xbf16, #tpu.memory_space<vmem>>, vector<1x16x128xbf16>
    %59 = vector.shape_cast %58 : vector<1x16x128xbf16> to vector<16x128xbf16>
    %60 = vector.shape_cast %57 : vector<16x128xbf16> to vector<1x16x128xbf16>
    tpu.vector_store %arg17[%c0_44, %c0_45, %c0_46], %60 {strides = array<i32>} : memref<1x16x128xbf16, #tpu.memory_space<vmem>>, vector<1x16x128xbf16>,
    %c0_47 = arith.constant 0 : index
    %c0_48 = arith.constant 0 : index
    %c0_49 = arith.constant 0 : index
    %61 = vector.load %arg7[%c0_47, %c0_48, %c0_49] : memref<9x16x16xbf16, #tpu.memory_space<vmem>>, vector<1x16x16xbf16>
    %62 = vector.shape_cast %61 : vector<1x16x16xbf16> to vector<16x16xbf16>
    %cst_50 = arith.constant dense<0.000000e+00> : vector<16x128xf32>
    %63 = tpu.matmul %62, %57, %cst_50 {dimension_numbers = #tpu.dot_dimension_numbers<[1], [0], [0], [1], [0, 0, 1, 1], [], []>} : vector<16x16xbf16>, vector<16x128xbf16>, vector<16x128xf32> -> vector<16x128xf32>
    %64 = arith.truncf %63 : vector<16x128xf32> to vector<16x128xbf16>
    %c1_51 = arith.constant 1 : index
    %c0_52 = arith.constant 0 : index
    %c0_53 = arith.constant 0 : index
    %65 = vector.load %arg7[%c1_51, %c0_52, %c0_53] : memref<9x16x16xbf16, #tpu.memory_space<vmem>>, vector<1x16x16xbf16>
    %66 = vector.shape_cast %65 : vector<1x16x16xbf16> to vector<16x16xbf16>
    %cst_54 = arith.constant dense<0.000000e+00> : vector<16x128xf32>
    %67 = tpu.matmul %66, %57, %cst_54 {dimension_numbers = #tpu.dot_dimension_numbers<[1], [0], [0], [1], [0, 0, 1, 1], [], []>} : vector<16x16xbf16>, vector<16x128xbf16>, vector<16x128xf32> -> vector<16x128xf32>
    %68 = arith.truncf %67 : vector<16x128xf32> to vector<16x128xbf16>
    %c2_55 = arith.constant 2 : index
    %c0_56 = arith.constant 0 : index
    %c0_57 = arith.constant 0 : index
    %69 = vector.load %arg7[%c2_55, %c0_56, %c0_57] : memref<9x16x16xbf16, #tpu.memory_space<vmem>>, vector<1x16x16xbf16>
    %70 = vector.shape_cast %69 : vector<1x16x16xbf16> to vector<16x16xbf16>
    %cst_58 = arith.constant dense<0.000000e+00> : vector<16x128xf32>
    %71 = tpu.matmul %70, %57, %cst_58 {dimension_numbers = #tpu.dot_dimension_numbers<[1], [0], [0], [1], [0, 0, 1, 1], [], []>} : vector<16x16xbf16>, vector<16x128xbf16>, vector<16x128xf32> -> vector<16x128xf32>
    %72 = arith.truncf %71 : vector<16x128xf32> to vector<16x128xbf16>
    %c3_59 = arith.constant 3 : index
    %c0_60 = arith.constant 0 : index
    %c0_61 = arith.constant 0 : index
    %73 = vector.load %arg7[%c3_59, %c0_60, %c0_61] : memref<9x16x16xbf16, #tpu.memory_space<vmem>>, vector<1x16x16xbf16>
    %74 = vector.shape_cast %73 : vector<1x16x16xbf16> to vector<16x16xbf16>
    %cst_62 = arith.constant dense<0.000000e+00> : vector<16x128xf32>
    %75 = tpu.matmul %74, %57, %cst_62 {dimension_numbers = #tpu.dot_dimension_numbers<[1], [0], [0], [1], [0, 0, 1, 1], [], []>} : vector<16x16xbf16>, vector<16x128xbf16>, vector<16x128xf32> -> vector<16x128xf32>
    %76 = arith.truncf %75 : vector<16x128xf32> to vector<16x128xbf16>
    %c4_63 = arith.constant 4 : index
    %c0_64 = arith.constant 0 : index
    %c0_65 = arith.constant 0 : index
    %77 = vector.load %arg7[%c4_63, %c0_64, %c0_65] : memref<9x16x16xbf16, #tpu.memory_space<vmem>>, vector<1x16x16xbf16>
    %78 = vector.shape_cast %77 : vector<1x16x16xbf16> to vector<16x16xbf16>
    %cst_66 = arith.constant dense<0.000000e+00> : vector<16x128xf32>
    %79 = tpu.matmul %78, %57, %cst_66 {dimension_numbers = #tpu.dot_dimension_numbers<[1], [0], [0], [1], [0, 0, 1, 1], [], []>} : vector<16x16xbf16>, vector<16x128xbf16>, vector<16x128xf32> -> vector<16x128xf32>
    %80 = arith.truncf %79 : vector<16x128xf32> to vector<16x128xbf16>
    %c5_67 = arith.constant 5 : index
    %c0_68 = arith.constant 0 : index
    %c0_69 = arith.constant 0 : index
    %81 = vector.load %arg7[%c5_67, %c0_68, %c0_69] : memref<9x16x16xbf16, #tpu.memory_space<vmem>>, vector<1x16x16xbf16>
    %82 = vector.shape_cast %81 : vector<1x16x16xbf16> to vector<16x16xbf16>
    %cst_70 = arith.constant dense<0.000000e+00> : vector<16x128xf32>
    %83 = tpu.matmul %82, %57, %cst_70 {dimension_numbers = #tpu.dot_dimension_numbers<[1], [0], [0], [1], [0, 0, 1, 1], [], []>} : vector<16x16xbf16>, vector<16x128xbf16>, vector<16x128xf32> -> vector<16x128xf32>
    %84 = arith.truncf %83 : vector<16x128xf32> to vector<16x128xbf16>
    %c6_71 = arith.constant 6 : index
    %c0_72 = arith.constant 0 : index
    %c0_73 = arith.constant 0 : index
    %85 = vector.load %arg7[%c6_71, %c0_72, %c0_73] : memref<9x16x16xbf16, #tpu.memory_space<vmem>>, vector<1x16x16xbf16>
    %86 = vector.shape_cast %85 : vector<1x16x16xbf16> to vector<16x16xbf16>
    %cst_74 = arith.constant dense<0.000000e+00> : vector<16x128xf32>
    %87 = tpu.matmul %86, %57, %cst_74 {dimension_numbers = #tpu.dot_dimension_numbers<[1], [0], [0], [1], [0, 0, 1, 1], [], []>} : vector<16x16xbf16>, vector<16x128xbf16>, vector<16x128xf32> -> vector<16x128xf32>
    %88 = arith.truncf %87 : vector<16x128xf32> to vector<16x128xbf16>
    %c7_75 = arith.constant 7 : index
    %c0_76 = arith.constant 0 : index
    %c0_77 = arith.constant 0 : index
    %89 = vector.load %arg7[%c7_75, %c0_76, %c0_77] : memref<9x16x16xbf16, #tpu.memory_space<vmem>>, vector<1x16x16xbf16>
    %90 = vector.shape_cast %89 : vector<1x16x16xbf16> to vector<16x16xbf16>
    %cst_78 = arith.constant dense<0.000000e+00> : vector<16x128xf32>
    %91 = tpu.matmul %90, %57, %cst_78 {dimension_numbers = #tpu.dot_dimension_numbers<[1], [0], [0], [1], [0, 0, 1, 1], [], []>} : vector<16x16xbf16>, vector<16x128xbf16>, vector<16x128xf32> -> vector<16x128xf32>
    %92 = arith.truncf %91 : vector<16x128xf32> to vector<16x128xbf16>
    %c8_79 = arith.constant 8 : index
    %c0_80 = arith.constant 0 : index
    %c0_81 = arith.constant 0 : index
    %93 = vector.load %arg7[%c8_79, %c0_80, %c0_81] : memref<9x16x16xbf16, #tpu.memory_space<vmem>>, vector<1x16x16xbf16>
    %94 = vector.shape_cast %93 : vector<1x16x16xbf16> to vector<16x16xbf16>
    %cst_82 = arith.constant dense<0.000000e+00> : vector<16x128xf32>
    %95 = tpu.matmul %94, %57, %cst_82 {dimension_numbers = #tpu.dot_dimension_numbers<[1], [0], [0], [1], [0, 0, 1, 1], [], []>} : vector<16x16xbf16>, vector<16x128xbf16>, vector<16x128xf32> -> vector<16x128xf32>
    %96 = arith.truncf %95 : vector<16x128xf32> to vector<16x128xbf16>
    %97 = tpu.concatenate %64, %68, %72, %76, %80, %84, %88, %92, %96 in 1 : vector<16x128xbf16>, vector<16x128xbf16>, vector<16x128xbf16>, vector<16x128xbf16>, vector<16x128xbf16>, vector<16x128xbf16>, vector<16x128xbf16>, vector<16x128xbf16>, vector<16x128xbf16> -> vector<16x1152xbf16>
    %c0_83 = arith.constant 0 : index
    %c0_84 = arith.constant 0 : index
    %98 = vector.load %arg8[%c0_83, %c0_84] : memref<1152x128xbf16, #tpu.memory_space<vmem>>, vector<1152x128xbf16>
    %cst_85 = arith.constant dense<0.000000e+00> : vector<16x128xf32>
    %99 = tpu.matmul %97, %98, %cst_85 {dimension_numbers = #tpu.dot_dimension_numbers<[1], [0], [0], [1], [0, 0, 1, 1], [], []>} : vector<16x1152xbf16>, vector<1152x128xbf16>, vector<16x128xf32> -> vector<16x128xf32>
    %c0_86 = arith.constant 0 : index
    %c0_87 = arith.constant 0 : index
    %100 = vector.load %arg9[%c0_86, %c0_87] : memref<1x128xf32, #tpu.memory_space<vmem>>, vector<1x128xf32>
    %101 = vector.broadcast %100 : vector<1x128xf32> to vector<16x128xf32>
    %102 = arith.addf %99, %101 : vector<16x128xf32>
    %cst_88 = arith.constant 0.000000e+00 : f32
    %103 = vector.broadcast %cst_88 : f32 to vector<16x128xf32>
    %104 = arith.maximumf %102, %103 : vector<16x128xf32>
    %105 = arith.truncf %104 : vector<16x128xf32> to vector<16x128xbf16>
    %c0_89 = arith.constant 0 : index
    %c0_90 = arith.constant 0 : index
    %c0_91 = arith.constant 0 : index
    %106 = vector.load %arg18[%c0_89, %c0_90, %c0_91] : memref<1x16x128xbf16, #tpu.memory_space<vmem>>, vector<1x16x128xbf16>
    %107 = vector.shape_cast %106 : vector<1x16x128xbf16> to vector<16x128xbf16>
    %108 = vector.shape_cast %105 : vector<16x128xbf16> to vector<1x16x128xbf16>
    tpu.vector_store %arg18[%c0_89, %c0_90, %c0_91], %108 {strides = array<i32>} : memref<1x16x128xbf16, #tpu.memory_space<vmem>>, vector<1x16x128xbf16>,
    %c0_92 = arith.constant 0 : index
    %c0_93 = arith.constant 0 : index
    %c0_94 = arith.constant 0 : index
    %109 = vector.load %arg10[%c0_92, %c0_93, %c0_94] : memref<9x16x16xbf16, #tpu.memory_space<vmem>>, vector<1x16x16xbf16>
    %110 = vector.shape_cast %109 : vector<1x16x16xbf16> to vector<16x16xbf16>
    %cst_95 = arith.constant dense<0.000000e+00> : vector<16x128xf32>
    %111 = tpu.matmul %110, %105, %cst_95 {dimension_numbers = #tpu.dot_dimension_numbers<[1], [0], [0], [1], [0, 0, 1, 1], [], []>} : vector<16x16xbf16>, vector<16x128xbf16>, vector<16x128xf32> -> vector<16x128xf32>
    %112 = arith.truncf %111 : vector<16x128xf32> to vector<16x128xbf16>
    %c1_96 = arith.constant 1 : index
    %c0_97 = arith.constant 0 : index
    %c0_98 = arith.constant 0 : index
    %113 = vector.load %arg10[%c1_96, %c0_97, %c0_98] : memref<9x16x16xbf16, #tpu.memory_space<vmem>>, vector<1x16x16xbf16>
    %114 = vector.shape_cast %113 : vector<1x16x16xbf16> to vector<16x16xbf16>
    %cst_99 = arith.constant dense<0.000000e+00> : vector<16x128xf32>
    %115 = tpu.matmul %114, %105, %cst_99 {dimension_numbers = #tpu.dot_dimension_numbers<[1], [0], [0], [1], [0, 0, 1, 1], [], []>} : vector<16x16xbf16>, vector<16x128xbf16>, vector<16x128xf32> -> vector<16x128xf32>
    %116 = arith.truncf %115 : vector<16x128xf32> to vector<16x128xbf16>
    %c2_100 = arith.constant 2 : index
    %c0_101 = arith.constant 0 : index
    %c0_102 = arith.constant 0 : index
    %117 = vector.load %arg10[%c2_100, %c0_101, %c0_102] : memref<9x16x16xbf16, #tpu.memory_space<vmem>>, vector<1x16x16xbf16>
    %118 = vector.shape_cast %117 : vector<1x16x16xbf16> to vector<16x16xbf16>
    %cst_103 = arith.constant dense<0.000000e+00> : vector<16x128xf32>
    %119 = tpu.matmul %118, %105, %cst_103 {dimension_numbers = #tpu.dot_dimension_numbers<[1], [0], [0], [1], [0, 0, 1, 1], [], []>} : vector<16x16xbf16>, vector<16x128xbf16>, vector<16x128xf32> -> vector<16x128xf32>
    %120 = arith.truncf %119 : vector<16x128xf32> to vector<16x128xbf16>
    %c3_104 = arith.constant 3 : index
    %c0_105 = arith.constant 0 : index
    %c0_106 = arith.constant 0 : index
    %121 = vector.load %arg10[%c3_104, %c0_105, %c0_106] : memref<9x16x16xbf16, #tpu.memory_space<vmem>>, vector<1x16x16xbf16>
    %122 = vector.shape_cast %121 : vector<1x16x16xbf16> to vector<16x16xbf16>
    %cst_107 = arith.constant dense<0.000000e+00> : vector<16x128xf32>
    %123 = tpu.matmul %122, %105, %cst_107 {dimension_numbers = #tpu.dot_dimension_numbers<[1], [0], [0], [1], [0, 0, 1, 1], [], []>} : vector<16x16xbf16>, vector<16x128xbf16>, vector<16x128xf32> -> vector<16x128xf32>
    %124 = arith.truncf %123 : vector<16x128xf32> to vector<16x128xbf16>
    %c4_108 = arith.constant 4 : index
    %c0_109 = arith.constant 0 : index
    %c0_110 = arith.constant 0 : index
    %125 = vector.load %arg10[%c4_108, %c0_109, %c0_110] : memref<9x16x16xbf16, #tpu.memory_space<vmem>>, vector<1x16x16xbf16>
    %126 = vector.shape_cast %125 : vector<1x16x16xbf16> to vector<16x16xbf16>
    %cst_111 = arith.constant dense<0.000000e+00> : vector<16x128xf32>
    %127 = tpu.matmul %126, %105, %cst_111 {dimension_numbers = #tpu.dot_dimension_numbers<[1], [0], [0], [1], [0, 0, 1, 1], [], []>} : vector<16x16xbf16>, vector<16x128xbf16>, vector<16x128xf32> -> vector<16x128xf32>
    %128 = arith.truncf %127 : vector<16x128xf32> to vector<16x128xbf16>
    %c5_112 = arith.constant 5 : index
    %c0_113 = arith.constant 0 : index
    %c0_114 = arith.constant 0 : index
    %129 = vector.load %arg10[%c5_112, %c0_113, %c0_114] : memref<9x16x16xbf16, #tpu.memory_space<vmem>>, vector<1x16x16xbf16>
    %130 = vector.shape_cast %129 : vector<1x16x16xbf16> to vector<16x16xbf16>
    %cst_115 = arith.constant dense<0.000000e+00> : vector<16x128xf32>
    %131 = tpu.matmul %130, %105, %cst_115 {dimension_numbers = #tpu.dot_dimension_numbers<[1], [0], [0], [1], [0, 0, 1, 1], [], []>} : vector<16x16xbf16>, vector<16x128xbf16>, vector<16x128xf32> -> vector<16x128xf32>
    %132 = arith.truncf %131 : vector<16x128xf32> to vector<16x128xbf16>
    %c6_116 = arith.constant 6 : index
    %c0_117 = arith.constant 0 : index
    %c0_118 = arith.constant 0 : index
    %133 = vector.load %arg10[%c6_116, %c0_117, %c0_118] : memref<9x16x16xbf16, #tpu.memory_space<vmem>>, vector<1x16x16xbf16>
    %134 = vector.shape_cast %133 : vector<1x16x16xbf16> to vector<16x16xbf16>
    %cst_119 = arith.constant dense<0.000000e+00> : vector<16x128xf32>
    %135 = tpu.matmul %134, %105, %cst_119 {dimension_numbers = #tpu.dot_dimension_numbers<[1], [0], [0], [1], [0, 0, 1, 1], [], []>} : vector<16x16xbf16>, vector<16x128xbf16>, vector<16x128xf32> -> vector<16x128xf32>
    %136 = arith.truncf %135 : vector<16x128xf32> to vector<16x128xbf16>
    %c7_120 = arith.constant 7 : index
    %c0_121 = arith.constant 0 : index
    %c0_122 = arith.constant 0 : index
    %137 = vector.load %arg10[%c7_120, %c0_121, %c0_122] : memref<9x16x16xbf16, #tpu.memory_space<vmem>>, vector<1x16x16xbf16>
    %138 = vector.shape_cast %137 : vector<1x16x16xbf16> to vector<16x16xbf16>
    %cst_123 = arith.constant dense<0.000000e+00> : vector<16x128xf32>
    %139 = tpu.matmul %138, %105, %cst_123 {dimension_numbers = #tpu.dot_dimension_numbers<[1], [0], [0], [1], [0, 0, 1, 1], [], []>} : vector<16x16xbf16>, vector<16x128xbf16>, vector<16x128xf32> -> vector<16x128xf32>
    %140 = arith.truncf %139 : vector<16x128xf32> to vector<16x128xbf16>
    %c8_124 = arith.constant 8 : index
    %c0_125 = arith.constant 0 : index
    %c0_126 = arith.constant 0 : index
    %141 = vector.load %arg10[%c8_124, %c0_125, %c0_126] : memref<9x16x16xbf16, #tpu.memory_space<vmem>>, vector<1x16x16xbf16>
    %142 = vector.shape_cast %141 : vector<1x16x16xbf16> to vector<16x16xbf16>
    %cst_127 = arith.constant dense<0.000000e+00> : vector<16x128xf32>
    %143 = tpu.matmul %142, %105, %cst_127 {dimension_numbers = #tpu.dot_dimension_numbers<[1], [0], [0], [1], [0, 0, 1, 1], [], []>} : vector<16x16xbf16>, vector<16x128xbf16>, vector<16x128xf32> -> vector<16x128xf32>
    %144 = arith.truncf %143 : vector<16x128xf32> to vector<16x128xbf16>
    %145 = tpu.concatenate %112, %116, %120, %124, %128, %132, %136, %140, %144 in 1 : vector<16x128xbf16>, vector<16x128xbf16>, vector<16x128xbf16>, vector<16x128xbf16>, vector<16x128xbf16>, vector<16x128xbf16>, vector<16x128xbf16>, vector<16x128xbf16>, vector<16x128xbf16> -> vector<16x1152xbf16>
    %c0_128 = arith.constant 0 : index
    %c0_129 = arith.constant 0 : index
    %146 = vector.load %arg11[%c0_128, %c0_129] : memref<1152x128xbf16, #tpu.memory_space<vmem>>, vector<1152x128xbf16>
    %cst_130 = arith.constant dense<0.000000e+00> : vector<16x128xf32>
    %147 = tpu.matmul %145, %146, %cst_130 {dimension_numbers = #tpu.dot_dimension_numbers<[1], [0], [0], [1], [0, 0, 1, 1], [], []>} : vector<16x1152xbf16>, vector<1152x128xbf16>, vector<16x128xf32> -> vector<16x128xf32>
    %c0_131 = arith.constant 0 : index
    %c0_132 = arith.constant 0 : index
    %148 = vector.load %arg12[%c0_131, %c0_132] : memref<1x128xf32, #tpu.memory_space<vmem>>, vector<1x128xf32>
    %149 = vector.broadcast %148 : vector<1x128xf32> to vector<16x128xf32>
    %150 = arith.addf %147, %149 : vector<16x128xf32>
    %cst_133 = arith.constant 0.000000e+00 : f32
    %151 = vector.broadcast %cst_133 : f32 to vector<16x128xf32>
    %152 = arith.maximumf %150, %151 : vector<16x128xf32>
    %153 = arith.truncf %152 : vector<16x128xf32> to vector<16x128xbf16>
    %c0_134 = arith.constant 0 : index
    %c0_135 = arith.constant 0 : index
    %c0_136 = arith.constant 0 : index
    %154 = vector.load %arg19[%c0_134, %c0_135, %c0_136] : memref<1x16x128xbf16, #tpu.memory_space<vmem>>, vector<1x16x128xbf16>
    %155 = vector.shape_cast %154 : vector<1x16x128xbf16> to vector<16x128xbf16>
    %156 = vector.shape_cast %153 : vector<16x128xbf16> to vector<1x16x128xbf16>
    tpu.vector_store %arg19[%c0_134, %c0_135, %c0_136], %156 {strides = array<i32>} : memref<1x16x128xbf16, #tpu.memory_space<vmem>>, vector<1x16x128xbf16>,
    %c0_137 = arith.constant 0 : index
    %c0_138 = arith.constant 0 : index
    %c0_139 = arith.constant 0 : index
    %157 = vector.load %arg13[%c0_137, %c0_138, %c0_139] : memref<9x16x16xbf16, #tpu.memory_space<vmem>>, vector<1x16x16xbf16>
    %158 = vector.shape_cast %157 : vector<1x16x16xbf16> to vector<16x16xbf16>
    %cst_140 = arith.constant dense<0.000000e+00> : vector<16x128xf32>
    %159 = tpu.matmul %158, %153, %cst_140 {dimension_numbers = #tpu.dot_dimension_numbers<[1], [0], [0], [1], [0, 0, 1, 1], [], []>} : vector<16x16xbf16>, vector<16x128xbf16>, vector<16x128xf32> -> vector<16x128xf32>
    %160 = arith.truncf %159 : vector<16x128xf32> to vector<16x128xbf16>
    %c1_141 = arith.constant 1 : index
    %c0_142 = arith.constant 0 : index
    %c0_143 = arith.constant 0 : index
    %161 = vector.load %arg13[%c1_141, %c0_142, %c0_143] : memref<9x16x16xbf16, #tpu.memory_space<vmem>>, vector<1x16x16xbf16>
    %162 = vector.shape_cast %161 : vector<1x16x16xbf16> to vector<16x16xbf16>
    %cst_144 = arith.constant dense<0.000000e+00> : vector<16x128xf32>
    %163 = tpu.matmul %162, %153, %cst_144 {dimension_numbers = #tpu.dot_dimension_numbers<[1], [0], [0], [1], [0, 0, 1, 1], [], []>} : vector<16x16xbf16>, vector<16x128xbf16>, vector<16x128xf32> -> vector<16x128xf32>
    %164 = arith.truncf %163 : vector<16x128xf32> to vector<16x128xbf16>
    %c2_145 = arith.constant 2 : index
    %c0_146 = arith.constant 0 : index
    %c0_147 = arith.constant 0 : index
    %165 = vector.load %arg13[%c2_145, %c0_146, %c0_147] : memref<9x16x16xbf16, #tpu.memory_space<vmem>>, vector<1x16x16xbf16>
    %166 = vector.shape_cast %165 : vector<1x16x16xbf16> to vector<16x16xbf16>
    %cst_148 = arith.constant dense<0.000000e+00> : vector<16x128xf32>
    %167 = tpu.matmul %166, %153, %cst_148 {dimension_numbers = #tpu.dot_dimension_numbers<[1], [0], [0], [1], [0, 0, 1, 1], [], []>} : vector<16x16xbf16>, vector<16x128xbf16>, vector<16x128xf32> -> vector<16x128xf32>
    %168 = arith.truncf %167 : vector<16x128xf32> to vector<16x128xbf16>
    %c3_149 = arith.constant 3 : index
    %c0_150 = arith.constant 0 : index
    %c0_151 = arith.constant 0 : index
    %169 = vector.load %arg13[%c3_149, %c0_150, %c0_151] : memref<9x16x16xbf16, #tpu.memory_space<vmem>>, vector<1x16x16xbf16>
    %170 = vector.shape_cast %169 : vector<1x16x16xbf16> to vector<16x16xbf16>
    %cst_152 = arith.constant dense<0.000000e+00> : vector<16x128xf32>
    %171 = tpu.matmul %170, %153, %cst_152 {dimension_numbers = #tpu.dot_dimension_numbers<[1], [0], [0], [1], [0, 0, 1, 1], [], []>} : vector<16x16xbf16>, vector<16x128xbf16>, vector<16x128xf32> -> vector<16x128xf32>
    %172 = arith.truncf %171 : vector<16x128xf32> to vector<16x128xbf16>
    %c4_153 = arith.constant 4 : index
    %c0_154 = arith.constant 0 : index
    %c0_155 = arith.constant 0 : index
    %173 = vector.load %arg13[%c4_153, %c0_154, %c0_155] : memref<9x16x16xbf16, #tpu.memory_space<vmem>>, vector<1x16x16xbf16>
    %174 = vector.shape_cast %173 : vector<1x16x16xbf16> to vector<16x16xbf16>
    %cst_156 = arith.constant dense<0.000000e+00> : vector<16x128xf32>
    %175 = tpu.matmul %174, %153, %cst_156 {dimension_numbers = #tpu.dot_dimension_numbers<[1], [0], [0], [1], [0, 0, 1, 1], [], []>} : vector<16x16xbf16>, vector<16x128xbf16>, vector<16x128xf32> -> vector<16x128xf32>
    %176 = arith.truncf %175 : vector<16x128xf32> to vector<16x128xbf16>
    %c5_157 = arith.constant 5 : index
    %c0_158 = arith.constant 0 : index
    %c0_159 = arith.constant 0 : index
    %177 = vector.load %arg13[%c5_157, %c0_158, %c0_159] : memref<9x16x16xbf16, #tpu.memory_space<vmem>>, vector<1x16x16xbf16>
    %178 = vector.shape_cast %177 : vector<1x16x16xbf16> to vector<16x16xbf16>
    %cst_160 = arith.constant dense<0.000000e+00> : vector<16x128xf32>
    %179 = tpu.matmul %178, %153, %cst_160 {dimension_numbers = #tpu.dot_dimension_numbers<[1], [0], [0], [1], [0, 0, 1, 1], [], []>} : vector<16x16xbf16>, vector<16x128xbf16>, vector<16x128xf32> -> vector<16x128xf32>
    %180 = arith.truncf %179 : vector<16x128xf32> to vector<16x128xbf16>
    %c6_161 = arith.constant 6 : index
    %c0_162 = arith.constant 0 : index
    %c0_163 = arith.constant 0 : index
    %181 = vector.load %arg13[%c6_161, %c0_162, %c0_163] : memref<9x16x16xbf16, #tpu.memory_space<vmem>>, vector<1x16x16xbf16>
    %182 = vector.shape_cast %181 : vector<1x16x16xbf16> to vector<16x16xbf16>
    %cst_164 = arith.constant dense<0.000000e+00> : vector<16x128xf32>
    %183 = tpu.matmul %182, %153, %cst_164 {dimension_numbers = #tpu.dot_dimension_numbers<[1], [0], [0], [1], [0, 0, 1, 1], [], []>} : vector<16x16xbf16>, vector<16x128xbf16>, vector<16x128xf32> -> vector<16x128xf32>
    %184 = arith.truncf %183 : vector<16x128xf32> to vector<16x128xbf16>
    %c7_165 = arith.constant 7 : index
    %c0_166 = arith.constant 0 : index
    %c0_167 = arith.constant 0 : index
    %185 = vector.load %arg13[%c7_165, %c0_166, %c0_167] : memref<9x16x16xbf16, #tpu.memory_space<vmem>>, vector<1x16x16xbf16>
    %186 = vector.shape_cast %185 : vector<1x16x16xbf16> to vector<16x16xbf16>
    %cst_168 = arith.constant dense<0.000000e+00> : vector<16x128xf32>
    %187 = tpu.matmul %186, %153, %cst_168 {dimension_numbers = #tpu.dot_dimension_numbers<[1], [0], [0], [1], [0, 0, 1, 1], [], []>} : vector<16x16xbf16>, vector<16x128xbf16>, vector<16x128xf32> -> vector<16x128xf32>
    %188 = arith.truncf %187 : vector<16x128xf32> to vector<16x128xbf16>
    %c8_169 = arith.constant 8 : index
    %c0_170 = arith.constant 0 : index
    %c0_171 = arith.constant 0 : index
    %189 = vector.load %arg13[%c8_169, %c0_170, %c0_171] : memref<9x16x16xbf16, #tpu.memory_space<vmem>>, vector<1x16x16xbf16>
    %190 = vector.shape_cast %189 : vector<1x16x16xbf16> to vector<16x16xbf16>
    %cst_172 = arith.constant dense<0.000000e+00> : vector<16x128xf32>
    %191 = tpu.matmul %190, %153, %cst_172 {dimension_numbers = #tpu.dot_dimension_numbers<[1], [0], [0], [1], [0, 0, 1, 1], [], []>} : vector<16x16xbf16>, vector<16x128xbf16>, vector<16x128xf32> -> vector<16x128xf32>
    %192 = arith.truncf %191 : vector<16x128xf32> to vector<16x128xbf16>
    %193 = tpu.concatenate %160, %164, %168, %172, %176, %180, %184, %188, %192 in 1 : vector<16x128xbf16>, vector<16x128xbf16>, vector<16x128xbf16>, vector<16x128xbf16>, vector<16x128xbf16>, vector<16x128xbf16>, vector<16x128xbf16>, vector<16x128xbf16>, vector<16x128xbf16> -> vector<16x1152xbf16>
    %c0_173 = arith.constant 0 : index
    %c0_174 = arith.constant 0 : index
    %194 = vector.load %arg14[%c0_173, %c0_174] : memref<1152x128xbf16, #tpu.memory_space<vmem>>, vector<1152x128xbf16>
    %cst_175 = arith.constant dense<0.000000e+00> : vector<16x128xf32>
    %195 = tpu.matmul %193, %194, %cst_175 {dimension_numbers = #tpu.dot_dimension_numbers<[1], [0], [0], [1], [0, 0, 1, 1], [], []>} : vector<16x1152xbf16>, vector<1152x128xbf16>, vector<16x128xf32> -> vector<16x128xf32>
    %c0_176 = arith.constant 0 : index
    %c0_177 = arith.constant 0 : index
    %196 = vector.load %arg15[%c0_176, %c0_177] : memref<1x128xf32, #tpu.memory_space<vmem>>, vector<1x128xf32>
    %197 = vector.broadcast %196 : vector<1x128xf32> to vector<16x128xf32>
    %198 = arith.addf %195, %197 : vector<16x128xf32>
    %cst_178 = arith.constant 0.000000e+00 : f32
    %199 = vector.broadcast %cst_178 : f32 to vector<16x128xf32>
    %200 = arith.maximumf %198, %199 : vector<16x128xf32>
    %201 = arith.truncf %200 : vector<16x128xf32> to vector<16x128xbf16>
    %c0_179 = arith.constant 0 : index
    %c0_180 = arith.constant 0 : index
    %c0_181 = arith.constant 0 : index
    %202 = vector.load %arg20[%c0_179, %c0_180, %c0_181] : memref<1x16x128xbf16, #tpu.memory_space<vmem>>, vector<1x16x128xbf16>
    %203 = vector.shape_cast %202 : vector<1x16x128xbf16> to vector<16x128xbf16>
    %204 = vector.shape_cast %201 : vector<16x128xbf16> to vector<1x16x128xbf16>
    tpu.vector_store %arg20[%c0_179, %c0_180, %c0_181], %204 {strides = array<i32>} : memref<1x16x128xbf16, #tpu.memory_space<vmem>>, vector<1x16x128xbf16>,
    return
  }
  func.func @transform_0(%arg0: i32) -> (i32, i32, i32) {
    %c0_i32 = arith.constant 0 : i32
    %c0_i32_0 = arith.constant 0 : i32
    %c0_i32_1 = arith.constant 0 : i32
    return %arg0, %c0_i32, %c0_i32_0 : i32, i32, i32
  }
  func.func @transform_1(%arg0: i32) -> (i32, i32) {
    %c0_i32 = arith.constant 0 : i32
    %c0_i32_0 = arith.constant 0 : i32
    %c0_i32_1 = arith.constant 0 : i32
    return %c0_i32, %c0_i32_0 : i32, i32
  }
  func.func @transform_2(%arg0: i32) -> (i32, i32) {
    %c0_i32 = arith.constant 0 : i32
    %c0_i32_0 = arith.constant 0 : i32
    %c0_i32_1 = arith.constant 0 : i32
    return %c0_i32, %c0_i32_0 : i32, i32
  }
  func.func @transform_3(%arg0: i32) -> (i32, i32, i32) {
    %c0_i32 = arith.constant 0 : i32
    %c0_i32_0 = arith.constant 0 : i32
    %c0_i32_1 = arith.constant 0 : i32
    %c0_i32_2 = arith.constant 0 : i32
    return %c0_i32, %c0_i32_0, %c0_i32_1 : i32, i32, i32
  }
  func.func @transform_4(%arg0: i32) -> (i32, i32) {
    %c0_i32 = arith.constant 0 : i32
    %c0_i32_0 = arith.constant 0 : i32
    %c0_i32_1 = arith.constant 0 : i32
    return %c0_i32, %c0_i32_0 : i32, i32
  }
  func.func @transform_5(%arg0: i32) -> (i32, i32) {
    %c0_i32 = arith.constant 0 : i32
    %c0_i32_0 = arith.constant 0 : i32
    %c0_i32_1 = arith.constant 0 : i32
    return %c0_i32, %c0_i32_0 : i32, i32
  }
  func.func @transform_6(%arg0: i32) -> (i32, i32, i32) {
    %c0_i32 = arith.constant 0 : i32
    %c0_i32_0 = arith.constant 0 : i32
    %c0_i32_1 = arith.constant 0 : i32
    %c0_i32_2 = arith.constant 0 : i32
    return %c0_i32, %c0_i32_0, %c0_i32_1 : i32, i32, i32
  }
  func.func @transform_7(%arg0: i32) -> (i32, i32) {
    %c0_i32 = arith.constant 0 : i32
    %c0_i32_0 = arith.constant 0 : i32
    %c0_i32_1 = arith.constant 0 : i32
    return %c0_i32, %c0_i32_0 : i32, i32
  }
  func.func @transform_8(%arg0: i32) -> (i32, i32) {
    %c0_i32 = arith.constant 0 : i32
    %c0_i32_0 = arith.constant 0 : i32
    %c0_i32_1 = arith.constant 0 : i32
    return %c0_i32, %c0_i32_0 : i32, i32
  }
  func.func @transform_9(%arg0: i32) -> (i32, i32, i32) {
    %c0_i32 = arith.constant 0 : i32
    %c0_i32_0 = arith.constant 0 : i32
    %c0_i32_1 = arith.constant 0 : i32
    %c0_i32_2 = arith.constant 0 : i32
    return %c0_i32, %c0_i32_0, %c0_i32_1 : i32, i32, i32
  }
  func.func @transform_10(%arg0: i32) -> (i32, i32) {
    %c0_i32 = arith.constant 0 : i32
    %c0_i32_0 = arith.constant 0 : i32
    %c0_i32_1 = arith.constant 0 : i32
    return %c0_i32, %c0_i32_0 : i32, i32
  }
  func.func @transform_11(%arg0: i32) -> (i32, i32) {
    %c0_i32 = arith.constant 0 : i32
    %c0_i32_0 = arith.constant 0 : i32
    %c0_i32_1 = arith.constant 0 : i32
    return %c0_i32, %c0_i32_0 : i32, i32
  }
  func.func @transform_12(%arg0: i32) -> (i32, i32, i32) {
    %c0_i32 = arith.constant 0 : i32
    %c0_i32_0 = arith.constant 0 : i32
    %c0_i32_1 = arith.constant 0 : i32
    %c0_i32_2 = arith.constant 0 : i32
    return %c0_i32, %c0_i32_0, %c0_i32_1 : i32, i32, i32
  }
  func.func @transform_13(%arg0: i32) -> (i32, i32) {
    %c0_i32 = arith.constant 0 : i32
    %c0_i32_0 = arith.constant 0 : i32
    %c0_i32_1 = arith.constant 0 : i32
    return %c0_i32, %c0_i32_0 : i32, i32
  }
  func.func @transform_14(%arg0: i32) -> (i32, i32) {
    %c0_i32 = arith.constant 0 : i32
    %c0_i32_0 = arith.constant 0 : i32
    %c0_i32_1 = arith.constant 0 : i32
    return %c0_i32, %c0_i32_0 : i32, i32
  }
  func.func @transform_15(%arg0: i32) -> (i32, i32, i32) {
    %c0_i32 = arith.constant 0 : i32
    %c0_i32_0 = arith.constant 0 : i32
    %c0_i32_1 = arith.constant 0 : i32
    return %arg0, %c0_i32, %c0_i32_0 : i32, i32, i32
  }
  func.func @transform_16(%arg0: i32) -> (i32, i32, i32) {
    %c0_i32 = arith.constant 0 : i32
    %c0_i32_0 = arith.constant 0 : i32
    %c0_i32_1 = arith.constant 0 : i32
    return %arg0, %c0_i32, %c0_i32_0 : i32, i32, i32
  }
  func.func @transform_17(%arg0: i32) -> (i32, i32, i32) {
    %c0_i32 = arith.constant 0 : i32
    %c0_i32_0 = arith.constant 0 : i32
    %c0_i32_1 = arith.constant 0 : i32
    return %arg0, %c0_i32, %c0_i32_0 : i32, i32, i32
  }
  func.func @transform_18(%arg0: i32) -> (i32, i32, i32) {
    %c0_i32 = arith.constant 0 : i32
    %c0_i32_0 = arith.constant 0 : i32
    %c0_i32_1 = arith.constant 0 : i32
    return %arg0, %c0_i32, %c0_i32_0 : i32, i32, i32
  }
  func.func @transform_19(%arg0: i32) -> (i32, i32, i32) {
    %c0_i32 = arith.constant 0 : i32
    %c0_i32_0 = arith.constant 0 : i32
    %c0_i32_1 = arith.constant 0 : i32
    return %arg0, %c0_i32, %c0_i32_0 : i32, i32, i32
  }
}

</mosaic_0001>

<bundles_post_ra>
// kernel: _lambda_.1
= control target key start
LH: loop header
LB: loop body
LE: loop exit
PB: predicated region body
PF: predicated region fallthrough
CT: control target
= control target key end

     0   :  { %s11222_s0 = inlined_call_operand.vmem [shape: bf16[2,64,1152], index: 0, kind: input, shape index: {}]   ;;  %s11223_s1 = inlined_call_operand.vmem [shape: bf16[1152,128], index: 1, kind: input, shape index: {}]   ;;  %s11224_s2 = inlined_call_operand.vmem [shape: f32[1,128], index: 2, kind: input, shape index: {}]   ;;  %s11225_s3 = inlined_call_operand.vmem [shape: bf16[9,16,64], index: 3, kind: input, shape index: {}]   ;;  %s11226_s4 = inlined_call_operand.vmem [shape: bf16[1152,128], index: 4, kind: input, shape index: {}]   ;;  %s11227_s5 = inlined_call_operand.vmem [shape: f32[1,128], index: 5, kind: input, shape index: {}]   ;;  %s11228_s6 = inlined_call_operand.vmem [shape: bf16[9,16,16], index: 6, kind: input, shape index: {}]   ;;  %s11229_s7 = inlined_call_operand.vmem [shape: bf16[1152,128], index: 7, kind: input, shape index: {}]   ;;  %s11230_s8 = inlined_call_operand.vmem [shape: f32[1,128], index: 8, kind: input, shape index: {}]   ;;  %s11231_s9 = inlined_call_operand.vmem [shape: bf16[9,16,16], index: 9, kind: input, shape index: {}]   ;;  %s11232_s10 = inlined_call_operand.vmem [shape: bf16[1152,128], index: 10, kind: input, shape index: {}]   ;;  %s11233_s11 = inlined_call_operand.vmem [shape: f32[1,128], index: 11, kind: input, shape index: {}]   ;;  %s11234_s12 = inlined_call_operand.vmem [shape: bf16[9,16,16], index: 12, kind: input, shape index: {}]   ;;  %s11235_s13 = inlined_call_operand.vmem [shape: bf16[1152,128], index: 13, kind: input, shape index: {}]   ;;  %s11236_s14 = inlined_call_operand.vmem [shape: f32[1,128], index: 14, kind: input, shape index: {}]   ;;  %s11237_s15 = inlined_call_operand.vmem [shape: bf16[2,64,128], index: 15, kind: output, shape index: {0}]   ;;  %s11238_s16 = inlined_call_operand.hbm [shape: bf16[2,16,128], index: 16, kind: output, shape index: {1}]   ;;  %s11239_s17 = inlined_call_operand.vmem [shape: bf16[2,16,128], index: 17, kind: output, shape index: {2}]   ;;  %s11240_s18 = inlined_call_operand.vmem [shape: bf16[2,16,128], index: 18, kind: output, shape index: {3}]   ;;  %s11241_s19 = inlined_call_operand.vmem [shape: bf16[2,16,128], index: 19, kind: output, shape index: {4}]  }
   0x1   :  { %11254 = sst [smem:[#allocation18_spill]] %s11222_s0 }
   0x2   :  { %11255 = sst [smem:[#allocation19_spill]] %s11223_s1 }
   0x3   :  { %11256 = sst [smem:[#allocation20_spill]] %s11224_s2 }
   0x4   :  { %11257 = sst [smem:[#allocation21_spill]] %s11225_s3 }
   0x5   :  { %11258 = sst [smem:[#allocation22_spill]] %s11236_s14 }
   0x6   :  { %11259 = sst [smem:[#allocation23_spill]] %s11241_s19 }
   0x7   :  { %25 = vsyncpa [#allocation3], 0 }
   0x8   :  { %27 = vsyncpa [#allocation3 + $0x1], 0  ;;  %s9473_s0 = smov 0   ;;  %s9475_s30 = smov 0  }
   0x9   :  { %s9477_s20 = smov 0   ;;  %s9479_s21 = smov 0  }
   0xa LB: > { %11260 = sst [smem:[#allocation5_spill]] %s9354_s0  ;;  %s9494_s1 = sadd.s32 4294967295, %s9366_s21   ;;  %s9366_s21 = sphi %s9479_s21, %s11294_s21   ;;  %s9362_s20 = sphi %s9477_s20, %s11296_s20   ;;  %s9358_s30 = sphi %s9475_s30, %s11298_s30   ;;  %s9354_s0 = sphi %s9473_s0, %s11297_s0  }
   0xb   : > { %11261 = sst [smem:[#allocation6_spill]] %s9362_s20  ;;  %s7145_s22 = sadd.s32 4294967294, %s9366_s21  }
   0xc   : > { %11262 = sst [smem:[#allocation7_spill]] %s9366_s21  ;;  %s9498_s2 = sadd.s32 1, %s9366_s21  }
   0xd   : > { %11263 = sst [smem:[#allocation8_spill]] %s9498_s2  ;;  %s386_s23 = sadd.s32 1, %s9362_s20 }
   0xe   : > { %s383_s24 = ssub.s32 %s9366_s21, %s9498_s2  ;;  %p396_p0 = scmp.ne.s32.totalorder %s9362_s20, %s9358_s30 }
   0xf   : > { %p384_p1 = scmp.eq.s32.totalorder %s383_s24, 0  ;;  %p397_p2 = scmp.eq.s32.totalorder %s9494_s1, 1 }
  0x10   : > { %p402_p3 = scmp.ne.s32.totalorder %s9358_s30, %s9354_s0  ;;  %p403_p4 = scmp.eq.s32.totalorder %s7145_s22, 1 }
  0x11   : > { %s9509_s25 = scalar_select %p384_p1, %s9362_s20, %s386_s23  }
  0x12   : > { %p9511_p5 = por %p397_p2, %p396_p0  ;;  %p9515_p6 = por %p403_p4, %p402_p3 }
  0x13   : > { %11264 = sst [smem:[#allocation9_spill]] %s9509_s25  ;;  %p7148_p7 = scmp.ge.s32.totalorder %s9366_s21, 1 }
  0x14   : > { %s11266_s26 = scalar_select %p9515_p6, 1, 0 }
  0x15   : > { %p549_p8 = scmp.lt.s32.totalorder %s9366_s21, 3 }
  0x16   : > { %11267 = sst [smem:[#allocation10_spill]] %s11266_s26 }
  0x17   : > { %p550_p9 = pnand %p7148_p7, %p549_p8 }
  0x19   : > { %553 = sbr.rel (%p550_p9) target bundleno = 2277 (0x8e5), region = 80 }
  0x1e   : > { %s11268_s29 = sld [smem:[#allocation19_spill]]  ;;  %p625_p10 = scmp.lt.s32.totalorder %s9494_s1, 1  ;;  %vm9369_vm0 = vmmov 0   ;;  %vm1838_vm1 = vcmask 523264   ;;  %vm3115_vm2 = vcmask 130048  }
  0x1f   : > { %s11269_s14 = sld [smem:[#allocation18_spill]]  ;;  %s11288_s25 = sand.u32 1, %s9358_s30  }
  0x20   : > { %s9586_s24 = scalar_select %p625_p10, %s9494_s1, 1 }
  0x21   : > { %s11274_s27 = sld [smem:[#allocation20_spill]] }
  0x22   : > { %s8814_s28 = smul.u32 288, %s9586_s24  ;;  %s7717_s22 = sshll.u32 %s9586_s24, 5 }
  0x23   : > { %s634_s20 = scalar_lea.vmem %s11237_s15, %s7717_s22  ;;  %s10542_s19 = sshll.u32 %s9586_s24, 3 }
  0x24   : > { %v8858_v0 = vld [vmem:[%s11268_s29 + $0x78] sm:$0xff]   ;;  %v8862_v4 = vld [vmem:[%s11268_s29 + $0x70] sm:$0xff]   ;;  %v8866_v8 = vld [vmem:[%s11268_s29 + $0x68] sm:$0xff]   ;;  %s644_s23 = scalar_lea.vmem %s11240_s18, %s10542_s19 }
  0x25   : > { %v8859_v1 = vld [vmem:[%s11268_s29 + $0x38] sm:$0xff]   ;;  %7781 = vmatprep.subr.bf16.mxu0 %v8858_v0  ;;  %v8863_v5 = vld [vmem:[%s11268_s29 + $0x30] sm:$0xff]   ;;  %v8867_v9 = vld [vmem:[%s11268_s29 + $0x28] sm:$0xff]   ;;  %s9616_s21 = scalar_lea.vmem %s11269_s14, %s8814_s28  ;;  %s11286_s28 = sld [smem:[#allocation21_spill]] }
  0x26   : > { %v8860_v2 = vld [vmem:[%s11268_s29 + $0xf8] sm:$0xff]   ;;  %7782 = vmatpush3.bf16.msra.mxu0 %v8859_v1  ;;  %v8864_v6 = vld [vmem:[%s11268_s29 + $0xf0] sm:$0xff]   ;;  %v8868_v10 = vld [vmem:[%s11268_s29 + $0xe8] sm:$0xff]  }
  0x27   : > { %v8861_v3 = vld [vmem:[%s11268_s29 + $0xb8] sm:$0xff]   ;;  %7821 = vmatprep.subr.bf16.mxu1 %v8860_v2  ;;  %7783 = vmatprep.subr.bf16.mxu0 %v8862_v4  ;;  %v8865_v7 = vld [vmem:[%s11268_s29 + $0xb0] sm:$0xff]   ;;  %v8869_v11 = vld [vmem:[%s11268_s29 + $0xa8] sm:$0xff]  }
  0x28   : > { %7822 = vmatpush3.bf16.msra.mxu1 %v8861_v3  ;;  %v8870_v12 = vld [vmem:[%s11268_s29 + $0x60] sm:$0xff]   ;;  %v8874_v16 = vld [vmem:[%s11268_s29 + $0x58] sm:$0xff]   ;;  %v8878_v20 = vld [vmem:[%s11268_s29 + $0x50] sm:$0xff]  }
  0x29   : > { %7823 = vmatprep.subr.bf16.mxu1 %v8864_v6  ;;  %v8871_v13 = vld [vmem:[%s11268_s29 + $0x20] sm:$0xff]   ;;  %v8875_v17 = vld [vmem:[%s11268_s29 + $0x18] sm:$0xff]   ;;  %v8879_v21 = vld [vmem:[%s11268_s29 + $0x10] sm:$0xff]  }
  0x2a   : > { %7784 = vmatpush3.bf16.msra.mxu0 %v8863_v5  ;;  %v8872_v14 = vld [vmem:[%s11268_s29 + $0xe0] sm:$0xff]   ;;  %v8876_v18 = vld [vmem:[%s11268_s29 + $0xd8] sm:$0xff]   ;;  %v8880_v22 = vld [vmem:[%s11268_s29 + $0xd0] sm:$0xff]  }
  0x2b   : > { %7785 = vmatprep.subr.bf16.mxu0 %v8866_v8  ;;  %v8873_v15 = vld [vmem:[%s11268_s29 + $0xa0] sm:$0xff]   ;;  %v8877_v19 = vld [vmem:[%s11268_s29 + $0x98] sm:$0xff]   ;;  %v8881_v23 = vld [vmem:[%s11268_s29 + $0x90] sm:$0xff]  }
  0x2c   : > { %7824 = vmatpush3.bf16.msra.mxu1 %v8865_v7  ;;  %v8882_v24 = vld [vmem:[%s11268_s29 + $0x48] sm:$0xff]   ;;  %v8886_v28 = vld [vmem:[%s11268_s29 + $0x40] sm:$0xff]   ;;  %v8893_v34 = vld [vmem:[%s11268_s29 + $0x178] sm:$0xff]  }
  0x2d   : > { %7825 = vmatprep.subr.bf16.mxu1 %v8868_v10  ;;  %v8883_v25 = vld [vmem:[%s11268_s29 + $0x8] sm:$0xff]   ;;  %v8887_v29 = vld [vmem:[%s11268_s29] sm:$0xff]   ;;  %v8897_v37 = vld [vmem:[%s11268_s29 + $0x138] sm:$0xff]  }
  0x2e   : > { %7786 = vmatpush3.bf16.msra.mxu0 %v8867_v9  ;;  %v8884_v26 = vld [vmem:[%s11268_s29 + $0xc8] sm:$0xff]   ;;  %v8888_v30 = vld [vmem:[%s11268_s29 + $0xc0] sm:$0xff]   ;;  %v8898_v38 = vld [vmem:[%s11268_s29 + $0x1f8] sm:$0xff]  }
  0x2f   : > { %7787 = vmatprep.subr.bf16.mxu0 %v8870_v12  ;;  %v8885_v27 = vld [vmem:[%s11268_s29 + $0x88] sm:$0xff]   ;;  %v8889_v31 = vld [vmem:[%s9616_s21] ss:$36 sps:$4 sm:$0xff]   ;;  %v8899_v39 = vld [vmem:[%s11268_s29 + $0x1b8] sm:$0xff]  }
  0x30   : > { %7826 = vmatpush3.bf16.msra.mxu1 %v8869_v11  ;;  %v8891_v32 = vld [vmem:[%s9616_s21 + $0x4] ss:$36 sps:$4 sm:$0xff]   ;;  %v8896_v36 = vld [vmem:[%s9616_s21 + $0xc] ss:$36 sps:$4 sm:$0xff]   ;;  %v8908_v47 = vld [vmem:[%s9616_s21 + $0x54] ss:$36 sps:$4 sm:$0xff]  }
  0x31   : > { %7827 = vmatprep.subr.bf16.mxu1 %v8872_v14  ;;  %v8892_v33 = vld [vmem:[%s11268_s29 + $0x80] sm:$0xff]   ;;  %1490 = vmatprep.mubr.bf16.mxu0 %v8891_v32  ;;  %v8894_v35 = vld [vmem:[%s9616_s21 + $0x8] ss:$36 sps:$4 sm:$0xff]   ;;  %v8900_v40 = vld [vmem:[%s11268_s29 + $0x170] sm:$0xff]  }
  0x32   : > { %7788 = vmatpush3.bf16.msra.mxu0 %v8871_v13  ;;  %1555 = vmatprep.mubr.bf16.mxu1 %v8896_v36  ;;  %v8901_v41 = vld [vmem:[%s11268_s29 + $0x130] sm:$0xff]   ;;  %v8906_v45 = vld [vmem:[%s9616_s21 + $0x48] ss:$36 sps:$4 sm:$0xff]   ;;  %v8914_v52 = vld [vmem:[%s11268_s29 + $0x160] sm:$0xff]  }
  0x33   : > { %7789 = vmatprep.subr.bf16.mxu0 %v8874_v16  ;;  %v8902_v42 = vld [vmem:[%s11268_s29 + $0x1f0] sm:$0xff]   ;;  %v8907_v46 = vld [vmem:[%s11268_s29 + $0x168] sm:$0xff]   ;;  %v8915_v53 = vld [vmem:[%s11268_s29 + $0x120] sm:$0xff]  }
  0x34   : > { %7828 = vmatpush3.bf16.msra.mxu1 %v8873_v15  ;;  %v8903_v43 = vld [vmem:[%s9616_s21 + $0x4c] ss:$36 sps:$4 sm:$0xff]   ;;  %v8916_v54 = vld [vmem:[%s11268_s29 + $0x1e0] sm:$0xff]   ;;  %v8917_v55 = vld [vmem:[%s9616_s21 + $0x94] ss:$36 sps:$4 sm:$0xff]  }
  0x35   : > { %7829 = vmatprep.subr.bf16.mxu1 %v8876_v18  ;;  %v8905_v44 = vld [vmem:[%s11268_s29 + $0x1b0] sm:$0xff]   ;;  %v8910_v48 = vld [vmem:[%s11268_s29 + $0x128] sm:$0xff]   ;;  %v8919_v56 = vld [vmem:[%s11268_s29 + $0x1a0] sm:$0xff]  }
  0x36   : > { %7790 = vmatpush3.bf16.msra.mxu0 %v8875_v17  ;;  %v8911_v49 = vld [vmem:[%s9616_s21 + $0x50] ss:$36 sps:$4 sm:$0xff]   ;;  %v8912_v50 = vld [vmem:[%s11268_s29 + $0x1e8] sm:$0xff]   ;;  %v8921_v58 = vld [vmem:[%s11268_s29 + $0x158] sm:$0xff]  }
  0x37   : > { %7791 = vmatprep.subr.bf16.mxu0 %v8878_v20  ;;  %v8913_v51 = vld [vmem:[%s11268_s29 + $0x1a8] sm:$0xff]   ;;  %v8920_v57 = vld [vmem:[%s9616_s21 + $0x90] ss:$36 sps:$4 sm:$0xff]   ;;  %v8922_v59 = vld [vmem:[%s9616_s21 + $0x9c] ss:$36 sps:$4 sm:$0xff]  }
  0x38   : > { %7830 = vmatpush3.bf16.msra.mxu1 %v8877_v19  ;;  %v8924_v60 = vld [vmem:[%s11268_s29 + $0x118] sm:$0xff]   ;;  %v8928_v0 = vld [vmem:[%s11268_s29 + $0x150] sm:$0xff]   ;;  %v8935_v6 = vld [vmem:[%s11268_s29 + $0x148] sm:$0xff]  }
  0x39   : > { %7831 = vmatprep.subr.bf16.mxu1 %v8880_v22  ;;  %v8925_v61 = vld [vmem:[%s9616_s21 + $0x98] ss:$36 sps:$4 sm:$0xff]   ;;  %v8929_v1 = vld [vmem:[%s11268_s29 + $0x110] sm:$0xff]   ;;  %v8936_v7 = vld [vmem:[%s9616_s21 + $0xe4] ss:$36 sps:$4 sm:$0xff]  }
  0x3a   : > { %7792 = vmatpush3.bf16.msra.mxu0 %v8879_v21  ;;  %v8926_v62 = vld [vmem:[%s11268_s29 + $0x1d8] sm:$0xff]   ;;  %v8930_v2 = vld [vmem:[%s11268_s29 + $0x1d0] sm:$0xff]   ;;  %v8938_v8 = vld [vmem:[%s11268_s29 + $0x108] sm:$0xff]  }
  0x3b   : > { %7793 = vmatprep.subr.bf16.mxu0 %v8882_v24  ;;  %v8927_v63 = vld [vmem:[%s11268_s29 + $0x198] sm:$0xff]   ;;  %v8933_v4 = vld [vmem:[%s11268_s29 + $0x190] sm:$0xff]   ;;  %v8939_v9 = vld [vmem:[%s9616_s21 + $0xe0] ss:$36 sps:$4 sm:$0xff]  }
  0x3c   : > { %7832 = vmatpush3.bf16.msra.mxu1 %v8881_v23  ;;  %v8931_v3 = vld [vmem:[%s9616_s21 + $0xdc] ss:$36 sps:$4 sm:$0xff]   ;;  %v8940_v10 = vld [vmem:[%s11268_s29 + $0x1c8] sm:$0xff]   ;;  %v8945_v15 = vld [vmem:[%s9616_s21 + $0x10] ss:$36 sps:$4 sm:$0xff]  }
  0x3d   : > { %7833 = vmatprep.subr.bf16.mxu1 %v8884_v26  ;;  %v8934_v5 = vld [vmem:[%s9616_s21 + $0xd8] ss:$36 sps:$4 sm:$0xff]   ;;  %v8941_v11 = vld [vmem:[%s11268_s29 + $0x188] sm:$0xff]   ;;  %v8942_v12 = vld [vmem:[%s11268_s29 + $0x140] sm:$0xff]  }
  0x3e   : > { %7794 = vmatpush3.bf16.msra.mxu0 %v8883_v25  ;;  %v8943_v13 = vld [vmem:[%s11268_s29 + $0x100] sm:$0xff]   ;;  %v8947_v16 = vld [vmem:[%s9616_s21 + $0x14] ss:$36 sps:$4 sm:$0xff]   ;;  %v8957_v24 = vld [vmem:[%s11268_s29 + $0x228] sm:$0xff]  }
  0x3f   : > { %7795 = vmatprep.subr.bf16.mxu0 %v8886_v28  ;;  %v8944_v14 = vld [vmem:[%s11268_s29 + $0x1c0] sm:$0xff]   ;;  %v8949_v18 = vld [vmem:[%s11268_s29 + $0x238] sm:$0xff]   ;;  %v8953_v21 = vld [vmem:[%s11268_s29 + $0x230] sm:$0xff]  }
  0x40   : > { %7834 = vmatpush3.bf16.msra.mxu1 %v8885_v27  ;;  %v8948_v17 = vld [vmem:[%s11268_s29 + $0x180] sm:$0xff]   ;;  %v8950_v19 = vld [vmem:[%s9616_s21 + $0x18] ss:$36 sps:$4 sm:$0xff]   ;;  %v8970_v32 = vld [vmem:[%s9616_s21 + $0xec] ss:$36 sps:$4 sm:$0xff]  }
  0x41   : > { %7835 = vmatprep.subr.bf16.mxu1 %v8888_v30  ;;  %v8952_v20 = vld [vmem:[%s9616_s21 + $0x1c] ss:$36 sps:$4 sm:$0xff]   ;;  %v8958_v25 = vld [vmem:[%s9616_s21 + $0x64] ss:$36 sps:$4 sm:$0xff]  }
  0x42   : > { %7796 = vmatpush3.bf16.msra.mxu0 %v8887_v29  ;;  %v8954_v22 = vld [vmem:[%s9616_s21 + $0x5c] ss:$36 sps:$4 sm:$0xff]   ;;  %v8962_v27 = vld [vmem:[%s9616_s21 + $0xa4] ss:$36 sps:$4 sm:$0xff]   ;;  %v8966_v29 = vld [vmem:[%s9616_s21 + $0xac] ss:$36 sps:$4 sm:$0xff]  }
  0x43   : > { %7861 = vmatprep.subr.bf16.mxu0 %v8893_v34  ;;  %v8956_v23 = vld [vmem:[%s9616_s21 + $0x58] ss:$36 sps:$4 sm:$0xff]   ;;  %v8961_v26 = vld [vmem:[%s11268_s29 + $0x220] sm:$0xff]   ;;  %v8968_v34 = vld [vmem:[%s9616_s21 + $0xa8] ss:$36 sps:$4 sm:$0xff]  }
  0x44   : > { %7836 = vmatpush3.bf16.msra.mxu1 %v8892_v33  ;;  %v8960_v28 = vld [vmem:[%s9616_s21 + $0x60] ss:$36 sps:$4 sm:$0xff]   ;;  %v8965_v30 = vld [vmem:[%s11268_s29 + $0x218] sm:$0xff]   ;;  %v8969_v33 = vld [vmem:[%s11268_s29 + $0x210] sm:$0xff]  }
  0x45   : > { %1491 = vmatmul.mubr.bf16.vlgmr.msra.gmra.mxu0 %v8889_v31  ;;  %7901 = vmatprep.subr.bf16.mxu1 %v8898_v38  ;;  %v8964_v31 = vld [vmem:[%s9616_s21 + $0xa0] ss:$36 sps:$4 sm:$0xff]   ;;  %v8972_v36 = vld [vmem:[%s9616_s21 + $0xe8] ss:$36 sps:$4 sm:$0xff]  }
  0x46   : > { %7862 = vmatpush3.bf16.msra.mxu0 %v8897_v37  ;;  %1498 = vmatprep.mubr.bf16.mxu0 %v8903_v43  ;;  %v8973_v37 = vld [vmem:[%s11268_s29 + $0x208] sm:$0xff]   ;;  %v8978_v38 = vld [vmem:[%s9616_s21 + $0x20] ss:$36 sps:$4 sm:$0xff]   ;;  %v8981_v43 = vld [vmem:[%s9616_s21 + $0xf8] ss:$36 sps:$4 sm:$0xff]  }
  0x47   : > { %1556 = vmatmul.mubr.bf16.vlgmr.msra.gmra.mxu1 %v8894_v35  ;;  %7863 = vmatprep.subr.bf16.mxu0 %v8900_v40  ;;  %v8974_v35 = vld [vmem:[%s9616_s21 + $0xf4] ss:$36 sps:$4 sm:$0xff]   ;;  %v8977_v40 = vld [vmem:[%s11268_s29 + $0x200] sm:$0xff]  }
  0x48   : > { %7902 = vmatpush3.bf16.msra.mxu1 %v8899_v39  ;;  %1563 = vmatprep.mubr.bf16.mxu1 %v8908_v47  ;;  %v8976_v39 = vld [vmem:[%s9616_s21 + $0xf0] ss:$36 sps:$4 sm:$0xff]  }
  0x49   : > { %7903 = vmatprep.subr.bf16.mxu1 %v8902_v42  ;;  %v8980_v42 = vld [vmem:[%s9616_s21 + $0xb0] ss:$36 sps:$4 sm:$0xff]  }
  0x4a   : > { %7864 = vmatpush3.bf16.msra.mxu0 %v8901_v41  ;;  %v8979_v41 = vld [vmem:[%s9616_s21 + $0x68] ss:$36 sps:$4 sm:$0xff]   ;;  %s639_s21 = scalar_lea.vmem %s11239_s17, %s10542_s19 }
  0x4b   : > { %7865 = vmatprep.subr.bf16.mxu0 %v8907_v46 }
  0x4c   : > { %7904 = vmatpush3.bf16.msra.mxu1 %v8905_v44  ;;  %v11250_v44 = vmov 0.0  }
  0x4d   : > { %1499 = vmatmul.mubr.bf16.gmra.mxu0 %v8906_v45  ;;  %7905 = vmatprep.subr.bf16.mxu1 %v8912_v50 }
  0x4e   : > { %7866 = vmatpush3.bf16.msra.mxu0 %v8910_v48  ;;  %1506 = vmatprep.mubr.bf16.mxu0 %v8917_v55 }
  0x4f   : > { %1564 = vmatmul.mubr.bf16.gmra.mxu1 %v8911_v49  ;;  %7867 = vmatprep.subr.bf16.mxu0 %v8914_v52 }
  0x50   : > { %7906 = vmatpush3.bf16.msra.mxu1 %v8913_v51  ;;  %1571 = vmatprep.mubr.bf16.mxu1 %v8922_v59 }
  0x51   : > { %7907 = vmatprep.subr.bf16.mxu1 %v8916_v54 }
  0x52   : > { %7868 = vmatpush3.bf16.msra.mxu0 %v8915_v53 }
  0x53   : > { %7869 = vmatprep.subr.bf16.mxu0 %v8921_v58 }
  0x54   : > { %7908 = vmatpush3.bf16.msra.mxu1 %v8919_v56 }
  0x55   : > { %1507 = vmatmul.mubr.bf16.gmra.mxu0 %v8920_v57  ;;  %7909 = vmatprep.subr.bf16.mxu1 %v8926_v62 }
  0x56   : > { %7870 = vmatpush3.bf16.msra.mxu0 %v8924_v60  ;;  %1514 = vmatprep.mubr.bf16.mxu0 %v8931_v3 }
  0x57   : > { %1572 = vmatmul.mubr.bf16.gmra.mxu1 %v8925_v61  ;;  %7871 = vmatprep.subr.bf16.mxu0 %v8928_v0 }
  0x58   : > { %7910 = vmatpush3.bf16.msra.mxu1 %v8927_v63  ;;  %1579 = vmatprep.mubr.bf16.mxu1 %v8936_v7 }
  0x59   : > { %7911 = vmatprep.subr.bf16.mxu1 %v8930_v2 }
  0x5a   : > { %7872 = vmatpush3.bf16.msra.mxu0 %v8929_v1 }
  0x5b   : > { %7873 = vmatprep.subr.bf16.mxu0 %v8935_v6 }
  0x5c   : > { %7912 = vmatpush3.bf16.msra.mxu1 %v8933_v4 }
  0x5d   : > { %1515 = vmatmul.mubr.bf16.gmra.mxu0 %v8934_v5  ;;  %7913 = vmatprep.subr.bf16.mxu1 %v8940_v10 }
  0x5e   : > { %7874 = vmatpush3.bf16.msra.mxu0 %v8938_v8  ;;  %1620 = vmatprep.mubr.bf16.mxu0 %v8947_v16 }
  0x5f   : > { %1580 = vmatmul.mubr.bf16.gmra.mxu1 %v8939_v9  ;;  %7875 = vmatprep.subr.bf16.mxu0 %v8942_v12 }
  0x60   : > { %7914 = vmatpush3.bf16.msra.mxu1 %v8941_v11  ;;  %1685 = vmatprep.mubr.bf16.mxu1 %v8952_v20 }
  0x61   : > { %7915 = vmatprep.subr.bf16.mxu1 %v8944_v14 }
  0x62   : > { %7876 = vmatpush3.bf16.msra.mxu0 %v8943_v13 }
  0x63   : > { %8440 = vmatprep.subr.bf16.mxu0 %v8949_v18 }
  0x64   : > { %7916 = vmatpush3.bf16.msra.mxu1 %v8948_v17 }
  0x65   : > { %1621 = vmatmul.mubr.bf16.vlgmr.msra.gmra.mxu0 %v8945_v15  ;;  %8488 = vmatprep.subr.bf16.mxu1 %v11250_v44 }
  0x66   : > { %8441 = vmatpush3.bf16.msra.mxu0 %v8949_v18  ;;  %1628 = vmatprep.mubr.bf16.mxu0 %v8954_v22 }
  0x67   : > { %1686 = vmatmul.mubr.bf16.vlgmr.msra.gmra.mxu1 %v8950_v19  ;;  %8442 = vmatprep.subr.bf16.mxu0 %v8953_v21 }
  0x68   : > { %1693 = vmatprep.mubr.bf16.mxu1 %v8958_v25 }
  0x6a   : > { %8443 = vmatpush3.bf16.msra.mxu0 %v8953_v21 }
  0x6b   : > { %8444 = vmatprep.subr.bf16.mxu0 %v8957_v24 }
  0x6d   : > { %1629 = vmatmul.mubr.bf16.gmra.mxu0 %v8956_v23 }
  0x6e   : > { %1636 = vmatprep.mubr.bf16.mxu0 %v8962_v27  ;;  %8445 = vmatpush3.bf16.msra.mxu0 %v8957_v24 }
  0x6f   : > { %8446 = vmatprep.subr.bf16.mxu0 %v8961_v26  ;;  %1694 = vmatmul.mubr.bf16.gmra.mxu1 %v8960_v28 }
  0x70   : > { %1701 = vmatprep.mubr.bf16.mxu1 %v8966_v29 }
  0x72   : > { %8447 = vmatpush3.bf16.msra.mxu0 %v8961_v26 }
  0x73   : > { %8448 = vmatprep.subr.bf16.mxu0 %v8965_v30 }
  0x75   : > { %1637 = vmatmul.mubr.bf16.gmra.mxu0 %v8964_v31  ;;  %v7159_v31 = vld [vmem:[%s11274_s27] ss:$0 sm:$0xff] }
  0x76   : > { %1644 = vmatprep.mubr.bf16.mxu0 %v8970_v32  ;;  %8449 = vmatpush3.bf16.msra.mxu0 %v8965_v30 }
  0x77   : > { %8450 = vmatprep.subr.bf16.mxu0 %v8969_v33  ;;  %1702 = vmatmul.mubr.bf16.gmra.mxu1 %v8968_v34 }
  0x78   : > { %1709 = vmatprep.mubr.bf16.mxu1 %v8974_v35 }
  0x7a   : > { %8451 = vmatpush3.bf16.msra.mxu0 %v8969_v33 }
  0x7b   : > { %8452 = vmatprep.subr.bf16.mxu0 %v8973_v37 }
  0x7d   : > { %1645 = vmatmul.mubr.bf16.gmra.mxu0 %v8972_v36 }
  0x7e   : > { %8456 = vmatprep.mubr.bf16.mxu0 %v8978_v38  ;;  %8453 = vmatpush3.bf16.msra.mxu0 %v8973_v37 }
  0x7f   : > { %8454 = vmatprep.subr.bf16.mxu0 %v8977_v40  ;;  %1710 = vmatmul.mubr.bf16.gmra.mxu1 %v8976_v39 }
  0x80   : > { %8496 = vmatprep.mubr.msk.bf16.mxu1 %vm9369_vm0, %v11250_v44 }
  0x82   : > { %8455 = vmatpush3.bf16.msra.mxu0 %v8977_v40 }
  0x83   : > { %8464 = vmatprep.subr.bf16.mxu0 %v11250_v44 }
  0x85   : > { %8457 = vmatmul.mubr.bf16.vlgmr.msra.gmra.mxu0 %v8979_v41 }
  0x86   : > { %8460 = vmatprep.mubr.bf16.mxu0 %v8980_v42 }
  0x8d   : > { %8461 = vmatmul.mubr.bf16.gmra.mxu0 %v8981_v43 }
  0x8e   : > { %8472 = vmatprep.mubr.msk.bf16.mxu0 %vm9369_vm0, %v11250_v44 }
 0x105   : > { %v7797_v45 = vpop.f32.mrf.mxu0 }
 0x107   : > { %v7798_v46 = vpop.f32.mrf.mxu0  ;;  %v7837_v47 = vpop.f32.mrf.mxu1 }
 0x108   : > { %v7799_v35 = vadd.f32 %v7798_v46, %v7797_v45 }
 0x109   : > { %v7800_v48 = vpop.f32.mrf.mxu0  ;;  %v7838_v49 = vpop.f32.mrf.mxu1 }
 0x10a   : > { %v1493_v44 = vadd.f32 %v7799_v35, %v7159_v31 }
 0x10b   : > { %v7801_v50 = vpop.f32.mrf.mxu0  ;;  %v7840_v51 = vpop.f32.mrf.mxu1 }
 0x10c   : > { %v7802_v36 = vadd.f32 %v7801_v50, %v7800_v48 }
 0x10d   : > { %v7803_v52 = vpop.f32.mrf.mxu0  ;;  %v7841_v53 = vpop.f32.mrf.mxu1 }
 0x10f   : > { %v7804_v54 = vpop.f32.mrf.mxu0  ;;  %v7843_v55 = vpop.f32.mrf.mxu1 }
 0x110   : > { %v7805_v32 = vadd.f32 %v7804_v54, %v7803_v52 }
 0x111   : > { %v7806_v56 = vpop.f32.mrf.mxu0  ;;  %v7844_v57 = vpop.f32.mrf.mxu1 }
 0x112   : > { %v1501_v40 = vadd.f32 %v7805_v32, %v7159_v31  ;;  %v7845_v41 = vadd.f32 %v7844_v57, %v7843_v55 }
 0x113   : > { %v7807_v58 = vpop.f32.mrf.mxu0  ;;  %v7846_v59 = vpop.f32.mrf.mxu1 }
 0x114   : > { %v7808_v37 = vadd.f32 %v7807_v58, %v7806_v56  ;;  %v1566_v48 = vadd.f32 %v7845_v41, %v1501_v40 }
 0x115   : > { %v7847_v60 = vpop.f32.mrf.mxu1  ;;  %v7809_v61 = vpop.f32.mrf.mxu0 }
 0x116   : > { %v1504_v52 = vadd.f32 %v7808_v37, %v7159_v31  ;;  %v7848_v54 = vadd.f32 %v7847_v60, %v7846_v59 }
 0x117   : > { %v7810_v62 = vpop.f32.mrf.mxu0  ;;  %v9789_v63 = vpop.f32.mrf.mxu1 }
 0x119   : > { %v9791_v0 = vpop.f32.mrf.mxu0  ;;  %v9793_v1 = vpop.f32.mrf.mxu1 }
 0x11b   : > { %v9795_v2 = vpop.f32.mrf.mxu0  ;;  %v9797_v3 = vpop.f32.mrf.mxu1 }
 0x11c   : > { %11270 = vst [vmem:[#allocation11_spill] sm:$0xff] %v9797_v3  ;;  %v1496_v3 = vadd.f32 %v7802_v36, %v7159_v31 }
 0x11d   : > { %v9799_v4 = vpop.f32.mrf.mxu1  ;;  %v7815_v5 = vpop.f32.mrf.mxu0 }
 0x11e   : > { %11271 = vst [vmem:[#allocation12_spill] sm:$0xff] %v9799_v4  ;;  %v7839_v4 = vadd.f32 %v7838_v49, %v7837_v47  ;;  %v1569_v47 = vadd.f32 %v7848_v54, %v1504_v52 }
 0x11f   : > { %v7816_v6 = vpop.f32.mrf.mxu0  ;;  %v9801_v7 = vpop.f32.mrf.mxu1 }
 0x120   : > { %v7817_v46 = vadd.f32 %v7816_v6, %v7815_v5  ;;  %v1558_v57 = vadd.f32 %v7839_v4, %v1493_v44 }
 0x121   : > { %v7818_v8 = vpop.f32.mrf.mxu0  ;;  %v9803_v9 = vpop.f32.mrf.mxu1 }
 0x122   : > { %v1517_v5 = vadd.f32 %v7817_v46, %v7159_v31  ;;  %v7857_v6 = vadd.f32 %v9803_v9, %v9801_v7 }
 0x123   : > { %v7819_v10 = vpop.f32.mrf.mxu0  ;;  %v9805_v11 = vpop.f32.mrf.mxu1 }
 0x124   : > { %11272 = vst [vmem:[#allocation13_spill] sm:$0xff] %v9805_v11 }
 0x125   : > { %v9807_v12 = vpop.f32.mrf.mxu1  ;;  %v7877_v13 = vpop.f32.mrf.mxu0 }
 0x126   : > { %11273 = vst [vmem:[#allocation14_spill] sm:$0xff] %v9807_v12  ;;  %v7842_v12 = vadd.f32 %v7841_v53, %v7840_v51 }
 0x127   : > { %v7878_v14 = vpop.f32.mrf.mxu0  ;;  %v7917_v15 = vpop.f32.mrf.mxu1 }
 0x128   : > { %v7879_v50 = vadd.f32 %v7878_v14, %v7877_v13  ;;  %v1561_v32 = vadd.f32 %v7842_v12, %v1496_v3 }
 0x129   : > { %v7880_v16 = vpop.f32.mrf.mxu0  ;;  %v7918_v17 = vpop.f32.mrf.mxu1 }
 0x12a   : > { %v1623_v44 = vadd.f32 %v7879_v50, %v1558_v57  ;;  %v7919_v3 = vadd.f32 %v7918_v17, %v7917_v15  ;;  %v1582_v15 = vadd.f32 %v7857_v6, %v1517_v5 }
 0x12b   : > { %v7881_v18 = vpop.f32.mrf.mxu0  ;;  %v7920_v19 = vpop.f32.mrf.mxu1  ;;  %v11278_v12 = vld [vmem:[#allocation13_spill] sm:$0xff] }
 0x12c   : > { %v7882_v35 = vadd.f32 %v7881_v18, %v7880_v16 }
 0x12d   : > { %v7883_v20 = vpop.f32.mrf.mxu0  ;;  %v7921_v21 = vpop.f32.mrf.mxu1 }
 0x12e   : > { %v1626_v14 = vadd.f32 %v7882_v35, %v1561_v32  ;;  %v7922_v16 = vadd.f32 %v7921_v21, %v7920_v19 }
 0x12f   : > { %v7884_v22 = vpop.f32.mrf.mxu0  ;;  %v7923_v23 = vpop.f32.mrf.mxu1 }
 0x130   : > { %v7885_v11 = vadd.f32 %v7884_v22, %v7883_v20  ;;  %v1691_v37 = vadd.f32 %v7922_v16, %v1626_v14  ;;  %v8982_v14 = vld [vmem:[%s11286_s28] sm:$0xff]   ;;  %v8983_v16 = vld [vmem:[%s11286_s28 + $0x10] sm:$0xff]  }
 0x131   : > { %v7886_v24 = vpop.f32.mrf.mxu0  ;;  %v7924_v25 = vpop.f32.mrf.mxu1 }
 0x132   : > { %v1631_v51 = vadd.f32 %v7885_v11, %v1566_v48  ;;  %v7925_v53 = vadd.f32 %v7924_v25, %v7923_v23  ;;  %v11279_v11 = vld [vmem:[#allocation14_spill] sm:$0xff]  ;;  %v1688_v25 = vadd.f32 %v7919_v3, %v1623_v44 }
 0x133   : > { %v7887_v26 = vpop.f32.mrf.mxu0  ;;  %v7926_v27 = vpop.f32.mrf.mxu1  ;;  %v7860_v13 = vadd.f32 %v11279_v11, %v11278_v12 }
 0x134   : > { %v7888_v56 = vadd.f32 %v7887_v26, %v7886_v24 }
 0x135   : > { %v7889_v28 = vpop.f32.mrf.mxu0  ;;  %v7927_v29 = vpop.f32.mrf.mxu1 }
 0x136   : > { %v1634_v4 = vadd.f32 %v7888_v56, %v1569_v47 }
 0x137   : > { %v7890_v30 = vpop.f32.mrf.mxu0  ;;  %v9812_v33 = vpop.f32.mrf.mxu1 }
 0x138   : > { %11275 = vst [vmem:[#allocation15_spill] sm:$0xff] %v9812_v33  ;;  %v7811_v33 = vadd.f32 %v7810_v62, %v7809_v61  ;;  %v7851_v61 = vadd.f32 %v9793_v1, %v9789_v63  ;;  %v7814_v62 = vadd.f32 %v9795_v2, %v9791_v0  ;;  %v1696_v1 = vadd.f32 %v7925_v53, %v1631_v51  ;;  %v11280_v0 = vld [vmem:[#allocation11_spill] sm:$0xff]  ;;  %v11281_v2 = vld [vmem:[#allocation12_spill] sm:$0xff] }
 0x139   : > { %v9814_v34 = vpop.f32.mrf.mxu0  ;;  %v9816_v38 = vpop.f32.mrf.mxu1  ;;  %v7854_v23 = vadd.f32 %v11281_v2, %v11280_v0  ;;  %v7891_v24 = vadd.f32 %v7890_v30, %v7889_v28  ;;  %v8990_v0 = vld [vmem:[%s11286_s28 + $0x40] sm:$0xff]   ;;  %v8991_v2 = vld [vmem:[%s11226_s4 + $0x78] sm:$0xff]  }
 0x13a   : > { %11276 = vst [vmem:[#allocation16_spill] sm:$0xff] %v9814_v34  ;;  %v1509_v49 = vadd.f32 %v7811_v33, %v7159_v31  ;;  %v1512_v22 = vadd.f32 %v7814_v62, %v7159_v31 }
 0x13b   : > { %v7893_v39 = vpop.f32.mrf.mxu0  ;;  %v9818_v42 = vpop.f32.mrf.mxu1 }
 0x13c   : > { %11277 = vst [vmem:[#allocation17_spill] sm:$0xff] %v9818_v42  ;;  %v7820_v42 = vadd.f32 %v7819_v10, %v7818_v8  ;;  %v7928_v8 = vadd.f32 %v7927_v29, %v7926_v27  ;;  %v1574_v27 = vadd.f32 %v7851_v61, %v1509_v49  ;;  %v1577_v28 = vadd.f32 %v7854_v23, %v1512_v22  ;;  %v8988_v22 = vld [vmem:[%s11286_s28 + $0x28] sm:$0xff]   ;;  %v8989_v23 = vld [vmem:[%s11286_s28 + $0x38] sm:$0xff]  }
 0x13d   : > { %v7895_v43 = vpop.f32.mrf.mxu0  ;;  %v9820_v34 = vpop.f32.mrf.mxu1 }
 0x13e   : > { %v1520_v10 = vadd.f32 %v7820_v42, %v7159_v31  ;;  %v1699_v26 = vadd.f32 %v7928_v8, %v1634_v4  ;;  %v1639_v30 = vadd.f32 %v7891_v24, %v1574_v27  ;;  %v8992_v24 = vld [vmem:[%s11226_s4 + $0x38] sm:$0xff]  }
 0x13f   : > { %v7896_v45 = vpop.f32.mrf.mxu0  ;;  %v7935_v58 = vpop.f32.mrf.mxu1  ;;  %v9002_v27 = vld [vmem:[%s11226_s4 + $0xb8] sm:$0xff]  }
 0x140   : > { %v7897_v63 = vadd.f32 %v7896_v45, %v7895_v43  ;;  %v1585_v29 = vadd.f32 %v7860_v13, %v1520_v10  ;;  %v11283_v43 = vld [vmem:[#allocation15_spill] sm:$0xff]  ;;  %v11285_v13 = vmov 0.0  }
 0x141   : > { %v7898_v55 = vpop.f32.mrf.mxu0  ;;  %v7936_v59 = vpop.f32.mrf.mxu1  ;;  %v11282_v33 = vld [vmem:[#allocation16_spill] sm:$0xff]  ;;  %v7931_v52 = vadd.f32 %v9816_v38, %v11283_v43  ;;  %v9008_v43 = vld [vmem:[%s11226_s4 + $0x8] sm:$0xff]  }
 0x142   : > { %v7894_v19 = vadd.f32 %v7893_v39, %v11282_v33  ;;  %v1647_v40 = vadd.f32 %v7897_v63, %v1582_v15  ;;  %v7937_v31 = vadd.f32 %v7936_v59, %v7935_v58  ;;  %v8986_v63 = vld [vmem:[%s11286_s28 + $0x18] sm:$0xff]   ;;  %v8995_v15 = vld [vmem:[%s11226_s4 + $0x68] sm:$0xff]   ;;  %v8998_v33 = vld [vmem:[%s11226_s4 + $0x20] sm:$0xff]  }
 0x143   : > { %v7899_v60 = vpop.f32.mrf.mxu0  ;;  %v7938_v18 = vpop.f32.mrf.mxu1  ;;  %v1704_v59 = vadd.f32 %v7931_v52, %v1639_v30  ;;  %v9014_v30 = vld [vmem:[%s11226_s4 + $0xa0] sm:$0xff]  }
 0x144   : > { %v7900_v7 = vadd.f32 %v7899_v60, %v7898_v55  ;;  %v1642_v39 = vadd.f32 %v7894_v19, %v1577_v28  ;;  %v11284_v55 = vld [vmem:[#allocation17_spill] sm:$0xff]  ;;  %v1712_v38 = vadd.f32 %v7937_v31, %v1647_v40  ;;  %v9006_v19 = vld [vmem:[%s11226_s4 + $0xb0] sm:$0xff]   ;;  %v9009_v40 = vld [vmem:[%s11226_s4 + $0xe8] sm:$0xff]  }
 0x145   : > { %v8458_v20 = vpop.f32.mrf.mxu0  ;;  %v7939_v21 = vpop.f32.mrf.mxu1  ;;  %v7934_v57 = vadd.f32 %v9820_v34, %v11284_v55  ;;  %v9010_v31 = vld [vmem:[%s11226_s4 + $0xa8] sm:$0xff]   ;;  %v9013_v28 = vld [vmem:[%s11226_s4 + $0xe0] sm:$0xff]  }
 0x146   : > { %v1761_v17 = vadd.f32 %v8458_v20, %v1696_v1  ;;  %v1650_v54 = vadd.f32 %v7900_v7, %v1585_v29  ;;  %v7940_v46 = vadd.f32 %v7939_v21, %v7938_v18  ;;  %v8984_v18 = vld [vmem:[%s11286_s28 + $0x8] sm:$0xff]   ;;  %v8985_v20 = vld [vmem:[%s11286_s28 + $0x20] sm:$0xff]   ;;  %v8987_v1 = vld [vmem:[%s11286_s28 + $0x30] sm:$0xff]  }
 0x147   : > { %v1752_v9 = vpop.f32.mrf.mxu0  ;;  %v1707_v5 = vadd.f32 %v7934_v57, %v1642_v39  ;;  %v8993_v7 = vld [vmem:[%s11226_s4 + $0x70] sm:$0xff]   ;;  %v8999_v21 = vld [vmem:[%s11226_s4 + $0x58] sm:$0xff]   ;;  %v9011_v52 = vld [vmem:[%s11226_s4 + $0x40] sm:$0xff]  }
 0x148   : > { %v1753_v41 = vadd.f32 %v1752_v9, %v1688_v25  ;;  %v1785_v48 = vmax.f32 %v1761_v17, 0.0  ;;  %v1715_v60 = vadd.f32 %v7940_v46, %v1650_v54  ;;  %v8994_v9 = vld [vmem:[%s11226_s4 + $0x30] sm:$0xff]   ;;  %v8996_v17 = vld [vmem:[%s11226_s4 + $0x28] sm:$0xff]   ;;  %v8997_v25 = vld [vmem:[%s11226_s4 + $0x60] sm:$0xff]  }
 0x149   : > { %v8459_v36 = vpop.f32.mrf.mxu0  ;;  %v9005_v29 = vld [vmem:[%s11226_s4 + $0xf0] sm:$0xff]   ;;  %v9016_v54 = vld [vmem:[%s11226_s4 + $0xd8] sm:$0xff]   ;;  %v9012_v46 = vld [vmem:[%s11226_s4] sm:$0xff]  }
 0x14a   : > { %v1764_v42 = vadd.f32 %v8459_v36, %v1699_v26  ;;  %v1783_v32 = vmax.f32 %v1753_v41, 0.0  ;;  %v9001_v26 = vld [vmem:[%s11226_s4 + $0xf8] sm:$0xff]   ;;  %v9004_v41 = vld [vmem:[%s11226_s4 + $0x10] sm:$0xff]   ;;  %v9024_v39 = vld [vmem:[%s11226_s4 + $0xc8] sm:$0xff]  }
 0x14b   : > { %v1755_v45 = vpop.f32.mrf.mxu0  ;;  %v9000_v36 = vld [vmem:[%s11226_s4 + $0x18] sm:$0xff]   ;;  %v9026_v55 = vld [vmem:[%s11226_s4 + $0x88] sm:$0xff]   ;;  %v9028_v57 = vld [vmem:[%s11226_s4 + $0xc0] sm:$0xff]  }
 0x14c   : > { %v1786_v50 = vmax.f32 %v1764_v42, 0.0  ;;  %v1756_v56 = vadd.f32 %v1755_v45, %v1691_v37  ;;  %v9003_v37 = vld [vmem:[%s11226_s4 + $0x50] sm:$0xff]   ;;  %v9007_v42 = vld [vmem:[%s11226_s4 + $0x48] sm:$0xff]   ;;  %v9018_v45 = vld [vmem:[%s11226_s4 + $0x98] sm:$0xff]  }
 0x14d   : > { %v8462_v58 = vpop.f32.mrf.mxu0 }
 0x14e   : > { %v9841_v35 = vpack.c.bf16 %v1786_v50, %v1785_v48  ;;  %v1784_v47 = vmax.f32 %v1756_v56, 0.0  ;;  %v1777_v53 = vadd.f32 %v8462_v58, %v1712_v38  ;;  %v9015_v48 = vld [vmem:[%s11226_s4 + $0x178] sm:$0xff]   ;;  %v9020_v50 = vld [vmem:[%s11226_s4 + $0xd0] sm:$0xff]   ;;  %v9030_v58 = vld [vmem:[%s11226_s4 + $0x80] sm:$0xff]  }
 0x14f   : > { %v1768_v49 = vpop.f32.mrf.mxu0  ;;  %v9022_v56 = vld [vmem:[%s11226_s4 + $0x90] sm:$0xff]  }
 0x150   : > { %7778 = vst [vmem:[%s634_s20 + $0x8] sm:$0xff] %v9841_v35   ;;  %v9844_v51 = vpack.c.bf16 %v1784_v47, %v1783_v32  ;;  %v1769_v34 = vadd.f32 %v1768_v49, %v1704_v59  ;;  %v1789_v44 = vmax.f32 %v1777_v53, 0.0  ;;  %v9033_v32 = vld [vmem:[%s11226_s4 + $0x1f8] sm:$0xff]  }
 0x151   : > { %v8463_v61 = vpop.f32.mrf.mxu0 }
 0x152   : > { %7742 = vst [vmem:[%s634_s20] sm:$0xff] %v9844_v51   ;;  %v1780_v62 = vadd.f32 %v8463_v61, %v1715_v60  ;;  %v1787_v8 = vmax.f32 %v1769_v34, 0.0 }
 0x153   : > { %v1771_v6 = vpop.f32.mrf.mxu0 }
 0x154   : > { %v1790_v3 = vmax.f32 %v1780_v62, 0.0  ;;  %v1772_v4 = vadd.f32 %v1771_v6, %v1707_v5 }
 0x156   : > { %v9847_v10 = vpack.c.bf16 %v1790_v3, %v1789_v44  ;;  %v1788_v12 = vmax.f32 %v1772_v4, 0.0  ;;  %v9017_v4 = vld [vmem:[%s11226_s4 + $0x138] sm:$0xff]  }
 0x158   : > { %7780 = vst [vmem:[%s634_s20 + $0x18] sm:$0xff] %v9847_v10   ;;  %v9850_v11 = vpack.c.bf16 %v1788_v12, %v1787_v8  ;;  %8465 = vmatpush3.bf16.msra.mxu0 %v9847_v10  ;;  %8489 = vmatpush3.bf16.msra.mxu1 %v9847_v10  ;;  %v9019_v12 = vld [vmem:[%s11226_s4 + $0x170] sm:$0xff]  }
 0x159   : > { %8466 = vmatprep.subr.bf16.mxu0 %v11285_v13  ;;  %8490 = vmatprep.subr.bf16.mxu1 %v11285_v13 }
 0x15a   : > { %7779 = vst [vmem:[%s634_s20 + $0x10] sm:$0xff] %v9850_v11   ;;  %s11252_s20 = sand.u32 1, %s9358_s30  }
 0x15b   : > { %s10226_s14 = sshll.u32 %s11252_s20, 3 }
 0x15c   : > { %8467 = vmatpush3.bf16.msra.mxu0 %v9850_v11  ;;  %8491 = vmatpush3.bf16.msra.mxu1 %v9850_v11  ;;  %s11253_s26 = scalar_lea.vmem [#allocation2], %s10226_s14  ;;  %s11287_s20 = scalar_lea.vmem [#allocation2], %s10226_s14 }
 0x15d   : > { %8468 = vmatprep.subr.bf16.mxu0 %v11285_v13  ;;  %8492 = vmatprep.subr.bf16.mxu1 %v11285_v13 }
 0x160   : > { %8469 = vmatpush3.bf16.msra.mxu0 %v9841_v35  ;;  %8493 = vmatpush3.bf16.msra.mxu1 %v9841_v35 }
 0x161   : > { %8470 = vmatprep.subr.bf16.mxu0 %v11285_v13  ;;  %8494 = vmatprep.subr.bf16.mxu1 %v11285_v13 }
 0x164   : > { %8471 = vmatpush3.bf16.msra.mxu0 %v9844_v51  ;;  %8495 = vmatpush3.bf16.msra.mxu1 %v9844_v51 }
 0x165   : > { %8476 = vmatprep.subr.bf16.mxu0 %v11285_v13  ;;  %8512 = vmatprep.subr.bf16.mxu1 %v11285_v13 }
 0x167   : > { %8473 = vmatmul.mubr.msk.bf16.vlgmr.msra.gmra.mxu0 %vm1838_vm1, %v8982_v14  ;;  %8497 = vmatmul.mubr.msk.bf16.vlgmr.msra.gmra.mxu1 %vm1838_vm1, %v8983_v16  ;;  %v9021_v14 = vld [vmem:[%s11226_s4 + $0x130] sm:$0xff]   ;;  %v9023_v16 = vld [vmem:[%s11226_s4 + $0x168] sm:$0xff]  }
 0x168   : > { %8477 = vmatpush3.bf16.msra.mxu0 %v9847_v10  ;;  %8513 = vmatpush3.bf16.msra.mxu1 %v9847_v10 }
 0x169   : > { %8478 = vmatprep.subr.bf16.mxu0 %v11285_v13  ;;  %8514 = vmatprep.subr.bf16.mxu1 %v11285_v13 }
 0x16a   : > { %8484 = vmatprep.mubr.msk.bf16.mxu0 %vm9369_vm0, %v11285_v13  ;;  %8520 = vmatprep.mubr.msk.bf16.mxu1 %vm9369_vm0, %v11285_v13 }
 0x16c   : > { %8479 = vmatpush3.bf16.msra.mxu0 %v9850_v11  ;;  %8515 = vmatpush3.bf16.msra.mxu1 %v9850_v11 }
 0x16d   : > { %8480 = vmatprep.subr.bf16.mxu0 %v11285_v13  ;;  %8516 = vmatprep.subr.bf16.mxu1 %v11285_v13 }
 0x170   : > { %8481 = vmatpush3.bf16.msra.mxu0 %v9841_v35  ;;  %8517 = vmatpush3.bf16.msra.mxu1 %v9841_v35 }
 0x171   : > { %8482 = vmatprep.subr.bf16.mxu0 %v11285_v13  ;;  %8518 = vmatprep.subr.bf16.mxu1 %v11285_v13 }
 0x174   : > { %8483 = vmatpush3.bf16.msra.mxu0 %v9844_v51  ;;  %8519 = vmatpush3.bf16.msra.mxu1 %v9844_v51 }
 0x175   : > { %8500 = vmatprep.subr.bf16.mxu0 %v11285_v13  ;;  %8536 = vmatprep.subr.bf16.mxu1 %v11285_v13 }
 0x177   : > { %8485 = vmatmul.mubr.msk.bf16.vlgmr.msra.gmra.mxu0 %vm1838_vm1, %v8984_v18  ;;  %8521 = vmatmul.mubr.msk.bf16.vlgmr.msra.gmra.mxu1 %vm1838_vm1, %v8985_v20  ;;  %v9025_v18 = vld [vmem:[%s11226_s4 + $0x128] sm:$0xff]   ;;  %v9027_v20 = vld [vmem:[%s11226_s4 + $0x160] sm:$0xff]  }
 0x178   : > { %8501 = vmatpush3.bf16.msra.mxu0 %v9847_v10  ;;  %8537 = vmatpush3.bf16.msra.mxu1 %v9847_v10 }
 0x179   : > { %8502 = vmatprep.subr.bf16.mxu0 %v11285_v13  ;;  %8538 = vmatprep.subr.bf16.mxu1 %v11285_v13 }
 0x17a   : > { %8508 = vmatprep.mubr.msk.bf16.mxu0 %vm9369_vm0, %v11285_v13  ;;  %8544 = vmatprep.mubr.msk.bf16.mxu1 %vm9369_vm0, %v11285_v13 }
 0x17c   : > { %8503 = vmatpush3.bf16.msra.mxu0 %v9850_v11  ;;  %8539 = vmatpush3.bf16.msra.mxu1 %v9850_v11 }
 0x17d   : > { %8504 = vmatprep.subr.bf16.mxu0 %v11285_v13  ;;  %8540 = vmatprep.subr.bf16.mxu1 %v11285_v13 }
 0x180   : > { %8505 = vmatpush3.bf16.msra.mxu0 %v9841_v35  ;;  %8541 = vmatpush3.bf16.msra.mxu1 %v9841_v35 }
 0x181   : > { %8506 = vmatprep.subr.bf16.mxu0 %v11285_v13  ;;  %8542 = vmatprep.subr.bf16.mxu1 %v11285_v13 }
 0x184   : > { %8507 = vmatpush3.bf16.msra.mxu0 %v9844_v51  ;;  %8543 = vmatpush3.bf16.msra.mxu1 %v9844_v51 }
 0x185   : > { %8524 = vmatprep.subr.bf16.mxu0 %v11285_v13  ;;  %8560 = vmatprep.subr.bf16.mxu1 %v11285_v13 }
 0x187   : > { %8509 = vmatmul.mubr.msk.bf16.vlgmr.msra.gmra.mxu0 %vm1838_vm1, %v8986_v63  ;;  %8545 = vmatmul.mubr.msk.bf16.vlgmr.msra.gmra.mxu1 %vm1838_vm1, %v8987_v1 }
 0x188   : > { %8525 = vmatpush3.bf16.msra.mxu0 %v9847_v10  ;;  %8561 = vmatpush3.bf16.msra.mxu1 %v9847_v10 }
 0x189   : > { %8526 = vmatprep.subr.bf16.mxu0 %v11285_v13  ;;  %8562 = vmatprep.subr.bf16.mxu1 %v11285_v13 }
 0x18a   : > { %8532 = vmatprep.mubr.msk.bf16.mxu0 %vm9369_vm0, %v11285_v13  ;;  %8568 = vmatprep.mubr.msk.bf16.mxu1 %vm9369_vm0, %v11285_v13 }
 0x18c   : > { %8527 = vmatpush3.bf16.msra.mxu0 %v9850_v11  ;;  %8563 = vmatpush3.bf16.msra.mxu1 %v9850_v11 }
 0x18d   : > { %8528 = vmatprep.subr.bf16.mxu0 %v11285_v13  ;;  %8564 = vmatprep.subr.bf16.mxu1 %v11285_v13 }
 0x190   : > { %8529 = vmatpush3.bf16.msra.mxu0 %v9841_v35  ;;  %8565 = vmatpush3.bf16.msra.mxu1 %v9841_v35 }
 0x191   : > { %8530 = vmatprep.subr.bf16.mxu0 %v11285_v13  ;;  %8566 = vmatprep.subr.bf16.mxu1 %v11285_v13 }
 0x194   : > { %8531 = vmatpush3.bf16.msra.mxu0 %v9844_v51  ;;  %8567 = vmatpush3.bf16.msra.mxu1 %v9844_v51 }
 0x195   : > { %8548 = vmatprep.subr.bf16.mxu0 %v11285_v13  ;;  %8020 = vmatprep.subr.bf16.mxu1 %v9001_v26 }
 0x197   : > { %8533 = vmatmul.mubr.msk.bf16.vlgmr.msra.gmra.mxu0 %vm1838_vm1, %v8988_v22  ;;  %8569 = vmatmul.mubr.msk.bf16.vlgmr.msra.gmra.mxu1 %vm1838_vm1, %v8990_v0  ;;  %v9029_v22 = vld [vmem:[%s11226_s4 + $0x120] sm:$0xff]  }
 0x198   : > { %8549 = vmatpush3.bf16.msra.mxu0 %v9847_v10  ;;  %8556 = vmatprep.mubr.msk.bf16.mxu0 %vm9369_vm0, %v11285_v13 }
 0x199   : > { %8550 = vmatprep.subr.bf16.mxu0 %v11285_v13  ;;  %8021 = vmatpush3.bf16.msra.mxu1 %v9002_v27  ;;  %v9035_v27 = vld [vmem:[%s11226_s4 + $0x150] sm:$0xff]  }
 0x19a   : > { %8022 = vmatprep.subr.bf16.mxu1 %v9005_v29  ;;  %v9037_v29 = vld [vmem:[%s11226_s4 + $0x1f0] sm:$0xff]  }
 0x19c   : > { %8551 = vmatpush3.bf16.msra.mxu0 %v9850_v11 }
 0x19d   : > { %8552 = vmatprep.subr.bf16.mxu0 %v11285_v13  ;;  %8023 = vmatpush3.bf16.msra.mxu1 %v9006_v19  ;;  %v9036_v19 = vld [vmem:[%s11226_s4 + $0x110] sm:$0xff]  }
 0x19e   : > { %8024 = vmatprep.subr.bf16.mxu1 %v9009_v40  ;;  %v9040_v40 = vld [vmem:[%s11226_s4 + $0x108] sm:$0xff]  }
 0x1a0   : > { %8553 = vmatpush3.bf16.msra.mxu0 %v9841_v35 }
 0x1a1   : > { %8554 = vmatprep.subr.bf16.mxu0 %v11285_v13  ;;  %8025 = vmatpush3.bf16.msra.mxu1 %v9010_v31  ;;  %v9042_v31 = vld [vmem:[%s11226_s4 + $0x1a8] sm:$0xff]  }
 0x1a2   : > { %8026 = vmatprep.subr.bf16.mxu1 %v9013_v28 }
 0x1a4   : > { %8555 = vmatpush3.bf16.msra.mxu0 %v9844_v51 }
 0x1a5   : > { %7998 = vmatprep.subr.bf16.mxu0 %v8991_v2  ;;  %8027 = vmatpush3.bf16.msra.mxu1 %v9014_v30  ;;  %v9031_v2 = vld [vmem:[%s11226_s4 + $0x158] sm:$0xff]  }
 0x1a6   : > { %8028 = vmatprep.subr.bf16.mxu1 %v9016_v54 }
 0x1a7   : > { %8557 = vmatmul.mubr.msk.bf16.vlgmr.msra.gmra.mxu0 %vm1838_vm1, %v8989_v23 }
 0x1a8   : > { %7999 = vmatpush3.bf16.msra.mxu0 %v8992_v24 }
 0x1a9   : > { %8000 = vmatprep.subr.bf16.mxu0 %v8993_v7  ;;  %8029 = vmatpush3.bf16.msra.mxu1 %v9018_v45  ;;  %v9047_v45 = vld [vmem:[%s11226_s4 + $0x1d8] sm:$0xff]  }
 0x1aa   : > { %8030 = vmatprep.subr.bf16.mxu1 %v9020_v50 }
 0x1ac   : > { %8001 = vmatpush3.bf16.msra.mxu0 %v8994_v9 }
 0x1ad   : > { %8002 = vmatprep.subr.bf16.mxu0 %v8995_v15  ;;  %8031 = vmatpush3.bf16.msra.mxu1 %v9022_v56  ;;  %v9032_v15 = vld [vmem:[%s11226_s4 + $0x118] sm:$0xff]  }
 0x1ae   : > { %8032 = vmatprep.subr.bf16.mxu1 %v9024_v39  ;;  %v9048_v39 = vld [vmem:[%s11226_s4 + $0x238] sm:$0xff]  }
 0x1b0   : > { %8003 = vmatpush3.bf16.msra.mxu0 %v8996_v17  ;;  %v9034_v17 = vld [vmem:[%s11226_s4 + $0x1b8] sm:$0xff]  }
 0x1b1   : > { %8004 = vmatprep.subr.bf16.mxu0 %v8997_v25  ;;  %8033 = vmatpush3.bf16.msra.mxu1 %v9026_v55  ;;  %v9049_v55 = vld [vmem:[%s11226_s4 + $0x198] sm:$0xff]  }
 0x1b2   : > { %8034 = vmatprep.subr.bf16.mxu1 %v9028_v57 }
 0x1b4   : > { %8005 = vmatpush3.bf16.msra.mxu0 %v8998_v33 }
 0x1b5   : > { %8006 = vmatprep.subr.bf16.mxu0 %v8999_v21  ;;  %8035 = vmatpush3.bf16.msra.mxu1 %v9030_v58  ;;  %v9038_v21 = vld [vmem:[%s11226_s4 + $0x1b0] sm:$0xff]  }
 0x1b6   : > { %8064 = vmatprep.subr.bf16.mxu1 %v9033_v32  ;;  %v9050_v32 = vld [vmem:[%s11226_s4 + $0x1d0] sm:$0xff]  }
 0x1b8   : > { %8007 = vmatpush3.bf16.msra.mxu0 %v9000_v36  ;;  %v9039_v36 = vld [vmem:[%s11226_s4 + $0x148] sm:$0xff]  }
 0x1b9   : > { %8008 = vmatprep.subr.bf16.mxu0 %v9003_v37  ;;  %v9041_v37 = vld [vmem:[%s11226_s4 + $0x1e8] sm:$0xff]  }
 0x1bc   : > { %8009 = vmatpush3.bf16.msra.mxu0 %v9004_v41  ;;  %v9043_v41 = vld [vmem:[%s11226_s4 + $0x140] sm:$0xff]  }
 0x1bd   : > { %8010 = vmatprep.subr.bf16.mxu0 %v9007_v42  ;;  %v9045_v42 = vld [vmem:[%s11226_s4 + $0x1e0] sm:$0xff]  }
 0x1c0   : > { %8011 = vmatpush3.bf16.msra.mxu0 %v9008_v43  ;;  %v9044_v43 = vld [vmem:[%s11226_s4 + $0x100] sm:$0xff]  }
 0x1c1   : > { %8012 = vmatprep.subr.bf16.mxu0 %v9011_v52  ;;  %v9046_v52 = vld [vmem:[%s11226_s4 + $0x1a0] sm:$0xff]  }
 0x1c4   : > { %8013 = vmatpush3.bf16.msra.mxu0 %v9012_v46 }
 0x1c5   : > { %8042 = vmatprep.subr.bf16.mxu0 %v9015_v48 }
 0x227   : > { %v1876_v35 = vpop.f32.mrf.mxu0  ;;  %v1982_v47 = vpop.f32.mrf.mxu1 }
 0x229   : > { %v8474_v38 = vpop.f32.mrf.mxu0  ;;  %v8498_v49 = vpop.f32.mrf.mxu1 }
 0x22a   : > { %v9052_v38 = vld [vmem:[%s11226_s4 + $0x190] sm:$0xff]   ;;  %v9053_v49 = vld [vmem:[%s11226_s4 + $0x1c8] sm:$0xff]  }
 0x22b   : > { %v1879_v51 = vpop.f32.mrf.mxu0  ;;  %v1985_v53 = vpop.f32.mrf.mxu1 }
 0x22c   : > { %v1883_v8 = vpack.c.bf16 %v1879_v51, %v1876_v35  ;;  %v1989_v25 = vpack.c.bf16 %v1985_v53, %v1982_v47  ;;  %v9051_v47 = vld [vmem:[%s11226_s4 + $0x230] sm:$0xff]   ;;  %v9054_v51 = vld [vmem:[%s11226_s4 + $0x228] sm:$0xff]  }
 0x22d   : > { %v8475_v59 = vpop.f32.mrf.mxu0  ;;  %v8499_v60 = vpop.f32.mrf.mxu1  ;;  %v9055_v53 = vld [vmem:[%s11226_s4 + $0x188] sm:$0xff]  }
 0x22e   : > { %v9056_v59 = vld [vmem:[%s11226_s4 + $0x1c0] sm:$0xff]  }
 0x237   : > { %v1929_v61 = vpop.f32.mrf.mxu0  ;;  %v10075_v34 = vpop.f32.mrf.mxu1 }
 0x239   : > { %v8486_v62 = vpop.f32.mrf.mxu0  ;;  %v8522_v5 = vpop.f32.mrf.mxu1 }
 0x23b   : > { %v1932_v6 = vpop.f32.mrf.mxu0  ;;  %v10077_v44 = vpop.f32.mrf.mxu1 }
 0x23c   : > { %v1936_v3 = vpack.c.bf16 %v1932_v6, %v1929_v61  ;;  %v2095_v57 = vpack.c.bf16 %v10077_v44, %v10075_v34  ;;  %v9057_v61 = vld [vmem:[%s11226_s4 + $0x220] sm:$0xff]   ;;  %v9059_v44 = vld [vmem:[%s11226_s4 + $0x218] sm:$0xff]  }
 0x23d   : > { %v8487_v10 = vpop.f32.mrf.mxu0  ;;  %v8523_v11 = vpop.f32.mrf.mxu1  ;;  %v9058_v34 = vld [vmem:[%s11226_s4 + $0x180] sm:$0xff]  }
 0x23e   : > { %2923 = vmatprep.mubr.bf16.mxu0 %v1936_v3  ;;  %v9061_v10 = vld [vmem:[%s11226_s4 + $0x208] sm:$0xff]  }
 0x23f   : > { %2924 = vmatmul.mubr.bf16.vlgmr.msra.gmra.mxu0 %v1883_v8  ;;  %v9060_v8 = vld [vmem:[%s11226_s4 + $0x210] sm:$0xff]  }
 0x240   : > { %8043 = vmatpush3.bf16.msra.mxu0 %v9017_v4 }
 0x241   : > { %8044 = vmatprep.subr.bf16.mxu0 %v9019_v12  ;;  %v9062_v12 = vld [vmem:[%s11226_s4 + $0x200] sm:$0xff]  }
 0x244   : > { %8045 = vmatpush3.bf16.msra.mxu0 %v9021_v14 }
 0x245   : > { %8046 = vmatprep.subr.bf16.mxu0 %v9023_v16 }
 0x247   : > { %v2035_v63 = vpop.f32.mrf.mxu0  ;;  %v10097_v1 = vpop.f32.mrf.mxu1 }
 0x248   : > { %8047 = vmatpush3.bf16.msra.mxu0 %v9025_v18 }
 0x249   : > { %v8510_v0 = vpop.f32.mrf.mxu0  ;;  %8048 = vmatprep.subr.bf16.mxu0 %v9027_v20  ;;  %v8546_v23 = vpop.f32.mrf.mxu1 }
 0x24b   : > { %v2038_v24 = vpop.f32.mrf.mxu0  ;;  %v10105_v7 = vpop.f32.mrf.mxu1 }
 0x24c   : > { %v2042_v9 = vpack.c.bf16 %v2038_v24, %v2035_v63  ;;  %8049 = vmatpush3.bf16.msra.mxu0 %v9029_v22  ;;  %v2201_v3 = vpack.c.bf16 %v10105_v7, %v10097_v1 }
 0x24d   : > { %v8511_v26 = vpop.f32.mrf.mxu0  ;;  %8050 = vmatprep.subr.bf16.mxu0 %v9031_v2  ;;  %v8547_v33 = vpop.f32.mrf.mxu1 }
 0x24e   : > { %2964 = vmatprep.mubr.bf16.mxu1 %v2042_v9 }
 0x24f   : > { %2965 = vmatmul.mubr.bf16.vlgmr.msra.gmra.mxu1 %v1989_v25 }
 0x250   : > { %8051 = vmatpush3.bf16.msra.mxu0 %v9032_v15  ;;  %8065 = vmatpush3.bf16.msra.mxu1 %v9034_v17  ;;  %v7310_v17 = vld [vmem:[%s11227_s5] ss:$0 sm:$0xff] }
 0x251   : > { %8052 = vmatprep.subr.bf16.mxu0 %v9035_v27  ;;  %8066 = vmatprep.subr.bf16.mxu1 %v9037_v29 }
 0x254   : > { %8053 = vmatpush3.bf16.msra.mxu0 %v9036_v19  ;;  %8067 = vmatpush3.bf16.msra.mxu1 %v9038_v21 }
 0x255   : > { %8054 = vmatprep.subr.bf16.mxu0 %v9039_v36  ;;  %8068 = vmatprep.subr.bf16.mxu1 %v9041_v37 }
 0x257   : > { %v2141_v28 = vpop.f32.mrf.mxu0  ;;  %v10143_v30 = vpop.f32.mrf.mxu1 }
 0x258   : > { %8055 = vmatpush3.bf16.msra.mxu0 %v9040_v40  ;;  %8069 = vmatpush3.bf16.msra.mxu1 %v9042_v31 }
 0x259   : > { %v8534_v54 = vpop.f32.mrf.mxu0  ;;  %8056 = vmatprep.subr.bf16.mxu0 %v9043_v41  ;;  %8070 = vmatprep.subr.bf16.mxu1 %v9045_v42  ;;  %v8570_v46 = vpop.f32.mrf.mxu1 }
 0x25b   : > { %v2144_v48 = vpop.f32.mrf.mxu0  ;;  %v2303_v50 = vpop.f32.mrf.mxu1 }
 0x25c   : > { %v2148_v56 = vpack.c.bf16 %v2144_v48, %v2141_v28  ;;  %8057 = vmatpush3.bf16.msra.mxu0 %v9044_v43  ;;  %8071 = vmatpush3.bf16.msra.mxu1 %v9046_v52  ;;  %v2307_v11 = vpack.c.bf16 %v2303_v50, %v10143_v30 }
 0x25d   : > { %v8535_v58 = vpop.f32.mrf.mxu0  ;;  %8572 = vmatprep.subr.bf16.mxu0 %v11285_v13  ;;  %8072 = vmatprep.subr.bf16.mxu1 %v9047_v45  ;;  %v8571_v35 = vpop.f32.mrf.mxu1 }
 0x25e   : > { %3005 = vmatprep.mubr.bf16.mxu0 %v2148_v56  ;;  %v9064_v35 = vld [vmem:[%s11228_s6 + $0x20] sm:$0xff]  }
 0x25f   : > { %3006 = vmatmul.mubr.bf16.vlgmr.msra.gmra.mxu0 %v2095_v57 }
 0x260   : > { %8573 = vmatpush3.bf16.msra.mxu0 %v9048_v39  ;;  %8073 = vmatpush3.bf16.msra.mxu1 %v9049_v55 }
 0x261   : > { %8574 = vmatprep.subr.bf16.mxu0 %v11285_v13  ;;  %8074 = vmatprep.subr.bf16.mxu1 %v9050_v32  ;;  %v9063_v32 = vld [vmem:[%s11228_s6] sm:$0xff]  }
 0x262   : > { %8588 = vmatprep.mubr.msk.bf16.mxu0 %vm9369_vm0, %v11285_v13 }
 0x264   : > { %8575 = vmatpush3.bf16.msra.mxu0 %v9051_v47  ;;  %8075 = vmatpush3.bf16.msra.mxu1 %v9052_v38  ;;  %v9065_v47 = vld [vmem:[%s11228_s6 + $0x8] sm:$0xff]   ;;  %v9066_v38 = vld [vmem:[%s11228_s6 + $0x30] sm:$0xff]  }
 0x265   : > { %8576 = vmatprep.subr.bf16.mxu0 %v11285_v13  ;;  %8076 = vmatprep.subr.bf16.mxu1 %v9053_v49  ;;  %v9081_v49 = vld [vmem:[%s11229_s7 + $0xf8] sm:$0xff]  }
 0x267   : > { %v2247_v60 = vpop.f32.mrf.mxu0 }
 0x268   : > { %8577 = vmatpush3.bf16.msra.mxu0 %v9054_v51  ;;  %8077 = vmatpush3.bf16.msra.mxu1 %v9055_v53  ;;  %v9067_v51 = vld [vmem:[%s11228_s6 + $0x10] sm:$0xff]   ;;  %v9071_v53 = vld [vmem:[%s11228_s6 + $0x40] sm:$0xff]  }
 0x269   : > { %v8558_v62 = vpop.f32.mrf.mxu0  ;;  %8578 = vmatprep.subr.bf16.mxu0 %v11285_v13  ;;  %8078 = vmatprep.subr.bf16.mxu1 %v9056_v59  ;;  %v9068_v59 = vld [vmem:[%s11228_s6 + $0x18] sm:$0xff]  }
 0x26a   : > { %v9073_v62 = vld [vmem:[%s11229_s7 + $0x38] sm:$0xff]  }
 0x26b   : > { %v2250_v5 = vpop.f32.mrf.mxu0 }
 0x26c   : > { %v2254_v6 = vpack.c.bf16 %v2250_v5, %v2247_v60  ;;  %8579 = vmatpush3.bf16.msra.mxu0 %v9057_v61  ;;  %8079 = vmatpush3.bf16.msra.mxu1 %v9058_v34  ;;  %v9069_v60 = vld [vmem:[%s11228_s6 + $0x28] sm:$0xff]   ;;  %v9072_v61 = vld [vmem:[%s11229_s7 + $0x78] sm:$0xff]   ;;  %v9074_v5 = vld [vmem:[%s11229_s7 + $0x70] sm:$0xff]  }
 0x26d   : > { %8580 = vmatprep.subr.bf16.mxu0 %v11285_v13  ;;  %v8559_v4 = vpop.f32.mrf.mxu0  ;;  %8592 = vmatprep.subr.bf16.mxu1 %v11285_v13  ;;  %v9070_v34 = vld [vmem:[%s11228_s6 + $0x38] sm:$0xff]  }
 0x26e   : > { %3046 = vmatprep.mubr.bf16.mxu1 %v2254_v6  ;;  %v9075_v6 = vld [vmem:[%s11229_s7 + $0x30] sm:$0xff]   ;;  %v9078_v4 = vld [vmem:[%s11229_s7 + $0x60] sm:$0xff]  }
 0x26f   : > { %3047 = vmatmul.mubr.bf16.vlgmr.msra.gmra.mxu1 %v2201_v3  ;;  %v9077_v3 = vld [vmem:[%s11229_s7 + $0x28] sm:$0xff]  }
 0x270   : > { %8581 = vmatpush3.bf16.msra.mxu0 %v9059_v44  ;;  %8594 = vmatprep.mubr.msk.bf16.mxu1 %vm9369_vm0, %v11285_v13  ;;  %v9076_v44 = vld [vmem:[%s11229_s7 + $0x68] sm:$0xff]  }
 0x271   : > { %8582 = vmatprep.subr.bf16.mxu0 %v11285_v13 }
 0x274   : > { %8583 = vmatpush3.bf16.msra.mxu0 %v9060_v8  ;;  %v9079_v8 = vld [vmem:[%s11229_s7 + $0x20] sm:$0xff]  }
 0x275   : > { %8584 = vmatprep.subr.bf16.mxu0 %v11285_v13 }
 0x278   : > { %8585 = vmatpush3.bf16.msra.mxu0 %v9061_v10  ;;  %v9080_v10 = vld [vmem:[%s11229_s7 + $0x58] sm:$0xff]  }
 0x279   : > { %8586 = vmatprep.subr.bf16.mxu0 %v11285_v13 }
 0x27c   : > { %8587 = vmatpush3.bf16.msra.mxu0 %v9062_v12  ;;  %v9082_v12 = vld [vmem:[%s11229_s7 + $0x18] sm:$0xff]  }
 0x27d   : > { %8616 = vmatprep.subr.bf16.mxu0 %v11285_v13 }
 0x27f   : > { %8589 = vmatmul.mubr.bf16.vlgmr.msra.gmra.mxu0 %v2307_v11  ;;  %v9083_v11 = vld [vmem:[%s11229_s7 + $0xb8] sm:$0xff]  }
 0x280   : > { %8618 = vmatprep.mubr.msk.bf16.mxu0 %vm9369_vm0, %v11285_v13 }
 0x2ff   : > { %v8014_v14 = vpop.f32.mrf.mxu0 }
 0x301   : > { %v8015_v18 = vpop.f32.mrf.mxu0 }
 0x302   : > { %v8016_v15 = vadd.f32 %v8015_v18, %v8014_v14  ;;  %v9084_v14 = vld [vmem:[%s11229_s7 + $0x50] sm:$0xff]  }
 0x303   : > { %v8017_v63 = vpop.f32.mrf.mxu0  ;;  %v9086_v18 = vld [vmem:[%s11229_s7 + $0x10] sm:$0xff]  }
 0x304   : > { %v2926_v33 = vadd.f32 %v8016_v15, %v7310_v17  ;;  %v9097_v15 = vld [vmem:[%s11229_s7 + $0x178] sm:$0xff]  }
 0x305   : > { %v8018_v22 = vpop.f32.mrf.mxu0 }
 0x306   : > { %v8019_v26 = vadd.f32 %v8018_v22, %v8017_v63  ;;  %v9088_v63 = vld [vmem:[%s11229_s7 + $0x48] sm:$0xff]  }
 0x307   : > { %v9090_v22 = vld [vmem:[%s11229_s7 + $0x8] sm:$0xff]  }
 0x308   : > { %v2929_v37 = vadd.f32 %v8019_v26, %v7310_v17  ;;  %v9098_v17 = vld [vmem:[%s11229_s7 + $0x98] sm:$0xff]   ;;  %v9102_v26 = vld [vmem:[%s11229_s7 + $0x90] sm:$0xff]  }
 0x30f   : > { %v8036_v16 = vpop.f32.mrf.mxu1 }
 0x311   : > { %v8037_v20 = vpop.f32.mrf.mxu1 }
 0x312   : > { %v8038_v27 = vadd.f32 %v8037_v20, %v8036_v16  ;;  %v9085_v16 = vld [vmem:[%s11229_s7 + $0xf0] sm:$0xff]  }
 0x313   : > { %v8039_v1 = vpop.f32.mrf.mxu1  ;;  %v9087_v20 = vld [vmem:[%s11229_s7 + $0xb0] sm:$0xff]  }
 0x314   : > { %v2967_v40 = vadd.f32 %v8038_v27, %v2926_v33  ;;  %v9104_v27 = vld [vmem:[%s11229_s7 + $0xc8] sm:$0xff]   ;;  %v9108_v33 = vld [vmem:[%s11229_s7 + $0xc0] sm:$0xff]  }
 0x315   : > { %v8040_v0 = vpop.f32.mrf.mxu1 }
 0x316   : > { %v8041_v19 = vadd.f32 %v8040_v0, %v8039_v1  ;;  %v9089_v1 = vld [vmem:[%s11229_s7 + $0xe8] sm:$0xff]  }
 0x317   : > { %v9091_v0 = vld [vmem:[%s11229_s7 + $0xa8] sm:$0xff]  }
 0x318   : > { %v2970_v42 = vadd.f32 %v8041_v19, %v2929_v37  ;;  %v9110_v19 = vld [vmem:[%s11229_s7 + $0x80] sm:$0xff]  }
 0x31f   : > { %v8058_v2 = vpop.f32.mrf.mxu0 }
 0x321   : > { %v8059_v24 = vpop.f32.mrf.mxu0 }
 0x322   : > { %v8060_v21 = vadd.f32 %v8059_v24, %v8058_v2  ;;  %v9092_v2 = vld [vmem:[%s11229_s7 + $0x40] sm:$0xff]  }
 0x323   : > { %v8061_v9 = vpop.f32.mrf.mxu0  ;;  %v9094_v24 = vld [vmem:[%s11229_s7] sm:$0xff]  }
 0x324   : > { %v3008_v28 = vadd.f32 %v8060_v21, %v2967_v40  ;;  %v9113_v21 = vld [vmem:[%s11229_s7 + $0x1f8] sm:$0xff]  }
 0x325   : > { %v8062_v29 = vpop.f32.mrf.mxu0 }
 0x326   : > { %v8063_v31 = vadd.f32 %v8062_v29, %v8061_v9  ;;  %v9096_v9 = vld [vmem:[%s11229_s7 + $0xd8] sm:$0xff]   ;;  %v9106_v29 = vld [vmem:[%s11229_s7 + $0x88] sm:$0xff]  }
 0x328   : > { %v3011_v52 = vadd.f32 %v8063_v31, %v2970_v42 }
 0x32f   : > { %v8080_v23 = vpop.f32.mrf.mxu1 }
 0x331   : > { %v8081_v7 = vpop.f32.mrf.mxu1 }
 0x332   : > { %v8082_v41 = vadd.f32 %v8081_v7, %v8080_v23  ;;  %v9093_v23 = vld [vmem:[%s11229_s7 + $0xe0] sm:$0xff]  }
 0x333   : > { %v8083_v25 = vpop.f32.mrf.mxu1  ;;  %v9095_v7 = vld [vmem:[%s11229_s7 + $0xa0] sm:$0xff]  }
 0x334   : > { %v3049_v54 = vadd.f32 %v8082_v41, %v3008_v28 }
 0x335   : > { %v8084_v36 = vpop.f32.mrf.mxu1 }
 0x336   : > { %v8085_v30 = vadd.f32 %v8084_v36, %v8083_v25  ;;  %v9100_v25 = vld [vmem:[%s11229_s7 + $0xd0] sm:$0xff]  }
 0x338   : > { %v3052_v48 = vadd.f32 %v8085_v30, %v3011_v52 }
 0x33f   : > { %v3089_v43 = vpop.f32.mrf.mxu0 }
 0x340   : > { %v3090_v46 = vadd.f32 %v3089_v43, %v3049_v54 }
 0x341   : > { %v8590_v45 = vpop.f32.mrf.mxu0 }
 0x342   : > { %v3096_v55 = vmax.f32 %v3090_v46, 0.0 }
 0x343   : > { %v3092_v50 = vpop.f32.mrf.mxu0 }
 0x344   : > { %v3093_v56 = vadd.f32 %v3092_v50, %v3052_v48 }
 0x345   : > { %v8591_v39 = vpop.f32.mrf.mxu0 }
 0x346   : > { %v3097_v57 = vmax.f32 %v3093_v56, 0.0  ;;  %v9099_v56 = vld [vmem:[%s11229_s7 + $0x138] sm:$0xff]  }
 0x348   : > { %v3098_v58 = vpack.c.bf16 %v3097_v57, %v3096_v55  ;;  %v9101_v57 = vld [vmem:[%s11229_s7 + $0x170] sm:$0xff]  }
 0x34a   : > { %8593 = vmatpush3.bf16.msra.mxu1 %v3098_v58  ;;  %8617 = vmatpush3.bf16.msra.mxu0 %v3098_v58  ;;  %7762 = vst [vmem:[%s11253_s26] sm:$0xff] %v3098_v58   ;;  %s6974_s26 = sshll.u32 %s11287_s20, 4  ;;  %s11171_s26 = int_to_ptr.vmem [resolvable:$true] %s6974_s26 }
 0x34b   : > { %8598 = vmatprep.subr.bf16.mxu1 %v11285_v13  ;;  %8628 = vmatprep.subr.bf16.mxu0 %v11285_v13  ;;  %s9306_s2 = scalar_lea.vmem %s11171_s26, 128 }
 0x34c   : > { %p9307_p11 = scmp.ne.s32.totalorder %s11171_s26, %s9306_s2 }
 0x34d   : > { %8595 = vmatmul.mubr.msk.bf16.vlgmr.msra.gmra.mxu1 %vm3115_vm2, %v9063_v32  ;;  %8619 = vmatmul.mubr.msk.bf16.vlgmr.msra.gmra.mxu0 %vm3115_vm2, %v9064_v35 }
 0x34e   : > { %8599 = vmatpush3.bf16.msra.mxu1 %v3098_v58  ;;  %8629 = vmatpush3.bf16.msra.mxu0 %v3098_v58  ;;  %p9308_p12 = pnand %p9307_p11, %p9511_p5 }
 0x34f   : > { %8600 = vmatprep.mubr.msk.bf16.mxu1 %vm9369_vm0, %v11285_v13  ;;  %8604 = vmatprep.subr.bf16.mxu1 %v11285_v13 }
 0x350   : > { %8630 = vmatprep.mubr.msk.bf16.mxu0 %vm9369_vm0, %v11285_v13  ;;  %8640 = vmatprep.subr.bf16.mxu0 %v11285_v13  ;;  %p9309_p13 = pneg %p9308_p12 }
 0x355   : > { %8601 = vmatmul.mubr.msk.bf16.vlgmr.msra.gmra.mxu1 %vm3115_vm2, %v9065_v47  ;;  %8631 = vmatmul.mubr.msk.bf16.vlgmr.msra.gmra.mxu0 %vm3115_vm2, %v9066_v38  ;;  %v9103_v47 = vld [vmem:[%s11229_s7 + $0x130] sm:$0xff]  }
 0x356   : > { %8605 = vmatpush3.bf16.msra.mxu1 %v3098_v58  ;;  %8641 = vmatpush3.bf16.msra.mxu0 %v3098_v58 }
 0x357   : > { %8606 = vmatprep.mubr.msk.bf16.mxu1 %vm9369_vm0, %v11285_v13  ;;  %8610 = vmatprep.subr.bf16.mxu1 %v11285_v13 }
 0x358   : > { %8642 = vmatprep.mubr.msk.bf16.mxu0 %vm9369_vm0, %v11285_v13  ;;  %8135 = vmatprep.subr.bf16.mxu0 %v9081_v49  ;;  %v9105_v49 = vld [vmem:[%s11229_s7 + $0x168] sm:$0xff]  }
 0x35d   : > { %8607 = vmatmul.mubr.msk.bf16.vlgmr.msra.gmra.mxu1 %vm3115_vm2, %v9067_v51  ;;  %8643 = vmatmul.mubr.msk.bf16.vlgmr.msra.gmra.mxu0 %vm3115_vm2, %v9071_v53 }
 0x35e   : > { %8611 = vmatpush3.bf16.msra.mxu1 %v3098_v58  ;;  %8612 = vmatprep.mubr.msk.bf16.mxu1 %vm9369_vm0, %v11285_v13 }
 0x35f   : > { %8622 = vmatprep.subr.bf16.mxu1 %v11285_v13  ;;  %8136 = vmatpush3.bf16.msra.mxu0 %v9083_v11 }
 0x360   : > { %8137 = vmatprep.subr.bf16.mxu0 %v9085_v16  ;;  %v9116_v16 = vld [vmem:[%s11229_s7 + $0x150] sm:$0xff]  }
 0x363   : > { %8138 = vmatpush3.bf16.msra.mxu0 %v9087_v20 }
 0x364   : > { %8139 = vmatprep.subr.bf16.mxu0 %v9089_v1  ;;  %v9119_v1 = vld [vmem:[%s11229_s7 + $0x1b0] sm:$0xff]  }
 0x365   : > { %8613 = vmatmul.mubr.msk.bf16.vlgmr.msra.gmra.mxu1 %vm3115_vm2, %v9068_v59 }
 0x366   : > { %8623 = vmatpush3.bf16.msra.mxu1 %v3098_v58  ;;  %8624 = vmatprep.mubr.msk.bf16.mxu1 %vm9369_vm0, %v11285_v13 }
 0x367   : > { %8634 = vmatprep.subr.bf16.mxu1 %v11285_v13  ;;  %8140 = vmatpush3.bf16.msra.mxu0 %v9091_v0  ;;  %v9120_v0 = vld [vmem:[%s11229_s7 + $0x148] sm:$0xff]  }
 0x368   : > { %8141 = vmatprep.subr.bf16.mxu0 %v9093_v23 }
 0x36b   : > { %8142 = vmatpush3.bf16.msra.mxu0 %v9095_v7  ;;  %v9122_v7 = vld [vmem:[%s11229_s7 + $0x108] sm:$0xff]  }
 0x36c   : > { %8143 = vmatprep.subr.bf16.mxu0 %v9096_v9  ;;  %v9123_v9 = vld [vmem:[%s11229_s7 + $0x1a8] sm:$0xff]  }
 0x36d   : > { %8625 = vmatmul.mubr.msk.bf16.vlgmr.msra.gmra.mxu1 %vm3115_vm2, %v9069_v60  ;;  %v9107_v60 = vld [vmem:[%s11229_s7 + $0x128] sm:$0xff]  }
 0x36e   : > { %8635 = vmatpush3.bf16.msra.mxu1 %v3098_v58  ;;  %8636 = vmatprep.mubr.msk.bf16.mxu1 %vm9369_vm0, %v11285_v13 }
 0x36f   : > { %8113 = vmatprep.subr.bf16.mxu1 %v9072_v61  ;;  %8144 = vmatpush3.bf16.msra.mxu0 %v9098_v17  ;;  %v9124_v17 = vld [vmem:[%s11229_s7 + $0x140] sm:$0xff]  }
 0x370   : > { %8145 = vmatprep.subr.bf16.mxu0 %v9100_v25  ;;  %v9125_v25 = vld [vmem:[%s11229_s7 + $0x1e0] sm:$0xff]  }
 0x373   : > { %8146 = vmatpush3.bf16.msra.mxu0 %v9102_v26 }
 0x374   : > { %8147 = vmatprep.subr.bf16.mxu0 %v9104_v27  ;;  %v9126_v27 = vld [vmem:[%s11229_s7 + $0x100] sm:$0xff]  }
 0x375   : > { %8637 = vmatmul.mubr.msk.bf16.vlgmr.msra.gmra.mxu1 %vm3115_vm2, %v9070_v34  ;;  %v9109_v34 = vld [vmem:[%s11229_s7 + $0x160] sm:$0xff]  }
 0x376   : > { %8114 = vmatpush3.bf16.msra.mxu1 %v9073_v62 }
 0x377   : > { %8115 = vmatprep.subr.bf16.mxu1 %v9074_v5  ;;  %8148 = vmatpush3.bf16.msra.mxu0 %v9106_v29  ;;  %v9127_v29 = vld [vmem:[%s11229_s7 + $0x1a0] sm:$0xff]  }
 0x378   : > { %8149 = vmatprep.subr.bf16.mxu0 %v9108_v33  ;;  %v9128_v33 = vld [vmem:[%s11229_s7 + $0x1d8] sm:$0xff]  }
 0x37a   : > { %8116 = vmatpush3.bf16.msra.mxu1 %v9075_v6  ;;  %v9111_v6 = vld [vmem:[%s11229_s7 + $0x120] sm:$0xff]  }
 0x37b   : > { %8117 = vmatprep.subr.bf16.mxu1 %v9076_v44  ;;  %8150 = vmatpush3.bf16.msra.mxu0 %v9110_v19 }
 0x37c   : > { %8179 = vmatprep.subr.bf16.mxu0 %v9113_v21 }
 0x37e   : > { %8118 = vmatpush3.bf16.msra.mxu1 %v9077_v3  ;;  %v9112_v3 = vld [vmem:[%s11229_s7 + $0x158] sm:$0xff]  }
 0x37f   : > { %8119 = vmatprep.subr.bf16.mxu1 %v9078_v4 }
 0x382   : > { %8120 = vmatpush3.bf16.msra.mxu1 %v9079_v8 }
 0x383   : > { %8121 = vmatprep.subr.bf16.mxu1 %v9080_v10  ;;  %v9114_v10 = vld [vmem:[%s11229_s7 + $0x118] sm:$0xff]  }
 0x386   : > { %8122 = vmatpush3.bf16.msra.mxu1 %v9082_v12  ;;  %v9115_v12 = vld [vmem:[%s11229_s7 + $0x1b8] sm:$0xff]  }
 0x387   : > { %8123 = vmatprep.subr.bf16.mxu1 %v9084_v14 }
 0x38a   : > { %8124 = vmatpush3.bf16.msra.mxu1 %v9086_v18  ;;  %v9117_v18 = vld [vmem:[%s11229_s7 + $0x1f0] sm:$0xff]  }
 0x38b   : > { %8125 = vmatprep.subr.bf16.mxu1 %v9088_v63  ;;  %v9118_v63 = vld [vmem:[%s11229_s7 + $0x110] sm:$0xff]  }
 0x38e   : > { %8126 = vmatpush3.bf16.msra.mxu1 %v9090_v22 }
 0x38f   : > { %8127 = vmatprep.subr.bf16.mxu1 %v9092_v2  ;;  %v9121_v2 = vld [vmem:[%s11229_s7 + $0x1e8] sm:$0xff]  }
 0x392   : > { %8128 = vmatpush3.bf16.msra.mxu1 %v9094_v24 }
 0x393   : > { %8157 = vmatprep.subr.bf16.mxu1 %v9097_v15 }
 0x40d   : > { %v3153_v36 = vpop.f32.mrf.mxu1  ;;  %v10390_v37 = vpop.f32.mrf.mxu0 }
 0x40f   : > { %v8596_v40 = vpop.f32.mrf.mxu1  ;;  %v8620_v31 = vpop.f32.mrf.mxu0 }
 0x410   : > { %v9130_v40 = vld [vmem:[%s11229_s7 + $0x238] sm:$0xff]  }
 0x411   : > { %v3156_v41 = vpop.f32.mrf.mxu1  ;;  %v10392_v42 = vpop.f32.mrf.mxu0 }
 0x412   : > { %v3160_v39 = vpack.c.bf16 %v3156_v41, %v3153_v36  ;;  %v9129_v36 = vld [vmem:[%s11229_s7 + $0x198] sm:$0xff]   ;;  %v3372_v41 = vpack.c.bf16 %v10392_v42, %v10390_v37  ;;  %v9133_v37 = vld [vmem:[%s11229_s7 + $0x230] sm:$0xff]   ;;  %v9134_v42 = vld [vmem:[%s11229_s7 + $0x1c8] sm:$0xff]  }
 0x413   : > { %v8597_v28 = vpop.f32.mrf.mxu1  ;;  %v8621_v30 = vpop.f32.mrf.mxu0 }
 0x414   : > { %v9131_v28 = vld [vmem:[%s11229_s7 + $0x1d0] sm:$0xff]  }
 0x415   : > { %v3206_v43 = vpop.f32.mrf.mxu1  ;;  %v10394_v52 = vpop.f32.mrf.mxu0 }
 0x417   : > { %v8602_v54 = vpop.f32.mrf.mxu1  ;;  %v8632_v45 = vpop.f32.mrf.mxu0 }
 0x418   : > { %v9135_v54 = vld [vmem:[%s11229_s7 + $0x188] sm:$0xff]  }
 0x419   : > { %v3209_v46 = vpop.f32.mrf.mxu1  ;;  %v10396_v48 = vpop.f32.mrf.mxu0  ;;  %v9136_v45 = vld [vmem:[%s11229_s7 + $0x228] sm:$0xff]  }
 0x41a   : > { %v3213_v50 = vpack.c.bf16 %v3209_v46, %v3206_v43  ;;  %v9132_v43 = vld [vmem:[%s11229_s7 + $0x190] sm:$0xff]   ;;  %v9137_v46 = vld [vmem:[%s11229_s7 + $0x1c0] sm:$0xff]  }
 0x41b   : > { %v8603_v55 = vpop.f32.mrf.mxu1  ;;  %v8633_v58 = vpop.f32.mrf.mxu0 }
 0x41c   : > { %4200 = vmatprep.mubr.bf16.mxu1 %v3213_v50  ;;  %v9138_v50 = vld [vmem:[%s11229_s7 + $0x180] sm:$0xff]   ;;  %v9140_v55 = vld [vmem:[%s11229_s7 + $0x218] sm:$0xff]  }
 0x41d   : > { %v3259_v32 = vpop.f32.mrf.mxu1  ;;  %4201 = vmatmul.mubr.bf16.vlgmr.msra.gmra.mxu1 %v3160_v39  ;;  %v10404_v35 = vpop.f32.mrf.mxu0  ;;  %v3478_v39 = vpack.c.bf16 %v10396_v48, %v10394_v52  ;;  %v9142_v52 = vld [vmem:[%s11229_s7 + $0x208] sm:$0xff]   ;;  %v9143_v48 = vld [vmem:[%s11229_s7 + $0x200] sm:$0xff]  }
 0x41e   : > { %8158 = vmatpush3.bf16.msra.mxu1 %v9099_v56  ;;  %v9139_v56 = vld [vmem:[%s11229_s7 + $0x220] sm:$0xff]  }
 0x41f   : > { %v8608_v38 = vpop.f32.mrf.mxu1  ;;  %8159 = vmatprep.subr.bf16.mxu1 %v9101_v57  ;;  %v8644_v51 = vpop.f32.mrf.mxu0  ;;  %v9141_v57 = vld [vmem:[%s11229_s7 + $0x210] sm:$0xff]  }
 0x421   : > { %v3262_v53 = vpop.f32.mrf.mxu1  ;;  %v10412_v59 = vpop.f32.mrf.mxu0 }
 0x422   : > { %8160 = vmatpush3.bf16.msra.mxu1 %v9103_v47  ;;  %v3266_v11 = vpack.c.bf16 %v3262_v53, %v3259_v32  ;;  %v3584_v58 = vpack.c.bf16 %v10412_v59, %v10404_v35  ;;  %v7419_v59 = vld [vmem:[%s11230_s8] ss:$0 sm:$0xff] }
 0x423   : > { %v8609_v61 = vpop.f32.mrf.mxu1  ;;  %8161 = vmatprep.subr.bf16.mxu1 %v9105_v49  ;;  %v8645_v62 = vpop.f32.mrf.mxu0 }
 0x425   : > { %v3312_v5 = vpop.f32.mrf.mxu1 }
 0x426   : > { %8162 = vmatpush3.bf16.msra.mxu1 %v9107_v60 }
 0x427   : > { %v8614_v44 = vpop.f32.mrf.mxu1  ;;  %8163 = vmatprep.subr.bf16.mxu1 %v9109_v34 }
 0x429   : > { %v3315_v4 = vpop.f32.mrf.mxu1 }
 0x42a   : > { %v3319_v8 = vpack.c.bf16 %v3315_v4, %v3312_v5  ;;  %8164 = vmatpush3.bf16.msra.mxu1 %v9111_v6 }
 0x42b   : > { %8165 = vmatprep.subr.bf16.mxu1 %v9112_v3  ;;  %v8615_v14 = vpop.f32.mrf.mxu1 }
 0x42c   : > { %4241 = vmatprep.mubr.bf16.mxu0 %v3319_v8 }
 0x42d   : > { %4242 = vmatmul.mubr.bf16.vlgmr.msra.gmra.mxu0 %v3266_v11  ;;  %v3418_v20 = vpop.f32.mrf.mxu1 }
 0x42e   : > { %8166 = vmatpush3.bf16.msra.mxu1 %v9114_v10  ;;  %8180 = vmatpush3.bf16.msra.mxu0 %v9115_v12 }
 0x42f   : > { %8167 = vmatprep.subr.bf16.mxu1 %v9116_v16  ;;  %8181 = vmatprep.subr.bf16.mxu0 %v9117_v18  ;;  %v8626_v22 = vpop.f32.mrf.mxu1 }
 0x431   : > { %v3421_v23 = vpop.f32.mrf.mxu1 }
 0x432   : > { %8168 = vmatpush3.bf16.msra.mxu1 %v9118_v63  ;;  %8182 = vmatpush3.bf16.msra.mxu0 %v9119_v1  ;;  %v3425_v24 = vpack.c.bf16 %v3421_v23, %v3418_v20 }
 0x433   : > { %8169 = vmatprep.subr.bf16.mxu1 %v9120_v0  ;;  %8183 = vmatprep.subr.bf16.mxu0 %v9121_v2  ;;  %v8627_v15 = vpop.f32.mrf.mxu1 }
 0x434   : > { %4282 = vmatprep.mubr.bf16.mxu1 %v3425_v24 }
 0x435   : > { %v3524_v26 = vpop.f32.mrf.mxu1 }
 0x436   : > { %8170 = vmatpush3.bf16.msra.mxu1 %v9122_v7  ;;  %8184 = vmatpush3.bf16.msra.mxu0 %v9123_v9 }
 0x437   : > { %8171 = vmatprep.subr.bf16.mxu1 %v9124_v17  ;;  %8185 = vmatprep.subr.bf16.mxu0 %v9125_v25  ;;  %v8638_v19 = vpop.f32.mrf.mxu1 }
 0x439   : > { %v3527_v21 = vpop.f32.mrf.mxu1 }
 0x43a   : > { %8172 = vmatpush3.bf16.msra.mxu1 %v9126_v27  ;;  %8186 = vmatpush3.bf16.msra.mxu0 %v9127_v29  ;;  %v3531_v31 = vpack.c.bf16 %v3527_v21, %v3524_v26  ;;  %v9144_v21 = vld [vmem:[%s11231_s9] sm:$0xff]  }
 0x43b   : > { %8187 = vmatprep.subr.bf16.mxu0 %v9128_v33  ;;  %8646 = vmatprep.subr.bf16.mxu1 %v11285_v13  ;;  %v8639_v30 = vpop.f32.mrf.mxu1 }
 0x43c   : > { %4323 = vmatprep.mubr.bf16.mxu0 %v3531_v31  ;;  %v9147_v31 = vld [vmem:[%s11231_s9 + $0x30] sm:$0xff]   ;;  %v9152_v30 = vld [vmem:[%s11231_s9 + $0x40] sm:$0xff]  }
 0x43d   : > { %4283 = vmatmul.mubr.bf16.vlgmr.msra.gmra.mxu1 %v3372_v41  ;;  %v9162_v41 = vld [vmem:[%s11232_s10 + $0xf8] sm:$0xff]  }
 0x43e   : > { %8188 = vmatpush3.bf16.msra.mxu0 %v9129_v36  ;;  %8647 = vmatpush3.bf16.msra.mxu1 %v9130_v40  ;;  %v9145_v36 = vld [vmem:[%s11231_s9 + $0x20] sm:$0xff]   ;;  %v9146_v40 = vld [vmem:[%s11231_s9 + $0x8] sm:$0xff]  }
 0x43f   : > { %8189 = vmatprep.subr.bf16.mxu0 %v9131_v28  ;;  %8648 = vmatprep.subr.bf16.mxu1 %v11285_v13  ;;  %v9148_v28 = vld [vmem:[%s11231_s9 + $0x10] sm:$0xff]  }
 0x440   : > { %8662 = vmatprep.mubr.msk.bf16.mxu1 %vm9369_vm0, %v11285_v13 }
 0x442   : > { %8190 = vmatpush3.bf16.msra.mxu0 %v9132_v43  ;;  %8649 = vmatpush3.bf16.msra.mxu1 %v9133_v37  ;;  %v9149_v43 = vld [vmem:[%s11231_s9 + $0x18] sm:$0xff]   ;;  %v9150_v37 = vld [vmem:[%s11231_s9 + $0x28] sm:$0xff]  }
 0x443   : > { %8191 = vmatprep.subr.bf16.mxu0 %v9134_v42  ;;  %8650 = vmatprep.subr.bf16.mxu1 %v11285_v13  ;;  %v9153_v42 = vld [vmem:[%s11232_s10 + $0x78] sm:$0xff]  }
 0x446   : > { %8192 = vmatpush3.bf16.msra.mxu0 %v9135_v54  ;;  %8651 = vmatpush3.bf16.msra.mxu1 %v9136_v45  ;;  %v9151_v54 = vld [vmem:[%s11231_s9 + $0x38] sm:$0xff]  }
 0x447   : > { %8193 = vmatprep.subr.bf16.mxu0 %v9137_v46  ;;  %8652 = vmatprep.subr.bf16.mxu1 %v11285_v13  ;;  %v9154_v45 = vld [vmem:[%s11232_s10 + $0x38] sm:$0xff]   ;;  %v9155_v46 = vld [vmem:[%s11232_s10 + $0x70] sm:$0xff]  }
 0x44a   : > { %8194 = vmatpush3.bf16.msra.mxu0 %v9138_v50  ;;  %8653 = vmatpush3.bf16.msra.mxu1 %v9139_v56  ;;  %v9156_v50 = vld [vmem:[%s11232_s10 + $0x30] sm:$0xff]   ;;  %v9157_v56 = vld [vmem:[%s11232_s10 + $0x68] sm:$0xff]  }
 0x44b   : > { %8654 = vmatprep.subr.bf16.mxu1 %v11285_v13  ;;  %8666 = vmatprep.subr.bf16.mxu0 %v11285_v13 }
 0x44d   : > { %4324 = vmatmul.mubr.bf16.vlgmr.msra.gmra.mxu0 %v3478_v39  ;;  %v9158_v39 = vld [vmem:[%s11232_s10 + $0x28] sm:$0xff]  }
 0x44e   : > { %8655 = vmatpush3.bf16.msra.mxu1 %v9140_v55  ;;  %8668 = vmatprep.mubr.msk.bf16.mxu0 %vm9369_vm0, %v11285_v13  ;;  %v9159_v55 = vld [vmem:[%s11232_s10 + $0x60] sm:$0xff]  }
 0x44f   : > { %8656 = vmatprep.subr.bf16.mxu1 %v11285_v13 }
 0x452   : > { %8657 = vmatpush3.bf16.msra.mxu1 %v9141_v57  ;;  %v9160_v57 = vld [vmem:[%s11232_s10 + $0x20] sm:$0xff]  }
 0x453   : > { %8658 = vmatprep.subr.bf16.mxu1 %v11285_v13 }
 0x456   : > { %8659 = vmatpush3.bf16.msra.mxu1 %v9142_v52  ;;  %v9161_v52 = vld [vmem:[%s11232_s10 + $0x58] sm:$0xff]  }
 0x457   : > { %8660 = vmatprep.subr.bf16.mxu1 %v11285_v13 }
 0x45a   : > { %8661 = vmatpush3.bf16.msra.mxu1 %v9143_v48  ;;  %v9163_v48 = vld [vmem:[%s11232_s10 + $0x18] sm:$0xff]  }
 0x45b   : > { %8690 = vmatprep.subr.bf16.mxu1 %v11285_v13 }
 0x45d   : > { %8663 = vmatmul.mubr.bf16.vlgmr.msra.gmra.mxu1 %v3584_v58  ;;  %v9164_v58 = vld [vmem:[%s11232_s10 + $0xb8] sm:$0xff]  }
 0x45e   : > { %8692 = vmatprep.mubr.msk.bf16.mxu1 %vm9369_vm0, %v11285_v13 }
 0x4dd   : > { %v8129_v32 = vpop.f32.mrf.mxu1 }
 0x4df   : > { %v8130_v38 = vpop.f32.mrf.mxu1 }
 0x4e0   : > { %v8131_v35 = vadd.f32 %v8130_v38, %v8129_v32  ;;  %v9165_v32 = vld [vmem:[%s11232_s10 + $0x50] sm:$0xff]  }
 0x4e1   : > { %v8132_v51 = vpop.f32.mrf.mxu1  ;;  %v9167_v38 = vld [vmem:[%s11232_s10 + $0x10] sm:$0xff]  }
 0x4e2   : > { %v4203_v12 = vadd.f32 %v8131_v35, %v7419_v59  ;;  %v9178_v35 = vld [vmem:[%s11232_s10 + $0x178] sm:$0xff]  }
 0x4e3   : > { %v8133_v60 = vpop.f32.mrf.mxu1 }
 0x4e4   : > { %v8134_v4 = vadd.f32 %v8133_v60, %v8132_v51  ;;  %v9169_v51 = vld [vmem:[%s11232_s10 + $0x48] sm:$0xff]  }
 0x4e5   : > { %v9171_v60 = vld [vmem:[%s11232_s10 + $0x8] sm:$0xff]  }
 0x4e6   : > { %v4206_v18 = vadd.f32 %v8134_v4, %v7419_v59  ;;  %v9179_v59 = vld [vmem:[%s11232_s10 + $0x98] sm:$0xff]   ;;  %v9183_v4 = vld [vmem:[%s11232_s10 + $0x90] sm:$0xff]  }
 0x4ed   : > { %v8151_v47 = vpop.f32.mrf.mxu0 }
 0x4ef   : > { %v8152_v49 = vpop.f32.mrf.mxu0 }
 0x4f0   : > { %v8153_v8 = vadd.f32 %v8152_v49, %v8151_v47  ;;  %v9166_v47 = vld [vmem:[%s11232_s10 + $0xf0] sm:$0xff]  }
 0x4f1   : > { %v8154_v53 = vpop.f32.mrf.mxu0  ;;  %v9168_v49 = vld [vmem:[%s11232_s10 + $0xb0] sm:$0xff]  }
 0x4f2   : > { %v4244_v20 = vadd.f32 %v8153_v8, %v4203_v12  ;;  %v9185_v8 = vld [vmem:[%s11232_s10 + $0xc8] sm:$0xff]   ;;  %v9189_v12 = vld [vmem:[%s11232_s10 + $0xc0] sm:$0xff]  }
 0x4f3   : > { %v8155_v61 = vpop.f32.mrf.mxu0 }
 0x4f4   : > { %v8156_v11 = vadd.f32 %v8155_v61, %v8154_v53  ;;  %v9170_v53 = vld [vmem:[%s11232_s10 + $0xe8] sm:$0xff]  }
 0x4f5   : > { %v9172_v61 = vld [vmem:[%s11232_s10 + $0xa8] sm:$0xff]  }
 0x4f6   : > { %v4247_v22 = vadd.f32 %v8156_v11, %v4206_v18  ;;  %v9191_v11 = vld [vmem:[%s11232_s10 + $0x80] sm:$0xff]  }
 0x4fd   : > { %v8173_v34 = vpop.f32.mrf.mxu1 }
 0x4ff   : > { %v8174_v5 = vpop.f32.mrf.mxu1 }
 0x500   : > { %v8175_v14 = vadd.f32 %v8174_v5, %v8173_v34  ;;  %v9173_v34 = vld [vmem:[%s11232_s10 + $0x40] sm:$0xff]  }
 0x501   : > { %v8176_v44 = vpop.f32.mrf.mxu1  ;;  %v9175_v5 = vld [vmem:[%s11232_s10] sm:$0xff]  }
 0x502   : > { %v4285_v0 = vadd.f32 %v8175_v14, %v4244_v20  ;;  %v9194_v14 = vld [vmem:[%s11232_s10 + $0x1f8] sm:$0xff]  }
 0x503   : > { %v8177_v10 = vpop.f32.mrf.mxu1 }
 0x504   : > { %v8178_v63 = vadd.f32 %v8177_v10, %v8176_v44  ;;  %v9177_v44 = vld [vmem:[%s11232_s10 + $0xd8] sm:$0xff]   ;;  %v9187_v10 = vld [vmem:[%s11232_s10 + $0x88] sm:$0xff]  }
 0x506   : > { %v4288_v24 = vadd.f32 %v8178_v63, %v4247_v22 }
 0x50d   : > { %v8195_v62 = vpop.f32.mrf.mxu0 }
 0x50f   : > { %v8196_v6 = vpop.f32.mrf.mxu0 }
 0x510   : > { %v8197_v1 = vadd.f32 %v8196_v6, %v8195_v62  ;;  %v9174_v62 = vld [vmem:[%s11232_s10 + $0xe0] sm:$0xff]  }
 0x511   : > { %v8198_v3 = vpop.f32.mrf.mxu0  ;;  %v9176_v6 = vld [vmem:[%s11232_s10 + $0xa0] sm:$0xff]  }
 0x512   : > { %v4326_v7 = vadd.f32 %v8197_v1, %v4285_v0 }
 0x513   : > { %v8199_v16 = vpop.f32.mrf.mxu0 }
 0x514   : > { %v8200_v2 = vadd.f32 %v8199_v16, %v8198_v3  ;;  %v9181_v3 = vld [vmem:[%s11232_s10 + $0xd0] sm:$0xff]  }
 0x516   : > { %v4329_v17 = vadd.f32 %v8200_v2, %v4288_v24 }
 0x51d   : > { %v4366_v23 = vpop.f32.mrf.mxu1 }
 0x51e   : > { %v4367_v15 = vadd.f32 %v4366_v23, %v4326_v7 }
 0x51f   : > { %v8664_v9 = vpop.f32.mrf.mxu1 }
 0x520   : > { %v4373_v29 = vmax.f32 %v4367_v15, 0.0 }
 0x521   : > { %v4369_v25 = vpop.f32.mrf.mxu1 }
 0x522   : > { %v4370_v26 = vadd.f32 %v4369_v25, %v4329_v17 }
 0x523   : > { %v8665_v27 = vpop.f32.mrf.mxu1 }
 0x524   : > { %v4374_v33 = vmax.f32 %v4370_v26, 0.0  ;;  %v9180_v26 = vld [vmem:[%s11232_s10 + $0x138] sm:$0xff]  }
 0x526   : > { %v4375_v19 = vpack.c.bf16 %v4374_v33, %v4373_v29  ;;  %v9182_v33 = vld [vmem:[%s11232_s10 + $0x170] sm:$0xff]  }
 0x528   : > { %8667 = vmatpush3.bf16.msra.mxu0 %v4375_v19  ;;  %8691 = vmatpush3.bf16.msra.mxu1 %v4375_v19  ;;  %7767 = vst [vmem:[%s639_s21] sm:$0xff] %v4375_v19   ;;  %s7737_s21 = sshll.u32 %s9494_s1, 7  ;;  %s9370_s1 = smov [#allocation2]  }
 0x529   : > { %8672 = vmatprep.subr.bf16.mxu0 %v11285_v13  ;;  %8702 = vmatprep.subr.bf16.mxu1 %v11285_v13  ;;  %s11169_s24 = scalar_lea.hbm %s11238_s16, %s7737_s21  ;;  %s9310_s14 = sshll.u32 %s9370_s1, 4  ;;  %s9311_s14 = int_to_ptr.vmem [resolvable:$false] %s9310_s14 }
 0x52a   : > { %s9312_s0 = scalar_lea.vmem %s9311_s14, 256  ;;  %p9313_p0 = scmp.lt.s32.totalorder %s11171_s26, %s9311_s14 }
 0x52b   : > { %8669 = vmatmul.mubr.msk.bf16.vlgmr.msra.gmra.mxu0 %vm3115_vm2, %v9144_v21  ;;  %8693 = vmatmul.mubr.msk.bf16.vlgmr.msra.gmra.mxu1 %vm3115_vm2, %v9145_v36  ;;  %p9314_p1 = scmp.lt.s32.totalorder %s9312_s0, %s9306_s2 }
 0x52c   : > { %8673 = vmatpush3.bf16.msra.mxu0 %v4375_v19  ;;  %8703 = vmatpush3.bf16.msra.mxu1 %v4375_v19 }
 0x52d   : > { %8674 = vmatprep.mubr.msk.bf16.mxu0 %vm9369_vm0, %v11285_v13  ;;  %8678 = vmatprep.subr.bf16.mxu0 %v11285_v13  ;;  %p9315_p2 = por %p9314_p1, %p9313_p0 }
 0x52e   : > { %8704 = vmatprep.mubr.msk.bf16.mxu1 %vm9369_vm0, %v11285_v13  ;;  %8714 = vmatprep.subr.bf16.mxu1 %v11285_v13 }
 0x52f   : > { %p9316_p3 = pnand %p9315_p2, %p9309_p13 }
 0x533   : > { %8675 = vmatmul.mubr.msk.bf16.vlgmr.msra.gmra.mxu0 %vm3115_vm2, %v9146_v40  ;;  %8705 = vmatmul.mubr.msk.bf16.vlgmr.msra.gmra.mxu1 %vm3115_vm2, %v9147_v31  ;;  %v9184_v40 = vld [vmem:[%s11232_s10 + $0x130] sm:$0xff]  }
 0x534   : > { %8679 = vmatpush3.bf16.msra.mxu0 %v4375_v19  ;;  %8715 = vmatpush3.bf16.msra.mxu1 %v4375_v19 }
 0x535   : > { %8680 = vmatprep.mubr.msk.bf16.mxu0 %vm9369_vm0, %v11285_v13  ;;  %8684 = vmatprep.subr.bf16.mxu0 %v11285_v13 }
 0x536   : > { %8716 = vmatprep.mubr.msk.bf16.mxu1 %vm9369_vm0, %v11285_v13  ;;  %8250 = vmatprep.subr.bf16.mxu1 %v9162_v41  ;;  %v9186_v41 = vld [vmem:[%s11232_s10 + $0x168] sm:$0xff]  }
 0x53b   : > { %8681 = vmatmul.mubr.msk.bf16.vlgmr.msra.gmra.mxu0 %vm3115_vm2, %v9148_v28  ;;  %8717 = vmatmul.mubr.msk.bf16.vlgmr.msra.gmra.mxu1 %vm3115_vm2, %v9152_v30 }
 0x53c   : > { %8685 = vmatpush3.bf16.msra.mxu0 %v4375_v19  ;;  %8686 = vmatprep.mubr.msk.bf16.mxu0 %vm9369_vm0, %v11285_v13 }
 0x53d   : > { %8696 = vmatprep.subr.bf16.mxu0 %v11285_v13  ;;  %8251 = vmatpush3.bf16.msra.mxu1 %v9164_v58 }
 0x53e   : > { %8252 = vmatprep.subr.bf16.mxu1 %v9166_v47  ;;  %v9197_v47 = vld [vmem:[%s11232_s10 + $0x150] sm:$0xff]  }
 0x541   : > { %8253 = vmatpush3.bf16.msra.mxu1 %v9168_v49 }
 0x542   : > { %8254 = vmatprep.subr.bf16.mxu1 %v9170_v53  ;;  %v9200_v53 = vld [vmem:[%s11232_s10 + $0x1b0] sm:$0xff]  }
 0x543   : > { %8687 = vmatmul.mubr.msk.bf16.vlgmr.msra.gmra.mxu0 %vm3115_vm2, %v9149_v43 }
 0x544   : > { %8697 = vmatpush3.bf16.msra.mxu0 %v4375_v19  ;;  %8698 = vmatprep.mubr.msk.bf16.mxu0 %vm9369_vm0, %v11285_v13 }
 0x545   : > { %8708 = vmatprep.subr.bf16.mxu0 %v11285_v13  ;;  %8255 = vmatpush3.bf16.msra.mxu1 %v9172_v61  ;;  %v9201_v61 = vld [vmem:[%s11232_s10 + $0x148] sm:$0xff]  }
 0x546   : > { %8256 = vmatprep.subr.bf16.mxu1 %v9174_v62 }
 0x549   : > { %8257 = vmatpush3.bf16.msra.mxu1 %v9176_v6  ;;  %v9203_v6 = vld [vmem:[%s11232_s10 + $0x108] sm:$0xff]  }
 0x54a   : > { %8258 = vmatprep.subr.bf16.mxu1 %v9177_v44  ;;  %v9204_v44 = vld [vmem:[%s11232_s10 + $0x1a8] sm:$0xff]  }
 0x54b   : > { %8699 = vmatmul.mubr.msk.bf16.vlgmr.msra.gmra.mxu0 %vm3115_vm2, %v9150_v37  ;;  %v9188_v37 = vld [vmem:[%s11232_s10 + $0x128] sm:$0xff]  }
 0x54c   : > { %8709 = vmatpush3.bf16.msra.mxu0 %v4375_v19  ;;  %8710 = vmatprep.mubr.msk.bf16.mxu0 %vm9369_vm0, %v11285_v13 }
 0x54d   : > { %8228 = vmatprep.subr.bf16.mxu0 %v9153_v42  ;;  %8259 = vmatpush3.bf16.msra.mxu1 %v9179_v59  ;;  %v9205_v59 = vld [vmem:[%s11232_s10 + $0x140] sm:$0xff]  }
 0x54e   : > { %8260 = vmatprep.subr.bf16.mxu1 %v9181_v3  ;;  %v9206_v3 = vld [vmem:[%s11232_s10 + $0x1e0] sm:$0xff]  }
 0x551   : > { %8261 = vmatpush3.bf16.msra.mxu1 %v9183_v4 }
 0x552   : > { %8262 = vmatprep.subr.bf16.mxu1 %v9185_v8  ;;  %v9207_v8 = vld [vmem:[%s11232_s10 + $0x100] sm:$0xff]  }
 0x553   : > { %8711 = vmatmul.mubr.msk.bf16.vlgmr.msra.gmra.mxu0 %vm3115_vm2, %v9151_v54  ;;  %v9190_v54 = vld [vmem:[%s11232_s10 + $0x160] sm:$0xff]  }
 0x554   : > { %8229 = vmatpush3.bf16.msra.mxu0 %v9154_v45 }
 0x555   : > { %8230 = vmatprep.subr.bf16.mxu0 %v9155_v46  ;;  %8263 = vmatpush3.bf16.msra.mxu1 %v9187_v10  ;;  %v9208_v10 = vld [vmem:[%s11232_s10 + $0x1a0] sm:$0xff]  }
 0x556   : > { %8264 = vmatprep.subr.bf16.mxu1 %v9189_v12  ;;  %v9209_v12 = vld [vmem:[%s11232_s10 + $0x1d8] sm:$0xff]  }
 0x558   : > { %8231 = vmatpush3.bf16.msra.mxu0 %v9156_v50  ;;  %v9192_v50 = vld [vmem:[%s11232_s10 + $0x120] sm:$0xff]  }
 0x559   : > { %8232 = vmatprep.subr.bf16.mxu0 %v9157_v56  ;;  %8265 = vmatpush3.bf16.msra.mxu1 %v9191_v11 }
 0x55a   : > { %8294 = vmatprep.subr.bf16.mxu1 %v9194_v14 }
 0x55c   : > { %8233 = vmatpush3.bf16.msra.mxu0 %v9158_v39  ;;  %v9193_v39 = vld [vmem:[%s11232_s10 + $0x158] sm:$0xff]  }
 0x55d   : > { %8234 = vmatprep.subr.bf16.mxu0 %v9159_v55 }
 0x560   : > { %8235 = vmatpush3.bf16.msra.mxu0 %v9160_v57 }
 0x561   : > { %8236 = vmatprep.subr.bf16.mxu0 %v9161_v52  ;;  %v9195_v52 = vld [vmem:[%s11232_s10 + $0x118] sm:$0xff]  }
 0x564   : > { %8237 = vmatpush3.bf16.msra.mxu0 %v9163_v48  ;;  %v9196_v48 = vld [vmem:[%s11232_s10 + $0x1b8] sm:$0xff]  }
 0x565   : > { %8238 = vmatprep.subr.bf16.mxu0 %v9165_v32 }
 0x568   : > { %8239 = vmatpush3.bf16.msra.mxu0 %v9167_v38  ;;  %v9198_v38 = vld [vmem:[%s11232_s10 + $0x1f0] sm:$0xff]  }
 0x569   : > { %8240 = vmatprep.subr.bf16.mxu0 %v9169_v51  ;;  %v9199_v51 = vld [vmem:[%s11232_s10 + $0x110] sm:$0xff]  }
 0x56c   : > { %8241 = vmatpush3.bf16.msra.mxu0 %v9171_v60 }
 0x56d   : > { %8242 = vmatprep.subr.bf16.mxu0 %v9173_v34  ;;  %v9202_v34 = vld [vmem:[%s11232_s10 + $0x1e8] sm:$0xff]  }
 0x570   : > { %8243 = vmatpush3.bf16.msra.mxu0 %v9175_v5 }
 0x571   : > { %8272 = vmatprep.subr.bf16.mxu0 %v9178_v35 }
 0x5eb   : > { %v4429_v16 = vpop.f32.mrf.mxu0  ;;  %v10707_v18 = vpop.f32.mrf.mxu1 }
 0x5ed   : > { %v8670_v20 = vpop.f32.mrf.mxu0  ;;  %v8694_v63 = vpop.f32.mrf.mxu1 }
 0x5ee   : > { %v9211_v20 = vld [vmem:[%s11232_s10 + $0x238] sm:$0xff]  }
 0x5ef   : > { %v4432_v1 = vpop.f32.mrf.mxu0  ;;  %v10709_v22 = vpop.f32.mrf.mxu1 }
 0x5f0   : > { %v4436_v27 = vpack.c.bf16 %v4432_v1, %v4429_v16  ;;  %v9210_v16 = vld [vmem:[%s11232_s10 + $0x198] sm:$0xff]   ;;  %v4648_v1 = vpack.c.bf16 %v10709_v22, %v10707_v18  ;;  %v9214_v18 = vld [vmem:[%s11232_s10 + $0x230] sm:$0xff]   ;;  %v9215_v22 = vld [vmem:[%s11232_s10 + $0x1c8] sm:$0xff]  }
 0x5f1   : > { %v8671_v0 = vpop.f32.mrf.mxu0  ;;  %v8695_v2 = vpop.f32.mrf.mxu1 }
 0x5f2   : > { %v9212_v0 = vld [vmem:[%s11232_s10 + $0x1d0] sm:$0xff]  }
 0x5f3   : > { %v4482_v23 = vpop.f32.mrf.mxu0  ;;  %v10711_v24 = vpop.f32.mrf.mxu1 }
 0x5f5   : > { %v8676_v7 = vpop.f32.mrf.mxu0  ;;  %v8706_v9 = vpop.f32.mrf.mxu1 }
 0x5f6   : > { %v9216_v7 = vld [vmem:[%s11232_s10 + $0x188] sm:$0xff]  }
 0x5f7   : > { %v4485_v15 = vpop.f32.mrf.mxu0  ;;  %v10713_v17 = vpop.f32.mrf.mxu1  ;;  %v9217_v9 = vld [vmem:[%s11232_s10 + $0x228] sm:$0xff]  }
 0x5f8   : > { %v4489_v25 = vpack.c.bf16 %v4485_v15, %v4482_v23  ;;  %v9213_v23 = vld [vmem:[%s11232_s10 + $0x190] sm:$0xff]   ;;  %v9218_v15 = vld [vmem:[%s11232_s10 + $0x1c0] sm:$0xff]  }
 0x5f9   : > { %v8677_v29 = vpop.f32.mrf.mxu0  ;;  %v8707_v19 = vpop.f32.mrf.mxu1 }
 0x5fa   : > { %5476 = vmatprep.mubr.bf16.mxu0 %v4489_v25  ;;  %v9219_v25 = vld [vmem:[%s11232_s10 + $0x180] sm:$0xff]   ;;  %v9221_v29 = vld [vmem:[%s11232_s10 + $0x218] sm:$0xff]  }
 0x5fb   : > { %v4535_v21 = vpop.f32.mrf.mxu0  ;;  %5477 = vmatmul.mubr.bf16.vlgmr.msra.gmra.mxu0 %v4436_v27  ;;  %v10721_v36 = vpop.f32.mrf.mxu1  ;;  %v4754_v27 = vpack.c.bf16 %v10713_v17, %v10711_v24  ;;  %v9223_v24 = vld [vmem:[%s11232_s10 + $0x208] sm:$0xff]   ;;  %v9224_v17 = vld [vmem:[%s11232_s10 + $0x200] sm:$0xff]  }
 0x5fc   : > { %8273 = vmatpush3.bf16.msra.mxu0 %v9180_v26  ;;  %v9220_v26 = vld [vmem:[%s11232_s10 + $0x220] sm:$0xff]  }
 0x5fd   : > { %v8682_v31 = vpop.f32.mrf.mxu0  ;;  %8274 = vmatprep.subr.bf16.mxu0 %v9182_v33  ;;  %v8718_v28 = vpop.f32.mrf.mxu1  ;;  %v9222_v33 = vld [vmem:[%s11232_s10 + $0x210] sm:$0xff]  }
 0x5ff   : > { %v4538_v30 = vpop.f32.mrf.mxu0  ;;  %v10729_v43 = vpop.f32.mrf.mxu1 }
 0x600   : > { %8275 = vmatpush3.bf16.msra.mxu0 %v9184_v40  ;;  %v4542_v58 = vpack.c.bf16 %v4538_v30, %v4535_v21  ;;  %v4860_v19 = vpack.c.bf16 %v10729_v43, %v10721_v36  ;;  %v7528_v43 = vld [vmem:[%s11233_s11] ss:$0 sm:$0xff] }
 0x601   : > { %v8683_v42 = vpop.f32.mrf.mxu0  ;;  %8276 = vmatprep.subr.bf16.mxu0 %v9186_v41  ;;  %v8719_v45 = vpop.f32.mrf.mxu1 }
 0x603   : > { %v4588_v46 = vpop.f32.mrf.mxu0 }
 0x604   : > { %8277 = vmatpush3.bf16.msra.mxu0 %v9188_v37 }
 0x605   : > { %v8688_v56 = vpop.f32.mrf.mxu0  ;;  %8278 = vmatprep.subr.bf16.mxu0 %v9190_v54 }
 0x607   : > { %v4591_v55 = vpop.f32.mrf.mxu0 }
 0x608   : > { %v4595_v57 = vpack.c.bf16 %v4591_v55, %v4588_v46  ;;  %8279 = vmatpush3.bf16.msra.mxu0 %v9192_v50 }
 0x609   : > { %8280 = vmatprep.subr.bf16.mxu0 %v9193_v39  ;;  %v8689_v32 = vpop.f32.mrf.mxu0 }
 0x60a   : > { %5517 = vmatprep.mubr.bf16.mxu1 %v4595_v57 }
 0x60b   : > { %5518 = vmatmul.mubr.bf16.vlgmr.msra.gmra.mxu1 %v4542_v58  ;;  %v4694_v49 = vpop.f32.mrf.mxu0 }
 0x60c   : > { %8281 = vmatpush3.bf16.msra.mxu0 %v9195_v52  ;;  %8295 = vmatpush3.bf16.msra.mxu1 %v9196_v48 }
 0x60d   : > { %8282 = vmatprep.subr.bf16.mxu0 %v9197_v47  ;;  %8296 = vmatprep.subr.bf16.mxu1 %v9198_v38  ;;  %v8700_v60 = vpop.f32.mrf.mxu0 }
 0x60f   : > { %v4697_v62 = vpop.f32.mrf.mxu0 }
 0x610   : > { %8283 = vmatpush3.bf16.msra.mxu0 %v9199_v51  ;;  %8297 = vmatpush3.bf16.msra.mxu1 %v9200_v53  ;;  %v4701_v5 = vpack.c.bf16 %v4697_v62, %v4694_v49 }
 0x611   : > { %8284 = vmatprep.subr.bf16.mxu0 %v9201_v61  ;;  %8298 = vmatprep.subr.bf16.mxu1 %v9202_v34  ;;  %v8701_v35 = vpop.f32.mrf.mxu0 }
 0x612   : > { %5558 = vmatprep.mubr.bf16.mxu0 %v4701_v5 }
 0x613   : > { %v4800_v4 = vpop.f32.mrf.mxu0 }
 0x614   : > { %8285 = vmatpush3.bf16.msra.mxu0 %v9203_v6  ;;  %8299 = vmatpush3.bf16.msra.mxu1 %v9204_v44 }
 0x615   : > { %8286 = vmatprep.subr.bf16.mxu0 %v9205_v59  ;;  %8300 = vmatprep.subr.bf16.mxu1 %v9206_v3  ;;  %v8712_v11 = vpop.f32.mrf.mxu0 }
 0x617   : > { %v4803_v14 = vpop.f32.mrf.mxu0 }
 0x618   : > { %8287 = vmatpush3.bf16.msra.mxu0 %v9207_v8  ;;  %8301 = vmatpush3.bf16.msra.mxu1 %v9208_v10  ;;  %v4807_v63 = vpack.c.bf16 %v4803_v14, %v4800_v4  ;;  %v9225_v14 = vld [vmem:[%s11234_s12] sm:$0xff]  }
 0x619   : > { %8302 = vmatprep.subr.bf16.mxu1 %v9209_v12  ;;  %8720 = vmatprep.subr.bf16.mxu0 %v11285_v13  ;;  %v8713_v2 = vpop.f32.mrf.mxu0 }
 0x61a   : > { %5599 = vmatprep.mubr.bf16.mxu1 %v4807_v63  ;;  %v9228_v63 = vld [vmem:[%s11234_s12 + $0x30] sm:$0xff]   ;;  %v9233_v2 = vld [vmem:[%s11234_s12 + $0x40] sm:$0xff]  }
 0x61b   : > { %5559 = vmatmul.mubr.bf16.vlgmr.msra.gmra.mxu0 %v4648_v1  ;;  %v9243_v1 = vld [vmem:[%s11235_s13 + $0xf8] sm:$0xff]  }
 0x61c   : > { %8303 = vmatpush3.bf16.msra.mxu1 %v9210_v16  ;;  %8721 = vmatpush3.bf16.msra.mxu0 %v9211_v20  ;;  %v9226_v16 = vld [vmem:[%s11234_s12 + $0x20] sm:$0xff]   ;;  %v9227_v20 = vld [vmem:[%s11234_s12 + $0x8] sm:$0xff]  }
 0x61d   : > { %8304 = vmatprep.subr.bf16.mxu1 %v9212_v0  ;;  %8722 = vmatprep.subr.bf16.mxu0 %v11285_v13  ;;  %v9229_v0 = vld [vmem:[%s11234_s12 + $0x10] sm:$0xff]  }
 0x61e   : > { %8736 = vmatprep.mubr.msk.bf16.mxu0 %vm9369_vm0, %v11285_v13 }
 0x620   : > { %8305 = vmatpush3.bf16.msra.mxu1 %v9213_v23  ;;  %8723 = vmatpush3.bf16.msra.mxu0 %v9214_v18  ;;  %v9230_v23 = vld [vmem:[%s11234_s12 + $0x18] sm:$0xff]   ;;  %v9231_v18 = vld [vmem:[%s11234_s12 + $0x28] sm:$0xff]  }
 0x621   : > { %8306 = vmatprep.subr.bf16.mxu1 %v9215_v22  ;;  %8724 = vmatprep.subr.bf16.mxu0 %v11285_v13  ;;  %v9234_v22 = vld [vmem:[%s11235_s13 + $0x78] sm:$0xff]  }
 0x624   : > { %8307 = vmatpush3.bf16.msra.mxu1 %v9216_v7  ;;  %8725 = vmatpush3.bf16.msra.mxu0 %v9217_v9  ;;  %v9232_v7 = vld [vmem:[%s11234_s12 + $0x38] sm:$0xff]  }
 0x625   : > { %8308 = vmatprep.subr.bf16.mxu1 %v9218_v15  ;;  %8726 = vmatprep.subr.bf16.mxu0 %v11285_v13  ;;  %v9235_v9 = vld [vmem:[%s11235_s13 + $0x38] sm:$0xff]   ;;  %v9236_v15 = vld [vmem:[%s11235_s13 + $0x70] sm:$0xff]  }
 0x628   : > { %8309 = vmatpush3.bf16.msra.mxu1 %v9219_v25  ;;  %8727 = vmatpush3.bf16.msra.mxu0 %v9220_v26  ;;  %v9237_v25 = vld [vmem:[%s11235_s13 + $0x30] sm:$0xff]   ;;  %v9238_v26 = vld [vmem:[%s11235_s13 + $0x68] sm:$0xff]  }
 0x629   : > { %8728 = vmatprep.subr.bf16.mxu0 %v11285_v13  ;;  %8740 = vmatprep.subr.bf16.mxu1 %v11285_v13 }
 0x62b   : > { %5600 = vmatmul.mubr.bf16.vlgmr.msra.gmra.mxu1 %v4754_v27  ;;  %v9239_v27 = vld [vmem:[%s11235_s13 + $0x28] sm:$0xff]  }
 0x62c   : > { %8729 = vmatpush3.bf16.msra.mxu0 %v9221_v29  ;;  %8742 = vmatprep.mubr.msk.bf16.mxu1 %vm9369_vm0, %v11285_v13  ;;  %v9240_v29 = vld [vmem:[%s11235_s13 + $0x60] sm:$0xff]  }
 0x62d   : > { %8730 = vmatprep.subr.bf16.mxu0 %v11285_v13 }
 0x630   : > { %8731 = vmatpush3.bf16.msra.mxu0 %v9222_v33  ;;  %v9241_v33 = vld [vmem:[%s11235_s13 + $0x20] sm:$0xff]  }
 0x631   : > { %8732 = vmatprep.subr.bf16.mxu0 %v11285_v13 }
 0x634   : > { %8733 = vmatpush3.bf16.msra.mxu0 %v9223_v24  ;;  %v9242_v24 = vld [vmem:[%s11235_s13 + $0x58] sm:$0xff]  }
 0x635   : > { %8734 = vmatprep.subr.bf16.mxu0 %v11285_v13 }
 0x638   : > { %8735 = vmatpush3.bf16.msra.mxu0 %v9224_v17  ;;  %v9244_v17 = vld [vmem:[%s11235_s13 + $0x18] sm:$0xff]  }
 0x639   : > { %8764 = vmatprep.subr.bf16.mxu0 %v11285_v13 }
 0x63b   : > { %8737 = vmatmul.mubr.bf16.vlgmr.msra.gmra.mxu0 %v4860_v19  ;;  %v9245_v19 = vld [vmem:[%s11235_s13 + $0xb8] sm:$0xff]  }
 0x63c   : > { %8766 = vmatprep.mubr.msk.bf16.mxu0 %vm9369_vm0, %v11285_v13 }
 0x6bb   : > { %v8244_v21 = vpop.f32.mrf.mxu0 }
 0x6bd   : > { %v8245_v31 = vpop.f32.mrf.mxu0 }
 0x6be   : > { %v8246_v36 = vadd.f32 %v8245_v31, %v8244_v21  ;;  %v9246_v21 = vld [vmem:[%s11235_s13 + $0x50] sm:$0xff]  }
 0x6bf   : > { %v8247_v28 = vpop.f32.mrf.mxu0  ;;  %v9248_v31 = vld [vmem:[%s11235_s13 + $0x10] sm:$0xff]  }
 0x6c0   : > { %v5479_v48 = vadd.f32 %v8246_v36, %v7528_v43  ;;  %v9259_v36 = vld [vmem:[%s11235_s13 + $0x178] sm:$0xff]  }
 0x6c1   : > { %v8248_v37 = vpop.f32.mrf.mxu0 }
 0x6c2   : > { %v8249_v55 = vadd.f32 %v8248_v37, %v8247_v28  ;;  %v9250_v28 = vld [vmem:[%s11235_s13 + $0x48] sm:$0xff]  }
 0x6c3   : > { %v9252_v37 = vld [vmem:[%s11235_s13 + $0x8] sm:$0xff]  }
 0x6c4   : > { %v5482_v38 = vadd.f32 %v8249_v55, %v7528_v43  ;;  %v9260_v43 = vld [vmem:[%s11235_s13 + $0x98] sm:$0xff]   ;;  %v9264_v55 = vld [vmem:[%s11235_s13 + $0x90] sm:$0xff]  }
 0x6cb   : > { %v8266_v40 = vpop.f32.mrf.mxu1 }
 0x6cd   : > { %v8267_v41 = vpop.f32.mrf.mxu1 }
 0x6ce   : > { %v8268_v57 = vadd.f32 %v8267_v41, %v8266_v40  ;;  %v9247_v40 = vld [vmem:[%s11235_s13 + $0xf0] sm:$0xff]  }
 0x6cf   : > { %v8269_v30 = vpop.f32.mrf.mxu1  ;;  %v9249_v41 = vld [vmem:[%s11235_s13 + $0xb0] sm:$0xff]  }
 0x6d0   : > { %v5520_v49 = vadd.f32 %v8268_v57, %v5479_v48  ;;  %v9266_v57 = vld [vmem:[%s11235_s13 + $0xc8] sm:$0xff]   ;;  %v9270_v48 = vld [vmem:[%s11235_s13 + $0xc0] sm:$0xff]  }
 0x6d1   : > { %v8270_v42 = vpop.f32.mrf.mxu1 }
 0x6d2   : > { %v8271_v58 = vadd.f32 %v8270_v42, %v8269_v30  ;;  %v9251_v30 = vld [vmem:[%s11235_s13 + $0xe8] sm:$0xff]  }
 0x6d3   : > { %v9253_v42 = vld [vmem:[%s11235_s13 + $0xa8] sm:$0xff]  }
 0x6d4   : > { %v5523_v60 = vadd.f32 %v8271_v58, %v5482_v38  ;;  %v9272_v58 = vld [vmem:[%s11235_s13 + $0x80] sm:$0xff]  }
 0x6db   : > { %v8288_v54 = vpop.f32.mrf.mxu0 }
 0x6dd   : > { %v8289_v46 = vpop.f32.mrf.mxu0 }
 0x6de   : > { %v8290_v32 = vadd.f32 %v8289_v46, %v8288_v54  ;;  %v9254_v54 = vld [vmem:[%s11235_s13 + $0x40] sm:$0xff]  }
 0x6df   : > { %v8291_v56 = vpop.f32.mrf.mxu0  ;;  %v9256_v46 = vld [vmem:[%s11235_s13] sm:$0xff]  }
 0x6e0   : > { %v5561_v61 = vadd.f32 %v8290_v32, %v5520_v49  ;;  %v9275_v32 = vld [vmem:[%s11235_s13 + $0x1f8] sm:$0xff]  }
 0x6e1   : > { %v8292_v52 = vpop.f32.mrf.mxu0 }
 0x6e2   : > { %v8293_v51 = vadd.f32 %v8292_v52, %v8291_v56  ;;  %v9258_v56 = vld [vmem:[%s11235_s13 + $0xd8] sm:$0xff]   ;;  %v9268_v52 = vld [vmem:[%s11235_s13 + $0x88] sm:$0xff]  }
 0x6e4   : > { %v5564_v5 = vadd.f32 %v8293_v51, %v5523_v60 }
 0x6eb   : > { %v8310_v45 = vpop.f32.mrf.mxu1 }
 0x6ed   : > { %v8311_v50 = vpop.f32.mrf.mxu1 }
 0x6ee   : > { %v8312_v53 = vadd.f32 %v8311_v50, %v8310_v45  ;;  %v9255_v45 = vld [vmem:[%s11235_s13 + $0xe0] sm:$0xff]  }
 0x6ef   : > { %v8313_v39 = vpop.f32.mrf.mxu1  ;;  %v9257_v50 = vld [vmem:[%s11235_s13 + $0xa0] sm:$0xff]  }
 0x6f0   : > { %v5602_v6 = vadd.f32 %v8312_v53, %v5561_v61 }
 0x6f1   : > { %v8314_v47 = vpop.f32.mrf.mxu1 }
 0x6f2   : > { %v8315_v34 = vadd.f32 %v8314_v47, %v8313_v39  ;;  %v9262_v39 = vld [vmem:[%s11235_s13 + $0xd0] sm:$0xff]  }
 0x6f4   : > { %v5605_v59 = vadd.f32 %v8315_v34, %v5564_v5 }
 0x6fb   : > { %v5642_v62 = vpop.f32.mrf.mxu0 }
 0x6fc   : > { %v5643_v35 = vadd.f32 %v5642_v62, %v5602_v6 }
 0x6fd   : > { %v8738_v44 = vpop.f32.mrf.mxu0 }
 0x6fe   : > { %v5649_v10 = vmax.f32 %v5643_v35, 0.0 }
 0x6ff   : > { %v5645_v3 = vpop.f32.mrf.mxu0 }
 0x700   : > { %v5646_v4 = vadd.f32 %v5645_v3, %v5605_v59 }
 0x701   : > { %v8739_v8 = vpop.f32.mrf.mxu0 }
 0x702   : > { %v5650_v12 = vmax.f32 %v5646_v4, 0.0  ;;  %v9261_v4 = vld [vmem:[%s11235_s13 + $0x138] sm:$0xff]  }
 0x704   : > { %v5651_v11 = vpack.c.bf16 %v5650_v12, %v5649_v10  ;;  %v9263_v12 = vld [vmem:[%s11235_s13 + $0x170] sm:$0xff]  }
 0x706   : > { %8741 = vmatpush3.bf16.msra.mxu1 %v5651_v11  ;;  %8765 = vmatpush3.bf16.msra.mxu0 %v5651_v11  ;;  %7772 = vst [vmem:[%s644_s23] sm:$0xff] %v5651_v11   ;;  %s11175_s23 = scalar_lea.sflag [#allocation3], %s11288_s25 }
 0x707   : > { %8746 = vmatprep.subr.bf16.mxu1 %v11285_v13  ;;  %8776 = vmatprep.subr.bf16.mxu0 %v11285_v13 }
 0x709   : > { %8743 = vmatmul.mubr.msk.bf16.vlgmr.msra.gmra.mxu1 %vm3115_vm2, %v9225_v14  ;;  %8767 = vmatmul.mubr.msk.bf16.vlgmr.msra.gmra.mxu0 %vm3115_vm2, %v9226_v16 }
 0x70a   : > { %8747 = vmatpush3.bf16.msra.mxu1 %v5651_v11  ;;  %8777 = vmatpush3.bf16.msra.mxu0 %v5651_v11 }
 0x70b   : > { %8748 = vmatprep.mubr.msk.bf16.mxu1 %vm9369_vm0, %v11285_v13  ;;  %8752 = vmatprep.subr.bf16.mxu1 %v11285_v13 }
 0x70c   : > { %8778 = vmatprep.mubr.msk.bf16.mxu0 %vm9369_vm0, %v11285_v13  ;;  %8788 = vmatprep.subr.bf16.mxu0 %v11285_v13 }
 0x711   : > { %8749 = vmatmul.mubr.msk.bf16.vlgmr.msra.gmra.mxu1 %vm3115_vm2, %v9227_v20  ;;  %8779 = vmatmul.mubr.msk.bf16.vlgmr.msra.gmra.mxu0 %vm3115_vm2, %v9228_v63  ;;  %v9265_v20 = vld [vmem:[%s11235_s13 + $0x130] sm:$0xff]  }
 0x712   : > { %8753 = vmatpush3.bf16.msra.mxu1 %v5651_v11  ;;  %8789 = vmatpush3.bf16.msra.mxu0 %v5651_v11 }
 0x713   : > { %8754 = vmatprep.mubr.msk.bf16.mxu1 %vm9369_vm0, %v11285_v13  ;;  %8758 = vmatprep.subr.bf16.mxu1 %v11285_v13 }
 0x714   : > { %8790 = vmatprep.mubr.msk.bf16.mxu0 %vm9369_vm0, %v11285_v13  ;;  %8365 = vmatprep.subr.bf16.mxu0 %v9243_v1  ;;  %v9267_v1 = vld [vmem:[%s11235_s13 + $0x168] sm:$0xff]  }
 0x719   : > { %8755 = vmatmul.mubr.msk.bf16.vlgmr.msra.gmra.mxu1 %vm3115_vm2, %v9229_v0  ;;  %8791 = vmatmul.mubr.msk.bf16.vlgmr.msra.gmra.mxu0 %vm3115_vm2, %v9233_v2 }
 0x71a   : > { %8759 = vmatpush3.bf16.msra.mxu1 %v5651_v11  ;;  %8760 = vmatprep.mubr.msk.bf16.mxu1 %vm9369_vm0, %v11285_v13 }
 0x71b   : > { %8770 = vmatprep.subr.bf16.mxu1 %v11285_v13  ;;  %8366 = vmatpush3.bf16.msra.mxu0 %v9245_v19 }
 0x71c   : > { %8367 = vmatprep.subr.bf16.mxu0 %v9247_v40  ;;  %v9279_v40 = vld [vmem:[%s11235_s13 + $0x1f0] sm:$0xff]  }
 0x71f   : > { %8368 = vmatpush3.bf16.msra.mxu0 %v9249_v41 }
 0x720   : > { %8369 = vmatprep.subr.bf16.mxu0 %v9251_v30  ;;  %v9281_v30 = vld [vmem:[%s11235_s13 + $0x1b0] sm:$0xff]  }
 0x721   : > { %8761 = vmatmul.mubr.msk.bf16.vlgmr.msra.gmra.mxu1 %vm3115_vm2, %v9230_v23 }
 0x722   : > { %8771 = vmatpush3.bf16.msra.mxu1 %v5651_v11  ;;  %8772 = vmatprep.mubr.msk.bf16.mxu1 %vm9369_vm0, %v11285_v13 }
 0x723   : > { %8782 = vmatprep.subr.bf16.mxu1 %v11285_v13  ;;  %8370 = vmatpush3.bf16.msra.mxu0 %v9253_v42  ;;  %v9283_v42 = vld [vmem:[%s11235_s13 + $0x1e8] sm:$0xff]  }
 0x724   : > { %8371 = vmatprep.subr.bf16.mxu0 %v9255_v45 }
 0x727   : > { %8372 = vmatpush3.bf16.msra.mxu0 %v9257_v50  ;;  %v9285_v50 = vld [vmem:[%s11235_s13 + $0x1a8] sm:$0xff]  }
 0x728   : > { %8373 = vmatprep.subr.bf16.mxu0 %v9258_v56 }
 0x729   : > { %8773 = vmatmul.mubr.msk.bf16.vlgmr.msra.gmra.mxu1 %vm3115_vm2, %v9231_v18  ;;  %v9269_v18 = vld [vmem:[%s11235_s13 + $0x128] sm:$0xff]  }
 0x72a   : > { %8783 = vmatpush3.bf16.msra.mxu1 %v5651_v11  ;;  %8784 = vmatprep.mubr.msk.bf16.mxu1 %vm9369_vm0, %v11285_v13 }
 0x72b   : > { %8343 = vmatprep.subr.bf16.mxu1 %v9234_v22  ;;  %8374 = vmatpush3.bf16.msra.mxu0 %v9260_v43  ;;  %v9287_v43 = vld [vmem:[%s11235_s13 + $0x1e0] sm:$0xff]  }
 0x72c   : > { %8375 = vmatprep.subr.bf16.mxu0 %v9262_v39 }
 0x72f   : > { %8376 = vmatpush3.bf16.msra.mxu0 %v9264_v55 }
 0x730   : > { %8377 = vmatprep.subr.bf16.mxu0 %v9266_v57  ;;  %v9288_v57 = vld [vmem:[%s11235_s13 + $0x100] sm:$0xff]  }
 0x731   : > { %8785 = vmatmul.mubr.msk.bf16.vlgmr.msra.gmra.mxu1 %vm3115_vm2, %v9232_v7  ;;  %v9271_v7 = vld [vmem:[%s11235_s13 + $0x160] sm:$0xff]  }
 0x732   : > { %8344 = vmatpush3.bf16.msra.mxu1 %v9235_v9 }
 0x733   : > { %8345 = vmatprep.subr.bf16.mxu1 %v9236_v15  ;;  %8378 = vmatpush3.bf16.msra.mxu0 %v9268_v52  ;;  %v9289_v52 = vld [vmem:[%s11235_s13 + $0x1a0] sm:$0xff]  }
 0x734   : > { %8379 = vmatprep.subr.bf16.mxu0 %v9270_v48  ;;  %v9290_v48 = vld [vmem:[%s11235_s13 + $0x1d8] sm:$0xff]  }
 0x736   : > { %8346 = vmatpush3.bf16.msra.mxu1 %v9237_v25  ;;  %v9273_v25 = vld [vmem:[%s11235_s13 + $0x120] sm:$0xff]  }
 0x737   : > { %8347 = vmatprep.subr.bf16.mxu1 %v9238_v26  ;;  %8380 = vmatpush3.bf16.msra.mxu0 %v9272_v58 }
 0x738   : > { %8409 = vmatprep.subr.bf16.mxu0 %v9275_v32 }
 0x73a   : > { %8348 = vmatpush3.bf16.msra.mxu1 %v9239_v27  ;;  %v9274_v27 = vld [vmem:[%s11235_s13 + $0x158] sm:$0xff]  }
 0x73b   : > { %8349 = vmatprep.subr.bf16.mxu1 %v9240_v29 }
 0x73e   : > { %8350 = vmatpush3.bf16.msra.mxu1 %v9241_v33 }
 0x73f   : > { %8351 = vmatprep.subr.bf16.mxu1 %v9242_v24  ;;  %v9276_v24 = vld [vmem:[%s11235_s13 + $0x118] sm:$0xff]  }
 0x742   : > { %8352 = vmatpush3.bf16.msra.mxu1 %v9244_v17  ;;  %v9277_v17 = vld [vmem:[%s11235_s13 + $0x1b8] sm:$0xff]  }
 0x743   : > { %8353 = vmatprep.subr.bf16.mxu1 %v9246_v21  ;;  %v9278_v21 = vld [vmem:[%s11235_s13 + $0x150] sm:$0xff]  }
 0x746   : > { %8354 = vmatpush3.bf16.msra.mxu1 %v9248_v31 }
 0x747   : > { %8355 = vmatprep.subr.bf16.mxu1 %v9250_v28  ;;  %v9280_v28 = vld [vmem:[%s11235_s13 + $0x110] sm:$0xff]  }
 0x74a   : > { %8356 = vmatpush3.bf16.msra.mxu1 %v9252_v37  ;;  %v9282_v37 = vld [vmem:[%s11235_s13 + $0x148] sm:$0xff]  }
 0x74b   : > { %8357 = vmatprep.subr.bf16.mxu1 %v9254_v54 }
 0x74e   : > { %8358 = vmatpush3.bf16.msra.mxu1 %v9256_v46  ;;  %v9284_v46 = vld [vmem:[%s11235_s13 + $0x108] sm:$0xff]  }
 0x74f   : > { %8387 = vmatprep.subr.bf16.mxu1 %v9259_v36  ;;  %v9286_v36 = vld [vmem:[%s11235_s13 + $0x140] sm:$0xff]  }
 0x7c9   : > { %v5705_v47 = vpop.f32.mrf.mxu1  ;;  %v11021_v38 = vpop.f32.mrf.mxu0 }
 0x7cb   : > { %v8744_v49 = vpop.f32.mrf.mxu1  ;;  %v8768_v51 = vpop.f32.mrf.mxu0 }
 0x7cc   : > { %v9292_v49 = vld [vmem:[%s11235_s13 + $0x238] sm:$0xff]  }
 0x7cd   : > { %v5708_v53 = vpop.f32.mrf.mxu1  ;;  %v11023_v60 = vpop.f32.mrf.mxu0 }
 0x7ce   : > { %v5712_v8 = vpack.c.bf16 %v5708_v53, %v5705_v47  ;;  %v9291_v47 = vld [vmem:[%s11235_s13 + $0x198] sm:$0xff]   ;;  %v5924_v53 = vpack.c.bf16 %v11023_v60, %v11021_v38  ;;  %v9295_v38 = vld [vmem:[%s11235_s13 + $0x230] sm:$0xff]   ;;  %v9296_v60 = vld [vmem:[%s11235_s13 + $0x1c8] sm:$0xff]  }
 0x7cf   : > { %v8745_v61 = vpop.f32.mrf.mxu1  ;;  %v8769_v34 = vpop.f32.mrf.mxu0 }
 0x7d0   : > { %v9293_v61 = vld [vmem:[%s11235_s13 + $0x1d0] sm:$0xff]  }
 0x7d1   : > { %v5758_v62 = vpop.f32.mrf.mxu1  ;;  %v11025_v5 = vpop.f32.mrf.mxu0 }
 0x7d3   : > { %v8750_v6 = vpop.f32.mrf.mxu1  ;;  %v8780_v44 = vpop.f32.mrf.mxu0 }
 0x7d4   : > { %v9297_v6 = vld [vmem:[%s11235_s13 + $0x188] sm:$0xff]  }
 0x7d5   : > { %v5761_v35 = vpop.f32.mrf.mxu1  ;;  %v11027_v59 = vpop.f32.mrf.mxu0  ;;  %v9298_v44 = vld [vmem:[%s11235_s13 + $0x228] sm:$0xff]  }
 0x7d6   : > { %v5765_v3 = vpack.c.bf16 %v5761_v35, %v5758_v62  ;;  %v9294_v62 = vld [vmem:[%s11235_s13 + $0x190] sm:$0xff]   ;;  %v9299_v35 = vld [vmem:[%s11235_s13 + $0x1c0] sm:$0xff]  }
 0x7d7   : > { %v8751_v10 = vpop.f32.mrf.mxu1  ;;  %v8781_v11 = vpop.f32.mrf.mxu0 }
 0x7d8   : > { %6752 = vmatprep.mubr.bf16.mxu1 %v5765_v3  ;;  %v9300_v3 = vld [vmem:[%s11235_s13 + $0x180] sm:$0xff]   ;;  %v9302_v10 = vld [vmem:[%s11235_s13 + $0x218] sm:$0xff]  }
 0x7d9   : > { %v5811_v14 = vpop.f32.mrf.mxu1  ;;  %6753 = vmatmul.mubr.bf16.vlgmr.msra.gmra.mxu1 %v5712_v8  ;;  %v11035_v16 = vpop.f32.mrf.mxu0  ;;  %v6030_v8 = vpack.c.bf16 %v11027_v59, %v11025_v5  ;;  %v9304_v5 = vld [vmem:[%s11235_s13 + $0x208] sm:$0xff]   ;;  %v9305_v59 = vld [vmem:[%s11235_s13 + $0x200] sm:$0xff]  }
 0x7da   : > { %8388 = vmatpush3.bf16.msra.mxu1 %v9261_v4  ;;  %v9301_v4 = vld [vmem:[%s11235_s13 + $0x220] sm:$0xff]  }
 0x7db   : > { %v8756_v63 = vpop.f32.mrf.mxu1  ;;  %8389 = vmatprep.subr.bf16.mxu1 %v9263_v12  ;;  %v8792_v0 = vpop.f32.mrf.mxu0  ;;  %v9303_v12 = vld [vmem:[%s11235_s13 + $0x210] sm:$0xff]  }
 0x7dd   : > { %v5814_v2 = vpop.f32.mrf.mxu1  ;;  %v11043_v23 = vpop.f32.mrf.mxu0 }
 0x7de   : > { %8390 = vmatpush3.bf16.msra.mxu1 %v9265_v20  ;;  %v5818_v19 = vpack.c.bf16 %v5814_v2, %v5811_v14  ;;  %v6136_v11 = vpack.c.bf16 %v11043_v23, %v11035_v16 }
 0x7df   : > { %v8757_v22 = vpop.f32.mrf.mxu1  ;;  %8391 = vmatprep.subr.bf16.mxu1 %v9267_v1  ;;  %v8793_v9 = vpop.f32.mrf.mxu0 }
 0x7e1   : > { %v5864_v15 = vpop.f32.mrf.mxu1 }
 0x7e2   : > { %8392 = vmatpush3.bf16.msra.mxu1 %v9269_v18 }
 0x7e3   : > { %v8762_v26 = vpop.f32.mrf.mxu1  ;;  %8393 = vmatprep.subr.bf16.mxu1 %v9271_v7 }
 0x7e5   : > { %v5867_v29 = vpop.f32.mrf.mxu1 }
 0x7e6   : > { %v5871_v33 = vpack.c.bf16 %v5867_v29, %v5864_v15  ;;  %8394 = vmatpush3.bf16.msra.mxu1 %v9273_v25 }
 0x7e7   : > { %8395 = vmatprep.subr.bf16.mxu1 %v9274_v27  ;;  %v8763_v31 = vpop.f32.mrf.mxu1 }
 0x7e8   : > { %6793 = vmatprep.mubr.bf16.mxu0 %v5871_v33 }
 0x7e9   : > { %6794 = vmatmul.mubr.bf16.vlgmr.msra.gmra.mxu0 %v5818_v19  ;;  %v5970_v41 = vpop.f32.mrf.mxu1 }
 0x7ea   : > { %8396 = vmatpush3.bf16.msra.mxu1 %v9276_v24  ;;  %8410 = vmatpush3.bf16.msra.mxu0 %v9277_v17 }
 0x7eb   : > { %8397 = vmatprep.subr.bf16.mxu1 %v9278_v21  ;;  %8411 = vmatprep.subr.bf16.mxu0 %v9279_v40  ;;  %v8774_v54 = vpop.f32.mrf.mxu1 }
 0x7ed   : > { %v5973_v45 = vpop.f32.mrf.mxu1 }
 0x7ee   : > { %8398 = vmatpush3.bf16.msra.mxu1 %v9280_v28  ;;  %8412 = vmatpush3.bf16.msra.mxu0 %v9281_v30  ;;  %v5977_v56 = vpack.c.bf16 %v5973_v45, %v5970_v41 }
 0x7ef   : > { %8399 = vmatprep.subr.bf16.mxu1 %v9282_v37  ;;  %8413 = vmatprep.subr.bf16.mxu0 %v9283_v42  ;;  %v8775_v39 = vpop.f32.mrf.mxu1 }
 0x7f0   : > { %6834 = vmatprep.mubr.bf16.mxu1 %v5977_v56 }
 0x7f1   : > { %v6076_v55 = vpop.f32.mrf.mxu1 }
 0x7f2   : > { %8400 = vmatpush3.bf16.msra.mxu1 %v9284_v46  ;;  %8414 = vmatpush3.bf16.msra.mxu0 %v9285_v50 }
 0x7f3   : > { %8401 = vmatprep.subr.bf16.mxu1 %v9286_v36  ;;  %8415 = vmatprep.subr.bf16.mxu0 %v9287_v43  ;;  %v8786_v58 = vpop.f32.mrf.mxu1 }
 0x7f5   : > { %v6079_v32 = vpop.f32.mrf.mxu1 }
 0x7f6   : > { %8402 = vmatpush3.bf16.msra.mxu1 %v9288_v57  ;;  %8416 = vmatpush3.bf16.msra.mxu0 %v9289_v52  ;;  %v6083_v51 = vpack.c.bf16 %v6079_v32, %v6076_v55 }
 0x7f7   : > { %8417 = vmatprep.subr.bf16.mxu0 %v9290_v48  ;;  %8794 = vmatprep.subr.bf16.mxu1 %v11285_v13  ;;  %v8787_v34 = vpop.f32.mrf.mxu1 }
 0x7f8   : > { %6875 = vmatprep.mubr.bf16.mxu0 %v6083_v51 }
 0x7f9   : > { %6835 = vmatmul.mubr.bf16.vlgmr.msra.gmra.mxu1 %v5924_v53 }
 0x7fa   : > { %8418 = vmatpush3.bf16.msra.mxu0 %v9291_v47  ;;  %8795 = vmatpush3.bf16.msra.mxu1 %v9292_v49 }
 0x7fb   : > { %8419 = vmatprep.subr.bf16.mxu0 %v9293_v61  ;;  %8796 = vmatprep.subr.bf16.mxu1 %v11285_v13 }
 0x7fc   : > { %8810 = vmatprep.mubr.msk.bf16.mxu1 %vm9369_vm0, %v11285_v13 }
 0x7fe   : > { %8420 = vmatpush3.bf16.msra.mxu0 %v9294_v62  ;;  %8797 = vmatpush3.bf16.msra.mxu1 %v9295_v38 }
 0x7ff   : > { %8421 = vmatprep.subr.bf16.mxu0 %v9296_v60  ;;  %8798 = vmatprep.subr.bf16.mxu1 %v11285_v13 }
 0x802   : > { %8422 = vmatpush3.bf16.msra.mxu0 %v9297_v6  ;;  %8799 = vmatpush3.bf16.msra.mxu1 %v9298_v44 }
 0x803   : > { %8423 = vmatprep.subr.bf16.mxu0 %v9299_v35  ;;  %8800 = vmatprep.subr.bf16.mxu1 %v11285_v13 }
 0x806   : > { %8424 = vmatpush3.bf16.msra.mxu0 %v9300_v3  ;;  %8801 = vmatpush3.bf16.msra.mxu1 %v9301_v4 }
 0x807   : > { %8802 = vmatprep.subr.bf16.mxu1 %v11285_v13 }
 0x809   : > { %6876 = vmatmul.mubr.bf16.vlgmr.msra.gmra.mxu0 %v6030_v8 }
 0x80a   : > { %8803 = vmatpush3.bf16.msra.mxu1 %v9302_v10 }
 0x80b   : > { %8804 = vmatprep.subr.bf16.mxu1 %v11285_v13 }
 0x80e   : > { %8805 = vmatpush3.bf16.msra.mxu1 %v9303_v12 }
 0x80f   : > { %8806 = vmatprep.subr.bf16.mxu1 %v11285_v13 }
 0x812   : > { %8807 = vmatpush3.bf16.msra.mxu1 %v9304_v5 }
 0x813   : > { %8808 = vmatprep.subr.bf16.mxu1 %v11285_v13 }
 0x816   : > { %8809 = vmatpush3.bf16.msra.mxu1 %v9305_v59 }
 0x819   : > { %8811 = vmatmul.mubr.bf16.vlgmr.msra.gmra.mxu1 %v6136_v11 }
 0x81a   : > { %9319 = shalt.err (!%p9316_p3)
}
 0x81b   : > { %s9320_s21 = scalar_lea.hbm %s11169_s24, 128  ;;  %s9324_s22 = scalar_lea.hbm %s11238_s16, 256 }
 0x81c   : > { %p9321_p4 = scmp.ne.s32.totalorder %s11169_s24, %s9320_s21  ;;  %p9325_p9 = scmp.lt.s32.totalorder %s11169_s24, %s11238_s16 }
 0x81d   : > { %p9326_p10 = scmp.lt.s32.totalorder %s9324_s22, %s9320_s21 }
 0x81e   : > { %p9322_p7 = pnand %p9321_p4, %p9511_p5 }
 0x81f   : > { %p9327_p11 = por %p9326_p10, %p9325_p9 }
 0x820   : > { %p9323_p8 = pneg %p9322_p7 }
 0x822   : > { %p9328_p12 = pnand %p9327_p11, %p9323_p8 }
 0x824   : > { %9331 = shalt.err (!%p9328_p12)
}
 0x825   : > { %s9371_s2 = smov 64   ;;  %s9372_s14 = smov 4  }
 0x826   : > { %8815 = dma.vmem_to_hbm [thread:$0]  (%p9511_p5), %s11171_s26, 128, %s11169_s24, %s11175_s23, %s9371_s2, %s9371_s2, %s9372_s14  }
 0x827   : > { %s11289_s20 = sld [smem:[#allocation22_spill]] }
 0x828   : > { %s11290_s24 = sld [smem:[#allocation23_spill]] }
 0x82d   : > { %v7637_v25 = vld [vmem:[%s11289_s20] ss:$0 sm:$0xff] }
 0x82e   : > { %s649_s23 = scalar_lea.vmem %s11290_s24, %s10542_s19 }
 0x899   : > { %v8359_v13 = vpop.f32.mrf.mxu1 }
 0x89b   : > { %v8360_v16 = vpop.f32.mrf.mxu1 }
 0x89c   : > { %v8361_v15 = vadd.f32 %v8360_v16, %v8359_v13 }
 0x89d   : > { %v8362_v63 = vpop.f32.mrf.mxu1 }
 0x89e   : > { %v6755_v24 = vadd.f32 %v8361_v15, %v7637_v25 }
 0x89f   : > { %v8363_v0 = vpop.f32.mrf.mxu1 }
 0x8a0   : > { %v8364_v27 = vadd.f32 %v8363_v0, %v8362_v63 }
 0x8a2   : > { %v6758_v40 = vadd.f32 %v8364_v27, %v7637_v25 }
 0x8a9   : > { %v8381_v14 = vpop.f32.mrf.mxu0 }
 0x8ab   : > { %v8382_v20 = vpop.f32.mrf.mxu0 }
 0x8ac   : > { %v8383_v29 = vadd.f32 %v8382_v20, %v8381_v14 }
 0x8ad   : > { %v8384_v1 = vpop.f32.mrf.mxu0 }
 0x8ae   : > { %v6796_v31 = vadd.f32 %v8383_v29, %v6755_v24 }
 0x8af   : > { %v8385_v2 = vpop.f32.mrf.mxu0 }
 0x8b0   : > { %v8386_v17 = vadd.f32 %v8385_v2, %v8384_v1 }
 0x8b2   : > { %v6799_v30 = vadd.f32 %v8386_v17, %v6758_v40 }
 0x8b9   : > { %v8403_v23 = vpop.f32.mrf.mxu1 }
 0x8bb   : > { %v8404_v22 = vpop.f32.mrf.mxu1 }
 0x8bc   : > { %v8405_v19 = vadd.f32 %v8404_v22, %v8403_v23 }
 0x8bd   : > { %v8406_v9 = vpop.f32.mrf.mxu1 }
 0x8be   : > { %v6837_v37 = vadd.f32 %v8405_v19, %v6796_v31 }
 0x8bf   : > { %v8407_v33 = vpop.f32.mrf.mxu1 }
 0x8c0   : > { %v8408_v41 = vadd.f32 %v8407_v33, %v8406_v9 }
 0x8c2   : > { %v6840_v45 = vadd.f32 %v8408_v41, %v6799_v30 }
 0x8c9   : > { %v8425_v18 = vpop.f32.mrf.mxu0 }
 0x8cb   : > { %v8426_v7 = vpop.f32.mrf.mxu0 }
 0x8cc   : > { %v8427_v28 = vadd.f32 %v8426_v7, %v8425_v18 }
 0x8cd   : > { %v8428_v26 = vpop.f32.mrf.mxu0 }
 0x8ce   : > { %v6878_v46 = vadd.f32 %v8427_v28, %v6837_v37 }
 0x8cf   : > { %v8429_v21 = vpop.f32.mrf.mxu0 }
 0x8d0   : > { %v8430_v42 = vadd.f32 %v8429_v21, %v8428_v26 }
 0x8d2   : > { %v6881_v36 = vadd.f32 %v8430_v42, %v6840_v45 }
 0x8d9   : > { %v6918_v54 = vpop.f32.mrf.mxu1 }
 0x8da   : > { %v6919_v56 = vadd.f32 %v6918_v54, %v6878_v46 }
 0x8db   : > { %v8812_v50 = vpop.f32.mrf.mxu1 }
 0x8dc   : > { %v6925_v57 = vmax.f32 %v6919_v56, 0.0 }
 0x8dd   : > { %v6921_v43 = vpop.f32.mrf.mxu1 }
 0x8de   : > { %v6922_v39 = vadd.f32 %v6921_v43, %v6881_v36 }
 0x8df   : > { %v8813_v55 = vpop.f32.mrf.mxu1 }
 0x8e0   : > { %v6926_v52 = vmax.f32 %v6922_v39, 0.0 }
 0x8e2   : > { %v7776_v48 = vpack.c.bf16 %v6926_v52, %v6925_v57 }
 0x8e4   : > { %7777 = vst [vmem:[%s649_s23] sm:$0xff] %v7776_v48  }
 0x8e5 PF: > { %s11291_s27 = sld [smem:[#allocation7_spill]] }
 0x8e6   : > { %s11292_s22 = sld [smem:[#allocation5_spill]] }
 0x8eb   : > { %p8821_p5 = scmp.ge.s32.totalorder %s11291_s27, 2 }
 0x8ec   : > { %s7006_s1 = sand.u32 1, %s11292_s22  }
 0x8ed   : > { %p8818_p13 = pnand %p8821_p5, %p9515_p6  ;;  %s7007_s2 = scalar_lea.sflag [#allocation3], %s7006_s1 }
 0x8ef   : > { %p8819_p0 = pneg %p8818_p13 }
 0x8f1   : > { %9349 = dma.done.wait (%p8819_p0), %s7007_s2, 128  }
 0x8f2   : > { %9351 = vsyncadd (%p8819_p0), %s7007_s2, 4294967168  ;;  %s11294_s21 = sld [smem:[#allocation8_spill]]  ;;  %s11297_s0 = smov %s9358_s30 }
 0x8f3   : > { %s11295_s14 = sld [smem:[#allocation6_spill]] }
 0x8f4   : > { %s11296_s20 = sld [smem:[#allocation9_spill]] }
 0x8f8   : > { %p30_p1 = scmp.ge.s32.totalorder %s11294_s21, 4  }
 0x8f9   : > { %s11298_s30 = smov %s11295_s14 }
 0x8fa   :  { %32 = sbr.rel (!%p30_p1) target bundleno = 10 (0xa), region = 195 }
 0x8ff   :  { %7036 = vsyncpa [#allocation3], 1 }
 0x900   :  { %7038 = vsyncpa [#allocation3 + $0x1], 1 }

</bundles_post_ra>
